<compile_context>
chip_gen: v7x
topology: tpu7x:2x2x1
jax: 0.10.0
libtpu: 0.0.40
codegen_flags: <defaults>
</compile_context>

<pallas_src>
import functools

import numpy as np
import jax
import jax.numpy as jnp
from jax import lax
from jax.experimental import pallas as pl
from jax.experimental.pallas import tpu as pltpu


# ----------------------------------------------------------------------------
# Fused ResidualBlock kernel:
#   out = x + BN2(conv2(relu(BN1(conv1(x)))))        (+ optional final ReLU)
# ----------------------------------------------------------------------------
def residual_block_kernel(x_ref, w1_ref, s1_ref, b1_ref, w2_ref, s2_ref,
                          b2_ref, out_ref,
                          acc_ref, pad_c_ref, pad_l_ref, pad_r_ref,
                          *, H, W, C, final_relu):
    # x_ref:   (1, H, W, C)      activation block (one batch element)
    # w*_ref:  (9, C, C) bf16    conv weights, tap-major (dy*3 + dx)
    # s*_ref:  (1, C) f32        folded BN scale
    # b*_ref:  (1, C) f32        folded BN bias (includes conv bias)
    # out_ref: (1, H, W, C)
    # acc_ref: (H*W, C) f32      VMEM accumulator (MXU output tile)
    # pad_*:   (H+2, W, C) bf16  H-padded, column-shifted input copies
    M = H * W

    # Zero only the 1-wide halo (rows 0 / H+1 and the wrap-around column of
    # the shifted copies).  Done every grid step so the kernel stays correct
    # even when the batch axis is split across TensorCores.
    zrow = jnp.zeros((1, W, C), jnp.bfloat16)
    zcol = jnp.zeros((H, 1, C), jnp.bfloat16)
    for buf in (pad_c_ref, pad_l_ref, pad_r_ref):
        buf[0:1] = zrow
        buf[H + 1:H + 2] = zrow
    pad_l_ref[1:H + 1, W - 1:W] = zcol
    pad_r_ref[1:H + 1, 0:1] = zcol

    def fill_shift_buffers(a):
        # a: (H, W, C); store bf16 copies shifted by dx = 0, +1, -1 along W.
        a16 = a.astype(jnp.bfloat16)
        pad_c_ref[1:H + 1] = a16                     # x[h, w]
        pad_l_ref[1:H + 1, 0:W - 1] = a16[:, 1:W]    # x[h, w + 1]
        pad_r_ref[1:H + 1, 1:W] = a16[:, 0:W - 1]    # x[h, w - 1]

    def conv3x3_bn(w_ref, scale_ref, bias_ref):
        # out[h, w, :] = sum_{dy, dx} x[h+dy-1, w+dx-1, :] @ w[dy, dx]
        taps = [(dy, dx, buf)
                for dy in range(3)
                for dx, buf in ((0, pad_r_ref), (1, pad_c_ref), (2, pad_l_ref))]
        for idx, (dy, dx, buf) in enumerate(taps):
            patch = buf[dy:dy + H].reshape(M, C)        # aligned row slice
            part = jnp.dot(patch, w_ref[dy * 3 + dx],   # bf16 x bf16 -> f32
                           preferred_element_type=jnp.float32)
            if idx == 0:
                acc_ref[...] = part
            else:
                acc_ref[...] += part
        return acc_ref[...] * scale_ref[...] + bias_ref[...]

    # conv1 + BN + ReLU; intermediate activation stays in VMEM.
    fill_shift_buffers(x_ref[0])
    h = jnp.maximum(conv3x3_bn(w1_ref, s1_ref, b1_ref), 0.0)

    # conv2 + BN + residual add (+ fused final FSRGenerator ReLU).
    fill_shift_buffers(h.reshape(H, W, C))
    y = x_ref[0].reshape(M, C).astype(jnp.float32) + conv3x3_bn(
        w2_ref, s2_ref, b2_ref)
    if final_relu:
        y = jnp.maximum(y, 0.0)
    out_ref[0] = y.reshape(H, W, C).astype(out_ref.dtype)


def residual_block(x, w1, s1, b1, w2, s2, b2, *, final_relu):
    """One ResidualBlock.  x: (B, H, W, C) NHWC, w*: (3, 3, C, C)."""
    B, H, W, C = x.shape
    assert W % 8 == 0 and C % 128 == 0, (
        "shapes are chosen lane/sublane aligned; general shapes need padding")

    def prep_w(w):                       # bf16 MXU operand, bf16 HBM->VMEM DMA
        return w.reshape(9, C, C).astype(jnp.bfloat16)

    def prep_v(v):
        return v.reshape(1, C).astype(jnp.float32)

    kernel = functools.partial(residual_block_kernel, H=H, W=W, C=C,
                               final_relu=final_relu)
    act_spec = pl.BlockSpec((1, H, W, C), lambda b: (b, 0, 0, 0))
    # Constant operands: whole-array VMEM residents, not pipelined /
    # double-buffered per grid step.
    resident = pl.BlockSpec(memory_space=pltpu.MemorySpace.VMEM)

    return pl.pallas_call(
        kernel,
        out_shape=jax.ShapeDtypeStruct((B, H, W, C), x.dtype),
        grid=(B,),
        in_specs=[act_spec, resident, resident, resident,
                  resident, resident, resident],
        out_specs=pl.BlockSpec((1, H, W, C), lambda b: (b, 0, 0, 0)),
        scratch_shapes=[
            pltpu.VMEM((H * W, C), jnp.float32),       # accumulator tile
            pltpu.VMEM((H + 2, W, C), jnp.bfloat16),   # dx = 0 taps
            pltpu.VMEM((H + 2, W, C), jnp.bfloat16),   # dx = +1 taps
            pltpu.VMEM((H + 2, W, C), jnp.bfloat16),   # dx = -1 taps
        ],
        compiler_params=pltpu.CompilerParams(
            dimension_semantics=("parallel",),
            vmem_limit_bytes=32 * 1024 * 1024,
        ),
    )(x, prep_w(w1), prep_v(s1), prep_v(b1),
      prep_w(w2), prep_v(s2), prep_v(b2))


# ----------------------------------------------------------------------------
# Parameter construction (deterministic, matching __init__ / init_weights).
# ----------------------------------------------------------------------------
def make_params(key, in_channels, num_block, bn_eps=0.8):
    params = []
    for _ in range(num_block):
        block = []
        for _ in range(2):               # two conv+BN per ResidualBlock
            key, kw, kb = jax.random.split(key, 3)
            fan_in = in_channels * 9
            w = jax.random.normal(
                kw, (3, 3, in_channels, in_channels), jnp.float32
            ) * np.sqrt(2.0 / fan_in)
            conv_bias = jax.random.normal(kb, (in_channels,), jnp.float32) * 0.01
            # BN per constant_init(1): gamma=1, beta=0, running mean=0, var=1.
            gamma = jnp.ones((in_channels,), jnp.float32)
            beta = jnp.zeros((in_channels,), jnp.float32)
            mean = jnp.zeros((in_channels,), jnp.float32)
            var = jnp.ones((in_channels,), jnp.float32)
            scale = gamma / jnp.sqrt(var + bn_eps)
            bias = beta - mean * scale + scale * conv_bias
            block.append((w, scale, bias))
        params.append(block)
    return params


# ----------------------------------------------------------------------------
# FSRGenerator forward (Pallas) and pure-JAX f32 reference.
# ----------------------------------------------------------------------------
def fsr_generator_forward_pallas(pooled_regions_sub, pooled_regions, params):
    # torch.cat((pooled_regions, pooled_regions_sub), dim=1) -> channel axis.
    feat = jnp.concatenate([pooled_regions, pooled_regions_sub], axis=-1)
    x = feat
    n = len(params)
    for i, ((w1, s1, b1), (w2, s2, b2)) in enumerate(params):
        # Final FSRGenerator ReLU is fused into the last block (commutes with
        # the trailing channel slice).
        x = residual_block(x, w1, s1, b1, w2, s2, b2, final_relu=(i == n - 1))
    if n == 0:
        x = jnp.maximum(x, 0.0)
    c = min(1024, x.shape[-1])
    return x[..., :c]


def _conv_bn_ref(x, w, scale, bias):
    y = lax.conv_general_dilated(
        x, w, window_strides=(1, 1), padding="SAME",
        dimension_numbers=("NHWC", "HWIO", "NHWC"),
        precision=lax.Precision.HIGHEST)
    return y * scale.reshape(1, 1, 1, -1) + bias.reshape(1, 1, 1, -1)


def fsr_generator_forward_ref(pooled_regions_sub, pooled_regions, params):
    feat = jnp.concatenate([pooled_regions, pooled_regions_sub], axis=-1)
    x = feat
    for (w1, s1, b1), (w2, s2, b2) in params:
        h = jnp.maximum(_conv_bn_ref(x, w1, s1, b1), 0.0)
        x = x + _conv_bn_ref(h, w2, s2, b2)
    c = min(1024, x.shape[-1])
    return jnp.maximum(x[..., :c], 0.0)


# ----------------------------------------------------------------------------
if __name__ == "__main__":
    B, H, W = 2, 16, 16
    C_sub, C_main = 64, 64            # concat -> 128 channels (lane-dense)
    in_channels = C_sub + C_main
    num_block = 2

    key = jax.random.PRNGKey(0)
    k1, k2, kp = jax.random.split(key, 3)
    pooled_regions_sub = jax.random.normal(k1, (B, H, W, C_sub), jnp.float32)
    pooled_regions = jax.random.normal(k2, (B, H, W, C_main), jnp.float32)

    params = make_params(kp, in_channels, num_block)

    out = fsr_generator_forward_pallas(pooled_regions_sub, pooled_regions,
                                       params)
    out = jax.block_until_ready(out)

    ref = fsr_generator_forward_ref(pooled_regions_sub, pooled_regions, params)
    ref = jax.block_until_ready(ref)

    # bf16 MXU operands (per perf review) => loosened tolerance vs f32 ref.
    np.testing.assert_allclose(np.asarray(out), np.asarray(ref),
                               rtol=2e-2, atol=1e-1)
    print("KERNEL_OK")
</pallas_src>

<mosaic_0001>
module attributes {stable_mosaic.version = 11 : i64} {
  func.func @residual_block_kernel(%arg0: i32, %arg1: memref<1x16x16x128xf32, #tpu.memory_space<vmem>>, %arg2: memref<9x128x128xbf16, #tpu.memory_space<vmem>>, %arg3: memref<1x128xf32, #tpu.memory_space<vmem>>, %arg4: memref<1x128xf32, #tpu.memory_space<vmem>>, %arg5: memref<9x128x128xbf16, #tpu.memory_space<vmem>>, %arg6: memref<1x128xf32, #tpu.memory_space<vmem>>, %arg7: memref<1x128xf32, #tpu.memory_space<vmem>>, %arg8: memref<1x16x16x128xf32, #tpu.memory_space<vmem>>, %arg9: memref<256x128xf32, #tpu.memory_space<vmem>>, %arg10: memref<18x16x128xbf16, #tpu.memory_space<vmem>>, %arg11: memref<18x16x128xbf16, #tpu.memory_space<vmem>>, %arg12: memref<18x16x128xbf16, #tpu.memory_space<vmem>>) attributes {dimension_semantics = [#tpu.dimension_semantics<parallel>], iteration_bounds = array<i64: 2>, scalar_prefetch = 0 : i64, scratch_operands = 4 : i64, tpu.core_type = #tpu.core_type<tc>, window_params = [{transform_indices = @transform_0, window_bounds = array<i64: 1, 16, 16, 128>}, {pipeline_mode = #tpu.pipeline_mode<synchronous>, transform_indices = @transform_1, window_bounds = array<i64: 9, 128, 128>}, {pipeline_mode = #tpu.pipeline_mode<synchronous>, transform_indices = @transform_2, window_bounds = array<i64: 1, 128>}, {pipeline_mode = #tpu.pipeline_mode<synchronous>, transform_indices = @transform_3, window_bounds = array<i64: 1, 128>}, {pipeline_mode = #tpu.pipeline_mode<synchronous>, transform_indices = @transform_4, window_bounds = array<i64: 9, 128, 128>}, {pipeline_mode = #tpu.pipeline_mode<synchronous>, transform_indices = @transform_5, window_bounds = array<i64: 1, 128>}, {pipeline_mode = #tpu.pipeline_mode<synchronous>, transform_indices = @transform_6, window_bounds = array<i64: 1, 128>}, {transform_indices = @transform_7, window_bounds = array<i64: 1, 16, 16, 128>}]} {
    %cst = arith.constant 0.000000e+00 : bf16
    %0 = vector.broadcast %cst : bf16 to vector<1x16x128xbf16>
    %cst_0 = arith.constant 0.000000e+00 : bf16
    %1 = vector.broadcast %cst_0 : bf16 to vector<16x1x128xbf16>
    %c0 = arith.constant 0 : index
    %c0_1 = arith.constant 0 : index
    %c0_2 = arith.constant 0 : index
    %2 = vector.load %arg10[%c0, %c0_1, %c0_2] : memref<18x16x128xbf16, #tpu.memory_space<vmem>>, vector<1x16x128xbf16>
    tpu.vector_store %arg10[%c0, %c0_1, %c0_2], %0 {strides = array<i32>} : memref<18x16x128xbf16, #tpu.memory_space<vmem>>, vector<1x16x128xbf16>,
    %c17 = arith.constant 17 : index
    %c0_3 = arith.constant 0 : index
    %c0_4 = arith.constant 0 : index
    %3 = vector.load %arg10[%c17, %c0_3, %c0_4] : memref<18x16x128xbf16, #tpu.memory_space<vmem>>, vector<1x16x128xbf16>
    tpu.vector_store %arg10[%c17, %c0_3, %c0_4], %0 {strides = array<i32>} : memref<18x16x128xbf16, #tpu.memory_space<vmem>>, vector<1x16x128xbf16>,
    %c0_5 = arith.constant 0 : index
    %c0_6 = arith.constant 0 : index
    %c0_7 = arith.constant 0 : index
    %4 = vector.load %arg11[%c0_5, %c0_6, %c0_7] : memref<18x16x128xbf16, #tpu.memory_space<vmem>>, vector<1x16x128xbf16>
    tpu.vector_store %arg11[%c0_5, %c0_6, %c0_7], %0 {strides = array<i32>} : memref<18x16x128xbf16, #tpu.memory_space<vmem>>, vector<1x16x128xbf16>,
    %c17_8 = arith.constant 17 : index
    %c0_9 = arith.constant 0 : index
    %c0_10 = arith.constant 0 : index
    %5 = vector.load %arg11[%c17_8, %c0_9, %c0_10] : memref<18x16x128xbf16, #tpu.memory_space<vmem>>, vector<1x16x128xbf16>
    tpu.vector_store %arg11[%c17_8, %c0_9, %c0_10], %0 {strides = array<i32>} : memref<18x16x128xbf16, #tpu.memory_space<vmem>>, vector<1x16x128xbf16>,
    %c0_11 = arith.constant 0 : index
    %c0_12 = arith.constant 0 : index
    %c0_13 = arith.constant 0 : index
    %6 = vector.load %arg12[%c0_11, %c0_12, %c0_13] : memref<18x16x128xbf16, #tpu.memory_space<vmem>>, vector<1x16x128xbf16>
    tpu.vector_store %arg12[%c0_11, %c0_12, %c0_13], %0 {strides = array<i32>} : memref<18x16x128xbf16, #tpu.memory_space<vmem>>, vector<1x16x128xbf16>,
    %c17_14 = arith.constant 17 : index
    %c0_15 = arith.constant 0 : index
    %c0_16 = arith.constant 0 : index
    %7 = vector.load %arg12[%c17_14, %c0_15, %c0_16] : memref<18x16x128xbf16, #tpu.memory_space<vmem>>, vector<1x16x128xbf16>
    tpu.vector_store %arg12[%c17_14, %c0_15, %c0_16], %0 {strides = array<i32>} : memref<18x16x128xbf16, #tpu.memory_space<vmem>>, vector<1x16x128xbf16>,
    %c1 = arith.constant 1 : index
    %c15 = arith.constant 15 : index
    %c0_17 = arith.constant 0 : index
    %8 = vector.load %arg11[%c1, %c15, %c0_17] : memref<18x16x128xbf16, #tpu.memory_space<vmem>>, vector<16x1x128xbf16>
    tpu.vector_store %arg11[%c1, %c15, %c0_17], %1 {strides = array<i32>} : memref<18x16x128xbf16, #tpu.memory_space<vmem>>, vector<16x1x128xbf16>,
    %c1_18 = arith.constant 1 : index
    %c0_19 = arith.constant 0 : index
    %c0_20 = arith.constant 0 : index
    %9 = vector.load %arg12[%c1_18, %c0_19, %c0_20] : memref<18x16x128xbf16, #tpu.memory_space<vmem>>, vector<16x1x128xbf16>
    tpu.vector_store %arg12[%c1_18, %c0_19, %c0_20], %1 {strides = array<i32>} : memref<18x16x128xbf16, #tpu.memory_space<vmem>>, vector<16x1x128xbf16>,
    %c0_21 = arith.constant 0 : index
    %c0_22 = arith.constant 0 : index
    %c0_23 = arith.constant 0 : index
    %c0_24 = arith.constant 0 : index
    %10 = vector.load %arg1[%c0_21, %c0_22, %c0_23, %c0_24] : memref<1x16x16x128xf32, #tpu.memory_space<vmem>>, vector<1x16x16x128xf32>
    %11 = vector.shape_cast %10 : vector<1x16x16x128xf32> to vector<16x16x128xf32>
    %12 = arith.truncf %11 : vector<16x16x128xf32> to vector<16x16x128xbf16>
    %c1_25 = arith.constant 1 : index
    %c0_26 = arith.constant 0 : index
    %c0_27 = arith.constant 0 : index
    %13 = vector.load %arg10[%c1_25, %c0_26, %c0_27] : memref<18x16x128xbf16, #tpu.memory_space<vmem>>, vector<16x16x128xbf16>
    tpu.vector_store %arg10[%c1_25, %c0_26, %c0_27], %12 {strides = array<i32>} : memref<18x16x128xbf16, #tpu.memory_space<vmem>>, vector<16x16x128xbf16>,
    %14 = vector.extract_strided_slice %12 {offsets = [0, 1, 0], sizes = [16, 15, 128], strides = [1, 1, 1]} : vector<16x16x128xbf16> to vector<16x15x128xbf16>
    %c1_28 = arith.constant 1 : index
    %c0_29 = arith.constant 0 : index
    %c0_30 = arith.constant 0 : index
    %15 = vector.load %arg11[%c1_28, %c0_29, %c0_30] : memref<18x16x128xbf16, #tpu.memory_space<vmem>>, vector<16x15x128xbf16>
    tpu.vector_store %arg11[%c1_28, %c0_29, %c0_30], %14 {strides = array<i32>} : memref<18x16x128xbf16, #tpu.memory_space<vmem>>, vector<16x15x128xbf16>,
    %16 = vector.extract_strided_slice %12 {offsets = [0, 0, 0], sizes = [16, 15, 128], strides = [1, 1, 1]} : vector<16x16x128xbf16> to vector<16x15x128xbf16>
    %c1_31 = arith.constant 1 : index
    %c1_32 = arith.constant 1 : index
    %c0_33 = arith.constant 0 : index
    %17 = vector.load %arg12[%c1_31, %c1_32, %c0_33] : memref<18x16x128xbf16, #tpu.memory_space<vmem>>, vector<16x15x128xbf16>
    tpu.vector_store %arg12[%c1_31, %c1_32, %c0_33], %16 {strides = array<i32>} : memref<18x16x128xbf16, #tpu.memory_space<vmem>>, vector<16x15x128xbf16>,
    %c0_34 = arith.constant 0 : index
    %c0_35 = arith.constant 0 : index
    %c0_36 = arith.constant 0 : index
    %18 = vector.load %arg12[%c0_34, %c0_35, %c0_36] : memref<18x16x128xbf16, #tpu.memory_space<vmem>>, vector<16x16x128xbf16>
    %19 = vector.shape_cast %18 : vector<16x16x128xbf16> to vector<256x128xbf16>
    %c0_37 = arith.constant 0 : index
    %c0_38 = arith.constant 0 : index
    %c0_39 = arith.constant 0 : index
    %20 = vector.load %arg2[%c0_37, %c0_38, %c0_39] : memref<9x128x128xbf16, #tpu.memory_space<vmem>>, vector<1x128x128xbf16>
    %21 = vector.shape_cast %20 : vector<1x128x128xbf16> to vector<128x128xbf16>
    %cst_40 = arith.constant dense<0.000000e+00> : vector<256x128xf32>
    %22 = tpu.matmul %19, %21, %cst_40 {dimension_numbers = #tpu.dot_dimension_numbers<[1], [0], [0], [1], [0, 0, 1, 1], [], []>} : vector<256x128xbf16>, vector<128x128xbf16>, vector<256x128xf32> -> vector<256x128xf32>
    %c0_41 = arith.constant 0 : index
    %c0_42 = arith.constant 0 : index
    %23 = vector.load %arg9[%c0_41, %c0_42] : memref<256x128xf32, #tpu.memory_space<vmem>>, vector<256x128xf32>
    tpu.vector_store %arg9[%c0_41, %c0_42], %22 {strides = array<i32>} : memref<256x128xf32, #tpu.memory_space<vmem>>, vector<256x128xf32>,
    %c0_43 = arith.constant 0 : index
    %c0_44 = arith.constant 0 : index
    %c0_45 = arith.constant 0 : index
    %24 = vector.load %arg10[%c0_43, %c0_44, %c0_45] : memref<18x16x128xbf16, #tpu.memory_space<vmem>>, vector<16x16x128xbf16>
    %25 = vector.shape_cast %24 : vector<16x16x128xbf16> to vector<256x128xbf16>
    %c1_46 = arith.constant 1 : index
    %c0_47 = arith.constant 0 : index
    %c0_48 = arith.constant 0 : index
    %26 = vector.load %arg2[%c1_46, %c0_47, %c0_48] : memref<9x128x128xbf16, #tpu.memory_space<vmem>>, vector<1x128x128xbf16>
    %27 = vector.shape_cast %26 : vector<1x128x128xbf16> to vector<128x128xbf16>
    %cst_49 = arith.constant dense<0.000000e+00> : vector<256x128xf32>
    %28 = tpu.matmul %25, %27, %cst_49 {dimension_numbers = #tpu.dot_dimension_numbers<[1], [0], [0], [1], [0, 0, 1, 1], [], []>} : vector<256x128xbf16>, vector<128x128xbf16>, vector<256x128xf32> -> vector<256x128xf32>
    %c0_50 = arith.constant 0 : index
    %c0_51 = arith.constant 0 : index
    %29 = vector.load %arg9[%c0_50, %c0_51] : memref<256x128xf32, #tpu.memory_space<vmem>>, vector<256x128xf32>
    %30 = arith.addf %29, %28 : vector<256x128xf32>
    %c0_52 = arith.constant 0 : index
    %c0_53 = arith.constant 0 : index
    %31 = vector.load %arg9[%c0_52, %c0_53] : memref<256x128xf32, #tpu.memory_space<vmem>>, vector<256x128xf32>
    tpu.vector_store %arg9[%c0_52, %c0_53], %30 {strides = array<i32>} : memref<256x128xf32, #tpu.memory_space<vmem>>, vector<256x128xf32>,
    %c0_54 = arith.constant 0 : index
    %c0_55 = arith.constant 0 : index
    %c0_56 = arith.constant 0 : index
    %32 = vector.load %arg11[%c0_54, %c0_55, %c0_56] : memref<18x16x128xbf16, #tpu.memory_space<vmem>>, vector<16x16x128xbf16>
    %33 = vector.shape_cast %32 : vector<16x16x128xbf16> to vector<256x128xbf16>
    %c2 = arith.constant 2 : index
    %c0_57 = arith.constant 0 : index
    %c0_58 = arith.constant 0 : index
    %34 = vector.load %arg2[%c2, %c0_57, %c0_58] : memref<9x128x128xbf16, #tpu.memory_space<vmem>>, vector<1x128x128xbf16>
    %35 = vector.shape_cast %34 : vector<1x128x128xbf16> to vector<128x128xbf16>
    %cst_59 = arith.constant dense<0.000000e+00> : vector<256x128xf32>
    %36 = tpu.matmul %33, %35, %cst_59 {dimension_numbers = #tpu.dot_dimension_numbers<[1], [0], [0], [1], [0, 0, 1, 1], [], []>} : vector<256x128xbf16>, vector<128x128xbf16>, vector<256x128xf32> -> vector<256x128xf32>
    %c0_60 = arith.constant 0 : index
    %c0_61 = arith.constant 0 : index
    %37 = vector.load %arg9[%c0_60, %c0_61] : memref<256x128xf32, #tpu.memory_space<vmem>>, vector<256x128xf32>
    %38 = arith.addf %37, %36 : vector<256x128xf32>
    %c0_62 = arith.constant 0 : index
    %c0_63 = arith.constant 0 : index
    %39 = vector.load %arg9[%c0_62, %c0_63] : memref<256x128xf32, #tpu.memory_space<vmem>>, vector<256x128xf32>
    tpu.vector_store %arg9[%c0_62, %c0_63], %38 {strides = array<i32>} : memref<256x128xf32, #tpu.memory_space<vmem>>, vector<256x128xf32>,
    %c1_64 = arith.constant 1 : index
    %c0_65 = arith.constant 0 : index
    %c0_66 = arith.constant 0 : index
    %40 = vector.load %arg12[%c1_64, %c0_65, %c0_66] : memref<18x16x128xbf16, #tpu.memory_space<vmem>>, vector<16x16x128xbf16>
    %41 = vector.shape_cast %40 : vector<16x16x128xbf16> to vector<256x128xbf16>
    %c3 = arith.constant 3 : index
    %c0_67 = arith.constant 0 : index
    %c0_68 = arith.constant 0 : index
    %42 = vector.load %arg2[%c3, %c0_67, %c0_68] : memref<9x128x128xbf16, #tpu.memory_space<vmem>>, vector<1x128x128xbf16>
    %43 = vector.shape_cast %42 : vector<1x128x128xbf16> to vector<128x128xbf16>
    %cst_69 = arith.constant dense<0.000000e+00> : vector<256x128xf32>
    %44 = tpu.matmul %41, %43, %cst_69 {dimension_numbers = #tpu.dot_dimension_numbers<[1], [0], [0], [1], [0, 0, 1, 1], [], []>} : vector<256x128xbf16>, vector<128x128xbf16>, vector<256x128xf32> -> vector<256x128xf32>
    %c0_70 = arith.constant 0 : index
    %c0_71 = arith.constant 0 : index
    %45 = vector.load %arg9[%c0_70, %c0_71] : memref<256x128xf32, #tpu.memory_space<vmem>>, vector<256x128xf32>
    %46 = arith.addf %45, %44 : vector<256x128xf32>
    %c0_72 = arith.constant 0 : index
    %c0_73 = arith.constant 0 : index
    %47 = vector.load %arg9[%c0_72, %c0_73] : memref<256x128xf32, #tpu.memory_space<vmem>>, vector<256x128xf32>
    tpu.vector_store %arg9[%c0_72, %c0_73], %46 {strides = array<i32>} : memref<256x128xf32, #tpu.memory_space<vmem>>, vector<256x128xf32>,
    %c1_74 = arith.constant 1 : index
    %c0_75 = arith.constant 0 : index
    %c0_76 = arith.constant 0 : index
    %48 = vector.load %arg10[%c1_74, %c0_75, %c0_76] : memref<18x16x128xbf16, #tpu.memory_space<vmem>>, vector<16x16x128xbf16>
    %49 = vector.shape_cast %48 : vector<16x16x128xbf16> to vector<256x128xbf16>
    %c4 = arith.constant 4 : index
    %c0_77 = arith.constant 0 : index
    %c0_78 = arith.constant 0 : index
    %50 = vector.load %arg2[%c4, %c0_77, %c0_78] : memref<9x128x128xbf16, #tpu.memory_space<vmem>>, vector<1x128x128xbf16>
    %51 = vector.shape_cast %50 : vector<1x128x128xbf16> to vector<128x128xbf16>
    %cst_79 = arith.constant dense<0.000000e+00> : vector<256x128xf32>
    %52 = tpu.matmul %49, %51, %cst_79 {dimension_numbers = #tpu.dot_dimension_numbers<[1], [0], [0], [1], [0, 0, 1, 1], [], []>} : vector<256x128xbf16>, vector<128x128xbf16>, vector<256x128xf32> -> vector<256x128xf32>
    %c0_80 = arith.constant 0 : index
    %c0_81 = arith.constant 0 : index
    %53 = vector.load %arg9[%c0_80, %c0_81] : memref<256x128xf32, #tpu.memory_space<vmem>>, vector<256x128xf32>
    %54 = arith.addf %53, %52 : vector<256x128xf32>
    %c0_82 = arith.constant 0 : index
    %c0_83 = arith.constant 0 : index
    %55 = vector.load %arg9[%c0_82, %c0_83] : memref<256x128xf32, #tpu.memory_space<vmem>>, vector<256x128xf32>
    tpu.vector_store %arg9[%c0_82, %c0_83], %54 {strides = array<i32>} : memref<256x128xf32, #tpu.memory_space<vmem>>, vector<256x128xf32>,
    %c1_84 = arith.constant 1 : index
    %c0_85 = arith.constant 0 : index
    %c0_86 = arith.constant 0 : index
    %56 = vector.load %arg11[%c1_84, %c0_85, %c0_86] : memref<18x16x128xbf16, #tpu.memory_space<vmem>>, vector<16x16x128xbf16>
    %57 = vector.shape_cast %56 : vector<16x16x128xbf16> to vector<256x128xbf16>
    %c5 = arith.constant 5 : index
    %c0_87 = arith.constant 0 : index
    %c0_88 = arith.constant 0 : index
    %58 = vector.load %arg2[%c5, %c0_87, %c0_88] : memref<9x128x128xbf16, #tpu.memory_space<vmem>>, vector<1x128x128xbf16>
    %59 = vector.shape_cast %58 : vector<1x128x128xbf16> to vector<128x128xbf16>
    %cst_89 = arith.constant dense<0.000000e+00> : vector<256x128xf32>
    %60 = tpu.matmul %57, %59, %cst_89 {dimension_numbers = #tpu.dot_dimension_numbers<[1], [0], [0], [1], [0, 0, 1, 1], [], []>} : vector<256x128xbf16>, vector<128x128xbf16>, vector<256x128xf32> -> vector<256x128xf32>
    %c0_90 = arith.constant 0 : index
    %c0_91 = arith.constant 0 : index
    %61 = vector.load %arg9[%c0_90, %c0_91] : memref<256x128xf32, #tpu.memory_space<vmem>>, vector<256x128xf32>
    %62 = arith.addf %61, %60 : vector<256x128xf32>
    %c0_92 = arith.constant 0 : index
    %c0_93 = arith.constant 0 : index
    %63 = vector.load %arg9[%c0_92, %c0_93] : memref<256x128xf32, #tpu.memory_space<vmem>>, vector<256x128xf32>
    tpu.vector_store %arg9[%c0_92, %c0_93], %62 {strides = array<i32>} : memref<256x128xf32, #tpu.memory_space<vmem>>, vector<256x128xf32>,
    %c2_94 = arith.constant 2 : index
    %c0_95 = arith.constant 0 : index
    %c0_96 = arith.constant 0 : index
    %64 = vector.load %arg12[%c2_94, %c0_95, %c0_96] : memref<18x16x128xbf16, #tpu.memory_space<vmem>>, vector<16x16x128xbf16>
    %65 = vector.shape_cast %64 : vector<16x16x128xbf16> to vector<256x128xbf16>
    %c6 = arith.constant 6 : index
    %c0_97 = arith.constant 0 : index
    %c0_98 = arith.constant 0 : index
    %66 = vector.load %arg2[%c6, %c0_97, %c0_98] : memref<9x128x128xbf16, #tpu.memory_space<vmem>>, vector<1x128x128xbf16>
    %67 = vector.shape_cast %66 : vector<1x128x128xbf16> to vector<128x128xbf16>
    %cst_99 = arith.constant dense<0.000000e+00> : vector<256x128xf32>
    %68 = tpu.matmul %65, %67, %cst_99 {dimension_numbers = #tpu.dot_dimension_numbers<[1], [0], [0], [1], [0, 0, 1, 1], [], []>} : vector<256x128xbf16>, vector<128x128xbf16>, vector<256x128xf32> -> vector<256x128xf32>
    %c0_100 = arith.constant 0 : index
    %c0_101 = arith.constant 0 : index
    %69 = vector.load %arg9[%c0_100, %c0_101] : memref<256x128xf32, #tpu.memory_space<vmem>>, vector<256x128xf32>
    %70 = arith.addf %69, %68 : vector<256x128xf32>
    %c0_102 = arith.constant 0 : index
    %c0_103 = arith.constant 0 : index
    %71 = vector.load %arg9[%c0_102, %c0_103] : memref<256x128xf32, #tpu.memory_space<vmem>>, vector<256x128xf32>
    tpu.vector_store %arg9[%c0_102, %c0_103], %70 {strides = array<i32>} : memref<256x128xf32, #tpu.memory_space<vmem>>, vector<256x128xf32>,
    %c2_104 = arith.constant 2 : index
    %c0_105 = arith.constant 0 : index
    %c0_106 = arith.constant 0 : index
    %72 = vector.load %arg10[%c2_104, %c0_105, %c0_106] : memref<18x16x128xbf16, #tpu.memory_space<vmem>>, vector<16x16x128xbf16>
    %73 = vector.shape_cast %72 : vector<16x16x128xbf16> to vector<256x128xbf16>
    %c7 = arith.constant 7 : index
    %c0_107 = arith.constant 0 : index
    %c0_108 = arith.constant 0 : index
    %74 = vector.load %arg2[%c7, %c0_107, %c0_108] : memref<9x128x128xbf16, #tpu.memory_space<vmem>>, vector<1x128x128xbf16>
    %75 = vector.shape_cast %74 : vector<1x128x128xbf16> to vector<128x128xbf16>
    %cst_109 = arith.constant dense<0.000000e+00> : vector<256x128xf32>
    %76 = tpu.matmul %73, %75, %cst_109 {dimension_numbers = #tpu.dot_dimension_numbers<[1], [0], [0], [1], [0, 0, 1, 1], [], []>} : vector<256x128xbf16>, vector<128x128xbf16>, vector<256x128xf32> -> vector<256x128xf32>
    %c0_110 = arith.constant 0 : index
    %c0_111 = arith.constant 0 : index
    %77 = vector.load %arg9[%c0_110, %c0_111] : memref<256x128xf32, #tpu.memory_space<vmem>>, vector<256x128xf32>
    %78 = arith.addf %77, %76 : vector<256x128xf32>
    %c0_112 = arith.constant 0 : index
    %c0_113 = arith.constant 0 : index
    %79 = vector.load %arg9[%c0_112, %c0_113] : memref<256x128xf32, #tpu.memory_space<vmem>>, vector<256x128xf32>
    tpu.vector_store %arg9[%c0_112, %c0_113], %78 {strides = array<i32>} : memref<256x128xf32, #tpu.memory_space<vmem>>, vector<256x128xf32>,
    %c2_114 = arith.constant 2 : index
    %c0_115 = arith.constant 0 : index
    %c0_116 = arith.constant 0 : index
    %80 = vector.load %arg11[%c2_114, %c0_115, %c0_116] : memref<18x16x128xbf16, #tpu.memory_space<vmem>>, vector<16x16x128xbf16>
    %81 = vector.shape_cast %80 : vector<16x16x128xbf16> to vector<256x128xbf16>
    %c8 = arith.constant 8 : index
    %c0_117 = arith.constant 0 : index
    %c0_118 = arith.constant 0 : index
    %82 = vector.load %arg2[%c8, %c0_117, %c0_118] : memref<9x128x128xbf16, #tpu.memory_space<vmem>>, vector<1x128x128xbf16>
    %83 = vector.shape_cast %82 : vector<1x128x128xbf16> to vector<128x128xbf16>
    %cst_119 = arith.constant dense<0.000000e+00> : vector<256x128xf32>
    %84 = tpu.matmul %81, %83, %cst_119 {dimension_numbers = #tpu.dot_dimension_numbers<[1], [0], [0], [1], [0, 0, 1, 1], [], []>} : vector<256x128xbf16>, vector<128x128xbf16>, vector<256x128xf32> -> vector<256x128xf32>
    %c0_120 = arith.constant 0 : index
    %c0_121 = arith.constant 0 : index
    %85 = vector.load %arg9[%c0_120, %c0_121] : memref<256x128xf32, #tpu.memory_space<vmem>>, vector<256x128xf32>
    %86 = arith.addf %85, %84 : vector<256x128xf32>
    %c0_122 = arith.constant 0 : index
    %c0_123 = arith.constant 0 : index
    %87 = vector.load %arg9[%c0_122, %c0_123] : memref<256x128xf32, #tpu.memory_space<vmem>>, vector<256x128xf32>
    tpu.vector_store %arg9[%c0_122, %c0_123], %86 {strides = array<i32>} : memref<256x128xf32, #tpu.memory_space<vmem>>, vector<256x128xf32>,
    %c0_124 = arith.constant 0 : index
    %c0_125 = arith.constant 0 : index
    %88 = vector.load %arg9[%c0_124, %c0_125] : memref<256x128xf32, #tpu.memory_space<vmem>>, vector<256x128xf32>
    %c0_126 = arith.constant 0 : index
    %c0_127 = arith.constant 0 : index
    %89 = vector.load %arg3[%c0_126, %c0_127] : memref<1x128xf32, #tpu.memory_space<vmem>>, vector<1x128xf32>
    %90 = vector.broadcast %89 : vector<1x128xf32> to vector<256x128xf32>
    %91 = arith.mulf %88, %90 : vector<256x128xf32>
    %c0_128 = arith.constant 0 : index
    %c0_129 = arith.constant 0 : index
    %92 = vector.load %arg4[%c0_128, %c0_129] : memref<1x128xf32, #tpu.memory_space<vmem>>, vector<1x128xf32>
    %93 = vector.broadcast %92 : vector<1x128xf32> to vector<256x128xf32>
    %94 = arith.addf %91, %93 : vector<256x128xf32>
    %cst_130 = arith.constant 0.000000e+00 : f32
    %95 = vector.broadcast %cst_130 : f32 to vector<256x128xf32>
    %96 = arith.maximumf %94, %95 : vector<256x128xf32>
    %97 = vector.shape_cast %96 : vector<256x128xf32> to vector<16x16x128xf32>
    %98 = arith.truncf %97 : vector<16x16x128xf32> to vector<16x16x128xbf16>
    %c1_131 = arith.constant 1 : index
    %c0_132 = arith.constant 0 : index
    %c0_133 = arith.constant 0 : index
    %99 = vector.load %arg10[%c1_131, %c0_132, %c0_133] : memref<18x16x128xbf16, #tpu.memory_space<vmem>>, vector<16x16x128xbf16>
    tpu.vector_store %arg10[%c1_131, %c0_132, %c0_133], %98 {strides = array<i32>} : memref<18x16x128xbf16, #tpu.memory_space<vmem>>, vector<16x16x128xbf16>,
    %100 = vector.extract_strided_slice %98 {offsets = [0, 1, 0], sizes = [16, 15, 128], strides = [1, 1, 1]} : vector<16x16x128xbf16> to vector<16x15x128xbf16>
    %c1_134 = arith.constant 1 : index
    %c0_135 = arith.constant 0 : index
    %c0_136 = arith.constant 0 : index
    %101 = vector.load %arg11[%c1_134, %c0_135, %c0_136] : memref<18x16x128xbf16, #tpu.memory_space<vmem>>, vector<16x15x128xbf16>
    tpu.vector_store %arg11[%c1_134, %c0_135, %c0_136], %100 {strides = array<i32>} : memref<18x16x128xbf16, #tpu.memory_space<vmem>>, vector<16x15x128xbf16>,
    %102 = vector.extract_strided_slice %98 {offsets = [0, 0, 0], sizes = [16, 15, 128], strides = [1, 1, 1]} : vector<16x16x128xbf16> to vector<16x15x128xbf16>
    %c1_137 = arith.constant 1 : index
    %c1_138 = arith.constant 1 : index
    %c0_139 = arith.constant 0 : index
    %103 = vector.load %arg12[%c1_137, %c1_138, %c0_139] : memref<18x16x128xbf16, #tpu.memory_space<vmem>>, vector<16x15x128xbf16>
    tpu.vector_store %arg12[%c1_137, %c1_138, %c0_139], %102 {strides = array<i32>} : memref<18x16x128xbf16, #tpu.memory_space<vmem>>, vector<16x15x128xbf16>,
    %c0_140 = arith.constant 0 : index
    %c0_141 = arith.constant 0 : index
    %c0_142 = arith.constant 0 : index
    %c0_143 = arith.constant 0 : index
    %104 = vector.load %arg1[%c0_140, %c0_141, %c0_142, %c0_143] : memref<1x16x16x128xf32, #tpu.memory_space<vmem>>, vector<1x16x16x128xf32>
    %105 = vector.shape_cast %104 : vector<1x16x16x128xf32> to vector<16x16x128xf32>
    %106 = vector.shape_cast %105 : vector<16x16x128xf32> to vector<256x128xf32>
    %c0_144 = arith.constant 0 : index
    %c0_145 = arith.constant 0 : index
    %c0_146 = arith.constant 0 : index
    %107 = vector.load %arg12[%c0_144, %c0_145, %c0_146] : memref<18x16x128xbf16, #tpu.memory_space<vmem>>, vector<16x16x128xbf16>
    %108 = vector.shape_cast %107 : vector<16x16x128xbf16> to vector<256x128xbf16>
    %c0_147 = arith.constant 0 : index
    %c0_148 = arith.constant 0 : index
    %c0_149 = arith.constant 0 : index
    %109 = vector.load %arg5[%c0_147, %c0_148, %c0_149] : memref<9x128x128xbf16, #tpu.memory_space<vmem>>, vector<1x128x128xbf16>
    %110 = vector.shape_cast %109 : vector<1x128x128xbf16> to vector<128x128xbf16>
    %cst_150 = arith.constant dense<0.000000e+00> : vector<256x128xf32>
    %111 = tpu.matmul %108, %110, %cst_150 {dimension_numbers = #tpu.dot_dimension_numbers<[1], [0], [0], [1], [0, 0, 1, 1], [], []>} : vector<256x128xbf16>, vector<128x128xbf16>, vector<256x128xf32> -> vector<256x128xf32>
    %c0_151 = arith.constant 0 : index
    %c0_152 = arith.constant 0 : index
    %112 = vector.load %arg9[%c0_151, %c0_152] : memref<256x128xf32, #tpu.memory_space<vmem>>, vector<256x128xf32>
    tpu.vector_store %arg9[%c0_151, %c0_152], %111 {strides = array<i32>} : memref<256x128xf32, #tpu.memory_space<vmem>>, vector<256x128xf32>,
    %c0_153 = arith.constant 0 : index
    %c0_154 = arith.constant 0 : index
    %c0_155 = arith.constant 0 : index
    %113 = vector.load %arg10[%c0_153, %c0_154, %c0_155] : memref<18x16x128xbf16, #tpu.memory_space<vmem>>, vector<16x16x128xbf16>
    %114 = vector.shape_cast %113 : vector<16x16x128xbf16> to vector<256x128xbf16>
    %c1_156 = arith.constant 1 : index
    %c0_157 = arith.constant 0 : index
    %c0_158 = arith.constant 0 : index
    %115 = vector.load %arg5[%c1_156, %c0_157, %c0_158] : memref<9x128x128xbf16, #tpu.memory_space<vmem>>, vector<1x128x128xbf16>
    %116 = vector.shape_cast %115 : vector<1x128x128xbf16> to vector<128x128xbf16>
    %cst_159 = arith.constant dense<0.000000e+00> : vector<256x128xf32>
    %117 = tpu.matmul %114, %116, %cst_159 {dimension_numbers = #tpu.dot_dimension_numbers<[1], [0], [0], [1], [0, 0, 1, 1], [], []>} : vector<256x128xbf16>, vector<128x128xbf16>, vector<256x128xf32> -> vector<256x128xf32>
    %c0_160 = arith.constant 0 : index
    %c0_161 = arith.constant 0 : index
    %118 = vector.load %arg9[%c0_160, %c0_161] : memref<256x128xf32, #tpu.memory_space<vmem>>, vector<256x128xf32>
    %119 = arith.addf %118, %117 : vector<256x128xf32>
    %c0_162 = arith.constant 0 : index
    %c0_163 = arith.constant 0 : index
    %120 = vector.load %arg9[%c0_162, %c0_163] : memref<256x128xf32, #tpu.memory_space<vmem>>, vector<256x128xf32>
    tpu.vector_store %arg9[%c0_162, %c0_163], %119 {strides = array<i32>} : memref<256x128xf32, #tpu.memory_space<vmem>>, vector<256x128xf32>,
    %c0_164 = arith.constant 0 : index
    %c0_165 = arith.constant 0 : index
    %c0_166 = arith.constant 0 : index
    %121 = vector.load %arg11[%c0_164, %c0_165, %c0_166] : memref<18x16x128xbf16, #tpu.memory_space<vmem>>, vector<16x16x128xbf16>
    %122 = vector.shape_cast %121 : vector<16x16x128xbf16> to vector<256x128xbf16>
    %c2_167 = arith.constant 2 : index
    %c0_168 = arith.constant 0 : index
    %c0_169 = arith.constant 0 : index
    %123 = vector.load %arg5[%c2_167, %c0_168, %c0_169] : memref<9x128x128xbf16, #tpu.memory_space<vmem>>, vector<1x128x128xbf16>
    %124 = vector.shape_cast %123 : vector<1x128x128xbf16> to vector<128x128xbf16>
    %cst_170 = arith.constant dense<0.000000e+00> : vector<256x128xf32>
    %125 = tpu.matmul %122, %124, %cst_170 {dimension_numbers = #tpu.dot_dimension_numbers<[1], [0], [0], [1], [0, 0, 1, 1], [], []>} : vector<256x128xbf16>, vector<128x128xbf16>, vector<256x128xf32> -> vector<256x128xf32>
    %c0_171 = arith.constant 0 : index
    %c0_172 = arith.constant 0 : index
    %126 = vector.load %arg9[%c0_171, %c0_172] : memref<256x128xf32, #tpu.memory_space<vmem>>, vector<256x128xf32>
    %127 = arith.addf %126, %125 : vector<256x128xf32>
    %c0_173 = arith.constant 0 : index
    %c0_174 = arith.constant 0 : index
    %128 = vector.load %arg9[%c0_173, %c0_174] : memref<256x128xf32, #tpu.memory_space<vmem>>, vector<256x128xf32>
    tpu.vector_store %arg9[%c0_173, %c0_174], %127 {strides = array<i32>} : memref<256x128xf32, #tpu.memory_space<vmem>>, vector<256x128xf32>,
    %c1_175 = arith.constant 1 : index
    %c0_176 = arith.constant 0 : index
    %c0_177 = arith.constant 0 : index
    %129 = vector.load %arg12[%c1_175, %c0_176, %c0_177] : memref<18x16x128xbf16, #tpu.memory_space<vmem>>, vector<16x16x128xbf16>
    %130 = vector.shape_cast %129 : vector<16x16x128xbf16> to vector<256x128xbf16>
    %c3_178 = arith.constant 3 : index
    %c0_179 = arith.constant 0 : index
    %c0_180 = arith.constant 0 : index
    %131 = vector.load %arg5[%c3_178, %c0_179, %c0_180] : memref<9x128x128xbf16, #tpu.memory_space<vmem>>, vector<1x128x128xbf16>
    %132 = vector.shape_cast %131 : vector<1x128x128xbf16> to vector<128x128xbf16>
    %cst_181 = arith.constant dense<0.000000e+00> : vector<256x128xf32>
    %133 = tpu.matmul %130, %132, %cst_181 {dimension_numbers = #tpu.dot_dimension_numbers<[1], [0], [0], [1], [0, 0, 1, 1], [], []>} : vector<256x128xbf16>, vector<128x128xbf16>, vector<256x128xf32> -> vector<256x128xf32>
    %c0_182 = arith.constant 0 : index
    %c0_183 = arith.constant 0 : index
    %134 = vector.load %arg9[%c0_182, %c0_183] : memref<256x128xf32, #tpu.memory_space<vmem>>, vector<256x128xf32>
    %135 = arith.addf %134, %133 : vector<256x128xf32>
    %c0_184 = arith.constant 0 : index
    %c0_185 = arith.constant 0 : index
    %136 = vector.load %arg9[%c0_184, %c0_185] : memref<256x128xf32, #tpu.memory_space<vmem>>, vector<256x128xf32>
    tpu.vector_store %arg9[%c0_184, %c0_185], %135 {strides = array<i32>} : memref<256x128xf32, #tpu.memory_space<vmem>>, vector<256x128xf32>,
    %c1_186 = arith.constant 1 : index
    %c0_187 = arith.constant 0 : index
    %c0_188 = arith.constant 0 : index
    %137 = vector.load %arg10[%c1_186, %c0_187, %c0_188] : memref<18x16x128xbf16, #tpu.memory_space<vmem>>, vector<16x16x128xbf16>
    %138 = vector.shape_cast %137 : vector<16x16x128xbf16> to vector<256x128xbf16>
    %c4_189 = arith.constant 4 : index
    %c0_190 = arith.constant 0 : index
    %c0_191 = arith.constant 0 : index
    %139 = vector.load %arg5[%c4_189, %c0_190, %c0_191] : memref<9x128x128xbf16, #tpu.memory_space<vmem>>, vector<1x128x128xbf16>
    %140 = vector.shape_cast %139 : vector<1x128x128xbf16> to vector<128x128xbf16>
    %cst_192 = arith.constant dense<0.000000e+00> : vector<256x128xf32>
    %141 = tpu.matmul %138, %140, %cst_192 {dimension_numbers = #tpu.dot_dimension_numbers<[1], [0], [0], [1], [0, 0, 1, 1], [], []>} : vector<256x128xbf16>, vector<128x128xbf16>, vector<256x128xf32> -> vector<256x128xf32>
    %c0_193 = arith.constant 0 : index
    %c0_194 = arith.constant 0 : index
    %142 = vector.load %arg9[%c0_193, %c0_194] : memref<256x128xf32, #tpu.memory_space<vmem>>, vector<256x128xf32>
    %143 = arith.addf %142, %141 : vector<256x128xf32>
    %c0_195 = arith.constant 0 : index
    %c0_196 = arith.constant 0 : index
    %144 = vector.load %arg9[%c0_195, %c0_196] : memref<256x128xf32, #tpu.memory_space<vmem>>, vector<256x128xf32>
    tpu.vector_store %arg9[%c0_195, %c0_196], %143 {strides = array<i32>} : memref<256x128xf32, #tpu.memory_space<vmem>>, vector<256x128xf32>,
    %c1_197 = arith.constant 1 : index
    %c0_198 = arith.constant 0 : index
    %c0_199 = arith.constant 0 : index
    %145 = vector.load %arg11[%c1_197, %c0_198, %c0_199] : memref<18x16x128xbf16, #tpu.memory_space<vmem>>, vector<16x16x128xbf16>
    %146 = vector.shape_cast %145 : vector<16x16x128xbf16> to vector<256x128xbf16>
    %c5_200 = arith.constant 5 : index
    %c0_201 = arith.constant 0 : index
    %c0_202 = arith.constant 0 : index
    %147 = vector.load %arg5[%c5_200, %c0_201, %c0_202] : memref<9x128x128xbf16, #tpu.memory_space<vmem>>, vector<1x128x128xbf16>
    %148 = vector.shape_cast %147 : vector<1x128x128xbf16> to vector<128x128xbf16>
    %cst_203 = arith.constant dense<0.000000e+00> : vector<256x128xf32>
    %149 = tpu.matmul %146, %148, %cst_203 {dimension_numbers = #tpu.dot_dimension_numbers<[1], [0], [0], [1], [0, 0, 1, 1], [], []>} : vector<256x128xbf16>, vector<128x128xbf16>, vector<256x128xf32> -> vector<256x128xf32>
    %c0_204 = arith.constant 0 : index
    %c0_205 = arith.constant 0 : index
    %150 = vector.load %arg9[%c0_204, %c0_205] : memref<256x128xf32, #tpu.memory_space<vmem>>, vector<256x128xf32>
    %151 = arith.addf %150, %149 : vector<256x128xf32>
    %c0_206 = arith.constant 0 : index
    %c0_207 = arith.constant 0 : index
    %152 = vector.load %arg9[%c0_206, %c0_207] : memref<256x128xf32, #tpu.memory_space<vmem>>, vector<256x128xf32>
    tpu.vector_store %arg9[%c0_206, %c0_207], %151 {strides = array<i32>} : memref<256x128xf32, #tpu.memory_space<vmem>>, vector<256x128xf32>,
    %c2_208 = arith.constant 2 : index
    %c0_209 = arith.constant 0 : index
    %c0_210 = arith.constant 0 : index
    %153 = vector.load %arg12[%c2_208, %c0_209, %c0_210] : memref<18x16x128xbf16, #tpu.memory_space<vmem>>, vector<16x16x128xbf16>
    %154 = vector.shape_cast %153 : vector<16x16x128xbf16> to vector<256x128xbf16>
    %c6_211 = arith.constant 6 : index
    %c0_212 = arith.constant 0 : index
    %c0_213 = arith.constant 0 : index
    %155 = vector.load %arg5[%c6_211, %c0_212, %c0_213] : memref<9x128x128xbf16, #tpu.memory_space<vmem>>, vector<1x128x128xbf16>
    %156 = vector.shape_cast %155 : vector<1x128x128xbf16> to vector<128x128xbf16>
    %cst_214 = arith.constant dense<0.000000e+00> : vector<256x128xf32>
    %157 = tpu.matmul %154, %156, %cst_214 {dimension_numbers = #tpu.dot_dimension_numbers<[1], [0], [0], [1], [0, 0, 1, 1], [], []>} : vector<256x128xbf16>, vector<128x128xbf16>, vector<256x128xf32> -> vector<256x128xf32>
    %c0_215 = arith.constant 0 : index
    %c0_216 = arith.constant 0 : index
    %158 = vector.load %arg9[%c0_215, %c0_216] : memref<256x128xf32, #tpu.memory_space<vmem>>, vector<256x128xf32>
    %159 = arith.addf %158, %157 : vector<256x128xf32>
    %c0_217 = arith.constant 0 : index
    %c0_218 = arith.constant 0 : index
    %160 = vector.load %arg9[%c0_217, %c0_218] : memref<256x128xf32, #tpu.memory_space<vmem>>, vector<256x128xf32>
    tpu.vector_store %arg9[%c0_217, %c0_218], %159 {strides = array<i32>} : memref<256x128xf32, #tpu.memory_space<vmem>>, vector<256x128xf32>,
    %c2_219 = arith.constant 2 : index
    %c0_220 = arith.constant 0 : index
    %c0_221 = arith.constant 0 : index
    %161 = vector.load %arg10[%c2_219, %c0_220, %c0_221] : memref<18x16x128xbf16, #tpu.memory_space<vmem>>, vector<16x16x128xbf16>
    %162 = vector.shape_cast %161 : vector<16x16x128xbf16> to vector<256x128xbf16>
    %c7_222 = arith.constant 7 : index
    %c0_223 = arith.constant 0 : index
    %c0_224 = arith.constant 0 : index
    %163 = vector.load %arg5[%c7_222, %c0_223, %c0_224] : memref<9x128x128xbf16, #tpu.memory_space<vmem>>, vector<1x128x128xbf16>
    %164 = vector.shape_cast %163 : vector<1x128x128xbf16> to vector<128x128xbf16>
    %cst_225 = arith.constant dense<0.000000e+00> : vector<256x128xf32>
    %165 = tpu.matmul %162, %164, %cst_225 {dimension_numbers = #tpu.dot_dimension_numbers<[1], [0], [0], [1], [0, 0, 1, 1], [], []>} : vector<256x128xbf16>, vector<128x128xbf16>, vector<256x128xf32> -> vector<256x128xf32>
    %c0_226 = arith.constant 0 : index
    %c0_227 = arith.constant 0 : index
    %166 = vector.load %arg9[%c0_226, %c0_227] : memref<256x128xf32, #tpu.memory_space<vmem>>, vector<256x128xf32>
    %167 = arith.addf %166, %165 : vector<256x128xf32>
    %c0_228 = arith.constant 0 : index
    %c0_229 = arith.constant 0 : index
    %168 = vector.load %arg9[%c0_228, %c0_229] : memref<256x128xf32, #tpu.memory_space<vmem>>, vector<256x128xf32>
    tpu.vector_store %arg9[%c0_228, %c0_229], %167 {strides = array<i32>} : memref<256x128xf32, #tpu.memory_space<vmem>>, vector<256x128xf32>,
    %c2_230 = arith.constant 2 : index
    %c0_231 = arith.constant 0 : index
    %c0_232 = arith.constant 0 : index
    %169 = vector.load %arg11[%c2_230, %c0_231, %c0_232] : memref<18x16x128xbf16, #tpu.memory_space<vmem>>, vector<16x16x128xbf16>
    %170 = vector.shape_cast %169 : vector<16x16x128xbf16> to vector<256x128xbf16>
    %c8_233 = arith.constant 8 : index
    %c0_234 = arith.constant 0 : index
    %c0_235 = arith.constant 0 : index
    %171 = vector.load %arg5[%c8_233, %c0_234, %c0_235] : memref<9x128x128xbf16, #tpu.memory_space<vmem>>, vector<1x128x128xbf16>
    %172 = vector.shape_cast %171 : vector<1x128x128xbf16> to vector<128x128xbf16>
    %cst_236 = arith.constant dense<0.000000e+00> : vector<256x128xf32>
    %173 = tpu.matmul %170, %172, %cst_236 {dimension_numbers = #tpu.dot_dimension_numbers<[1], [0], [0], [1], [0, 0, 1, 1], [], []>} : vector<256x128xbf16>, vector<128x128xbf16>, vector<256x128xf32> -> vector<256x128xf32>
    %c0_237 = arith.constant 0 : index
    %c0_238 = arith.constant 0 : index
    %174 = vector.load %arg9[%c0_237, %c0_238] : memref<256x128xf32, #tpu.memory_space<vmem>>, vector<256x128xf32>
    %175 = arith.addf %174, %173 : vector<256x128xf32>
    %c0_239 = arith.constant 0 : index
    %c0_240 = arith.constant 0 : index
    %176 = vector.load %arg9[%c0_239, %c0_240] : memref<256x128xf32, #tpu.memory_space<vmem>>, vector<256x128xf32>
    tpu.vector_store %arg9[%c0_239, %c0_240], %175 {strides = array<i32>} : memref<256x128xf32, #tpu.memory_space<vmem>>, vector<256x128xf32>,
    %c0_241 = arith.constant 0 : index
    %c0_242 = arith.constant 0 : index
    %177 = vector.load %arg9[%c0_241, %c0_242] : memref<256x128xf32, #tpu.memory_space<vmem>>, vector<256x128xf32>
    %c0_243 = arith.constant 0 : index
    %c0_244 = arith.constant 0 : index
    %178 = vector.load %arg6[%c0_243, %c0_244] : memref<1x128xf32, #tpu.memory_space<vmem>>, vector<1x128xf32>
    %179 = vector.broadcast %178 : vector<1x128xf32> to vector<256x128xf32>
    %180 = arith.mulf %177, %179 : vector<256x128xf32>
    %c0_245 = arith.constant 0 : index
    %c0_246 = arith.constant 0 : index
    %181 = vector.load %arg7[%c0_245, %c0_246] : memref<1x128xf32, #tpu.memory_space<vmem>>, vector<1x128xf32>
    %182 = vector.broadcast %181 : vector<1x128xf32> to vector<256x128xf32>
    %183 = arith.addf %180, %182 : vector<256x128xf32>
    %184 = arith.addf %106, %183 : vector<256x128xf32>
    %185 = vector.shape_cast %184 : vector<256x128xf32> to vector<16x16x128xf32>
    %c0_247 = arith.constant 0 : index
    %c0_248 = arith.constant 0 : index
    %c0_249 = arith.constant 0 : index
    %c0_250 = arith.constant 0 : index
    %186 = vector.load %arg8[%c0_247, %c0_248, %c0_249, %c0_250] : memref<1x16x16x128xf32, #tpu.memory_space<vmem>>, vector<1x16x16x128xf32>
    %187 = vector.shape_cast %186 : vector<1x16x16x128xf32> to vector<16x16x128xf32>
    %188 = vector.shape_cast %185 : vector<16x16x128xf32> to vector<1x16x16x128xf32>
    tpu.vector_store %arg8[%c0_247, %c0_248, %c0_249, %c0_250], %188 {strides = array<i32>} : memref<1x16x16x128xf32, #tpu.memory_space<vmem>>, vector<1x16x16x128xf32>,
    return
  }
  func.func @transform_0(%arg0: i32) -> (i32, i32, i32, i32) {
    %c0_i32 = arith.constant 0 : i32
    %c0_i32_0 = arith.constant 0 : i32
    %c0_i32_1 = arith.constant 0 : i32
    %c0_i32_2 = arith.constant 0 : i32
    return %arg0, %c0_i32, %c0_i32_0, %c0_i32_1 : i32, i32, i32, i32
  }
  func.func @transform_1(%arg0: i32) -> (i32, i32, i32) {
    %c0_i32 = arith.constant 0 : i32
    %c0_i32_0 = arith.constant 0 : i32
    %c0_i32_1 = arith.constant 0 : i32
    %c0_i32_2 = arith.constant 0 : i32
    return %c0_i32, %c0_i32_0, %c0_i32_1 : i32, i32, i32
  }
  func.func @transform_2(%arg0: i32) -> (i32, i32) {
    %c0_i32 = arith.constant 0 : i32
    %c0_i32_0 = arith.constant 0 : i32
    %c0_i32_1 = arith.constant 0 : i32
    return %c0_i32, %c0_i32_0 : i32, i32
  }
  func.func @transform_3(%arg0: i32) -> (i32, i32) {
    %c0_i32 = arith.constant 0 : i32
    %c0_i32_0 = arith.constant 0 : i32
    %c0_i32_1 = arith.constant 0 : i32
    return %c0_i32, %c0_i32_0 : i32, i32
  }
  func.func @transform_4(%arg0: i32) -> (i32, i32, i32) {
    %c0_i32 = arith.constant 0 : i32
    %c0_i32_0 = arith.constant 0 : i32
    %c0_i32_1 = arith.constant 0 : i32
    %c0_i32_2 = arith.constant 0 : i32
    return %c0_i32, %c0_i32_0, %c0_i32_1 : i32, i32, i32
  }
  func.func @transform_5(%arg0: i32) -> (i32, i32) {
    %c0_i32 = arith.constant 0 : i32
    %c0_i32_0 = arith.constant 0 : i32
    %c0_i32_1 = arith.constant 0 : i32
    return %c0_i32, %c0_i32_0 : i32, i32
  }
  func.func @transform_6(%arg0: i32) -> (i32, i32) {
    %c0_i32 = arith.constant 0 : i32
    %c0_i32_0 = arith.constant 0 : i32
    %c0_i32_1 = arith.constant 0 : i32
    return %c0_i32, %c0_i32_0 : i32, i32
  }
  func.func @transform_7(%arg0: i32) -> (i32, i32, i32, i32) {
    %c0_i32 = arith.constant 0 : i32
    %c0_i32_0 = arith.constant 0 : i32
    %c0_i32_1 = arith.constant 0 : i32
    %c0_i32_2 = arith.constant 0 : i32
    return %arg0, %c0_i32, %c0_i32_0, %c0_i32_1 : i32, i32, i32, i32
  }
}

</mosaic_0001>

<bundles_post_ra>
// kernel: tpu_custom_call.1
= control target key start
LH: loop header
LB: loop body
LE: loop exit
PB: predicated region body
PF: predicated region fallthrough
CT: control target
= control target key end

     0   :  { %12 = vsyncpa [#allocation7], 0  ;;  %s11385_s0 = inlined_call_operand.hbm [shape: f32[2,16,16,128], index: 0, kind: input, shape index: {}]   ;;  %s11386_s1 = inlined_call_operand.hbm [shape: bf16[9,128,128], index: 1, kind: input, shape index: {}]   ;;  %s11387_s2 = inlined_call_operand.vmem [shape: f32[1,128], index: 2, kind: input, shape index: {}]   ;;  %s11388_s3 = inlined_call_operand.vmem [shape: f32[1,128], index: 3, kind: input, shape index: {}]   ;;  %s11389_s4 = inlined_call_operand.hbm [shape: bf16[9,128,128], index: 4, kind: input, shape index: {}]   ;;  %s11390_s5 = inlined_call_operand.vmem [shape: f32[1,128], index: 5, kind: input, shape index: {}]   ;;  %s11391_s6 = inlined_call_operand.vmem [shape: f32[1,128], index: 6, kind: input, shape index: {}]   ;;  %s11392_s7 = inlined_call_operand.hbm [shape: f32[2,16,16,128], index: 7, kind: output, shape index: {}]  }
   0x1   :  { %14 = vsyncpa [#allocation7 + $0x1], 0 }
   0x2   :  { %15 = vsyncpa [#allocation10], 0 }
   0x3   :  { %16 = vsyncpa [#allocation8], 0 }
   0x4   :  { %18 = vsyncpa [#allocation8 + $0x1], 0  ;;  %s9928_s24 = smov 0   ;;  %s9930_s25 = smov 0  }
   0x5   :  { %s9932_s26 = smov 0   ;;  %s9934_s27 = smov 0  }
   0x6 LB: > { %s9949_s28 = sadd.s32 4294967295, %s9875_s27   ;;  %s7497_s29 = sadd.s32 4294967294, %s9875_s27   ;;  %s9875_s27 = sphi %s9934_s27, %s11447_s27   ;;  %s9871_s26 = sphi %s9932_s26, %s11446_s26   ;;  %s9867_s25 = sphi %s9930_s25, %s11445_s25   ;;  %s9863_s24 = sphi %s9928_s24, %s11444_s24  }
   0x7   : > { %p44_p0 = scmp.ne.s32.totalorder %s9867_s25, %s9863_s24  ;;  %p11393_p1 = scmp.eq.s32.totalorder %s9949_s28, 0 }
   0x8   : > { %p200_p3 = scmp.eq.s32.totalorder %s7497_s29, 1  ;;  %p7498_p5 = scmp.ge.s32.totalorder %s9875_s27, 1 }
   0x9   : > { %p9958_p4 = por %p11393_p1, %p44_p0  ;;  %p207_p7 = scmp.lt.s32.totalorder %s9875_s27, 3 }
   0xa   : > { %p9963_p6 = por %p200_p3, %p44_p0  ;;  %s9877_s10 = smov [#allocation9]  }
   0xb   : > { %s11408_s30 = scalar_select %p9958_p4, 1, 0 }
   0xc   : > { %s11409_s8 = scalar_select %p9963_p6, 1, 0 }
   0xd   : > { %p9968_p8 = pnand %p7498_p5, %p207_p7  ;;  %s219_s11 = sshll.u32 %s9877_s10, 4  ;;  %s9972_s11 = int_to_ptr.vmem [resolvable:$true] %s219_s11 }
   0xe   : > { %s9878_s13 = smov [#allocation11]   ;;  %s9719_s17 = scalar_lea.hbm %s11386_s1, 9216 }
   0xf   : > { %p9485_p9 = pneg %p9968_p8  ;;  %s238_s14 = sshll.u32 %s9878_s13, 4  ;;  %s9983_s14 = int_to_ptr.vmem [resolvable:$true] %s238_s14 }
  0x10   : > { %p9720_p12 = scmp.ne.s32.totalorder %s11386_s1, %s9719_s17  ;;  %p9726_p5 = scmp.lt.u32.totalorder %s9719_s17, %s11386_s1 }
  0x11   : > { %p9979_p11 = pnand %p9485_p9, %p11393_p1 }
  0x13   : > { %p9721_p13 = pneg %p9979_p11 }
  0x15   : > { %p9722_p0 = pnand %p9721_p13, %p9720_p12 }
  0x17   : > { %p9723_p3 = pneg %p9722_p0 }
  0x19   : > { %p9728_p7 = pnand %p9726_p5, %p9723_p3 }
  0x1b   : > { %9731 = shalt.err (!%p9728_p7)
}
  0x1c   : > { %s9732_s22 = scalar_lea.vmem %s9972_s11, 9216  ;;  %p9740_p2 = scmp.lt.s32.totalorder %s9972_s11, %s9972_s11 }
  0x1d   : > { %p9733_p9 = scmp.ne.s32.totalorder %s9972_s11, %s9732_s22  ;;  %p9741_p12 = scmp.lt.s32.totalorder %s9732_s22, %s9732_s22 }
  0x1f   : > { %p9735_p10 = pnand %p9733_p9, %p9721_p13  ;;  %p9742_p0 = por %p9741_p12, %p9740_p2 }
  0x21   : > { %p9736_p1 = pneg %p9735_p10 }
  0x23   : > { %p9743_p6 = pnand %p9742_p0, %p9736_p1 }
  0x25   : > { %9746 = shalt.err (!%p9743_p6)
}
  0x26   : > { %s9879_s23 = smov 64   ;;  %s9880_s29 = smov 4  }
  0x27   : > { %9488 = dma.hbm_to_vmem [thread:$0]  (!%p9979_p11), %s11386_s1, 9216, %s9972_s11, [#allocation10], %s9879_s23, %s9879_s23, %s9880_s29  }
  0x28   : > { %s9747_s17 = scalar_lea.hbm %s11389_s4, 9216 }
  0x29   : > { %p9748_p2 = scmp.ne.s32.totalorder %s11389_s4, %s9747_s17  ;;  %p9754_p10 = scmp.lt.u32.totalorder %s9747_s17, %s11389_s4 }
  0x2b   : > { %p9750_p1 = pnand %p9748_p2, %p9721_p13 }
  0x2d   : > { %p9751_p6 = pneg %p9750_p1 }
  0x2f   : > { %p9756_p3 = pnand %p9754_p10, %p9751_p6 }
  0x31   : > { %9759 = shalt.err (!%p9756_p3)
}
  0x32   : > { %s9760_s11 = scalar_lea.vmem %s9983_s14, 9216  ;;  %p9768_p12 = scmp.lt.s32.totalorder %s9983_s14, %s9983_s14 }
  0x33   : > { %p9761_p5 = scmp.ne.s32.totalorder %s9983_s14, %s9760_s11  ;;  %p9769_p0 = scmp.lt.s32.totalorder %s9760_s11, %s9760_s11 }
  0x35   : > { %p9763_p7 = pnand %p9761_p5, %p9721_p13  ;;  %p9770_p2 = por %p9769_p0, %p9768_p12 }
  0x37   : > { %p9764_p9 = pneg %p9763_p7 }
  0x39   : > { %p9771_p1 = pnand %p9770_p2, %p9764_p9 }
  0x3b   : > { %9774 = shalt.err (!%p9771_p1)
}
  0x3c   : > { %9491 = dma.hbm_to_vmem [thread:$0]  (!%p9979_p11), %s11389_s4, 9216, %s9983_s14, [#allocation10], %s9879_s23, %s9879_s23, %s9880_s29  }
  0x3d   : > { %s10038_s13 = sadd.s32 1, %s9875_s27   ;;  %s31_s12 = sadd.s32 1, %s9871_s26 }
  0x3e   : > { %s28_s15 = ssub.s32 %s9875_s27, %s10038_s13  ;;  %p38_p13 = scmp.ne.s32.totalorder %s9871_s26, %s9867_s25 }
  0x3f   : > { %p29_p6 = scmp.eq.s32.totalorder %s28_s15, 0  ;;  %p39_p10 = scmp.eq.s32.totalorder %s9875_s27, 0 }
  0x40   : > { %p11412_p3 = scmp.eq.s32.totalorder %s9949_s28, 1  ;;  %p9502_p7 = scmp.lt.s32.totalorder %s9875_s27, 2 }
  0x41   : > { %s10054_s17 = scalar_select %p29_p6, %s9871_s26, %s31_s12  }
  0x42   : > { %p10048_p5 = por %p11412_p3, %p38_p13  ;;  %p40_p9 = por %p39_p10, %p38_p13 }
  0x43   : > { %s258_s18 = sand.u32 1, %s9871_s26   ;;  %s7663_s14 = sshll.u32 %s9875_s27, 12 }
  0x44   : > { %s11413_s16 = scalar_select %p10048_p5, 1, 0 }
  0x45   : > { %s7502_s19 = sshll.u32 %s258_s18, 8  ;;  %s10061_s20 = scalar_lea.hbm %s11385_s0, %s7663_s14 }
  0x46   : > { %s262_s21 = scalar_lea.vmem [#allocation6], %s7502_s19  ;;  %p10065_p11 = pnand %p9502_p7, %p40_p9 }
  0x47   : > { %s269_s11 = sshll.u32 %s262_s21, 4  ;;  %s10069_s10 = scalar_lea.sflag [#allocation7], %s258_s18  ;;  %s10063_s11 = int_to_ptr.vmem [resolvable:$true] %s269_s11 }
  0x48   : > { %s9775_s12 = scalar_lea.hbm %s10061_s20, 4096  ;;  %p9777_p0 = pneg %p10065_p11 }
  0x49   : > { %p9776_p12 = scmp.ne.s32.totalorder %s10061_s20, %s9775_s12  ;;  %s9780_s14 = scalar_lea.hbm %s11385_s0, 8192 }
  0x4a   : > { %p9781_p13 = scmp.lt.u32.totalorder %s10061_s20, %s11385_s0  ;;  %p9782_p6 = scmp.lt.u32.totalorder %s9780_s14, %s9775_s12 }
  0x4b   : > { %p9778_p2 = pnand %p9777_p0, %p9776_p12  ;;  %p9784_p3 = scmp.lt.u32.totalorder %s9775_s12, %s10061_s20 }
  0x4c   : > { %p9783_p10 = por %p9782_p6, %p9781_p13 }
  0x4d   : > { %p9779_p1 = pneg %p9778_p2 }
  0x4e   : > { %p9785_p7 = por %p9784_p3, %p9783_p10 }
  0x50   : > { %p9786_p9 = pnand %p9785_p7, %p9779_p1 }
  0x52   : > { %9789 = shalt.err (!%p9786_p9)
}
  0x53   : > { %s9790_s18 = scalar_lea.vmem %s10063_s11, 4096  ;;  %s9881_s21 = smov [#allocation6]  }
  0x54   : > { %p9791_p12 = scmp.ne.s32.totalorder %s10063_s11, %s9790_s18  ;;  %s9795_s15 = sshll.u32 %s9881_s21, 4  ;;  %s9796_s15 = int_to_ptr.vmem [resolvable:$false] %s9795_s15 }
  0x55   : > { %s9797_s19 = scalar_lea.vmem %s9796_s15, 8192  ;;  %p9798_p4 = scmp.lt.s32.totalorder %s10063_s11, %s9796_s15 }
  0x56   : > { %p9793_p2 = pnand %p9791_p12, %p9777_p0  ;;  %p9799_p13 = scmp.lt.s32.totalorder %s9797_s19, %s9790_s18 }
  0x58   : > { %p9794_p5 = pneg %p9793_p2  ;;  %p9800_p6 = por %p9799_p13, %p9798_p4 }
  0x5a   : > { %p9801_p10 = pnand %p9800_p6, %p9794_p5 }
  0x5c   : > { %9804 = shalt.err (!%p9801_p10)
}
  0x5d   : > { %s9882_s12 = smov 128   ;;  %s9883_s14 = smov 8  }
  0x5e   : > { %9495 = dma.hbm_to_vmem [thread:$0]  (!%p10065_p11), %s10061_s20, 4096, %s10063_s11, %s10069_s10, %s9882_s12, %s9882_s12, %s9883_s14  }
  0x5f   : > { %281 = sbr.rel (%p9968_p8) target bundleno = 1690 (0x69a), region = 48 }
  0x66   : > { %s10100_s23 = sand.u32 1, %s9867_s25   ;;  %p11415_p4 = scmp.ne.s32.totalorder %s11408_s30, 0 }
  0x67   : > { %s7506_s29 = sshll.u32 %s10100_s23, 8  ;;  %s284_s18 = scalar_lea.sflag [#allocation7], %s10100_s23 }
  0x68   : > { %s10106_s21 = scalar_lea.vmem [#allocation6], %s7506_s29 }
  0x69   : > { %9850 = dma.done.wait (%p11415_p4), %s284_s18, 4096  }
  0x6a   : > { %9852 = vsyncadd (%p11415_p4), %s284_s18, 4294963200  ;;  %p11416_p5 = scmp.eq.s32.totalorder %s9949_s28, 0 }
  0x6c   : > { %9854 = dma.done.wait (%p11416_p5), [#allocation10], 18432   ;;  %p11417_p8 = pmov %p11416_p5 }
  0x6d   : > { %v9884_v0 = vmov 0   ;;  %v9547_v1 = vld [vmem:[#allocation9] sm:$0xff]   ;;  %v9548_v2 = vld [vmem:[#allocation9 + $0x8] sm:$0xff]   ;;  %vm389_vm0 = vcmask 1040384   ;;  %vm390_vm1 = vsmask.f32 256 }
  0x6e   : > { %9856 = vsyncadd (%p11417_p8), [#allocation10], 4294948864  ;;  %333 = vst [vmem:[#allocation5] sm:$0xff] %v9884_v0  ;;  %8113 = vmatprep.mubr.bf16.mxu0 %v9884_v0  ;;  %8545 = vmatprep.mubr.bf16.mxu1 %v9884_v0  ;;  %v9549_v3 = vld [vmem:[#allocation9 + $0x10] sm:$0xff]   ;;  %v9550_v5 = vld [vmem:[#allocation9 + $0x18] sm:$0xff]   ;;  %vm633_vm3 = vcmask 1047552  }
  0x6f   : > { %8097 = vmatprep.subr.bf16.mxu0 %v9547_v1  ;;  %vm10116_vm2 = vmand %vm389_vm0, %vm390_vm1  ;;  %v392_v6 = vld [vmem:[#allocation5 + $0x8] sm:$0x1]  ;;  %v440_v7 = vld [vmem:[%s10106_s21] sm:$0xff]  ;;  %vm732_vm4 = vsmask.f32 7938  ;;  %vm337_vm6 = vcmask 1047559  }
  0x70   : > { %8098 = vmatpush3.bf16.msra.mxu0 %v9547_v1  ;;  %v441_v8 = vld [vmem:[%s10106_s21 + $0x8] sm:$0xff]  ;;  %v393_v9 = vsel %vm10116_vm2, 0, %v392_v6  ;;  %v9551_v11 = vld [vmem:[#allocation9 + $0x20] sm:$0xff]   ;;  %v442_v13 = vld [vmem:[%s10106_s21 + $0x10] sm:$0xff]  ;;  %vm338_vm7 = vsmask.f32 7966 }
  0x71   : > { %8099 = vmatprep.subr.bf16.mxu0 %v9548_v2  ;;  %v10124_v10 = vpack.c.bf16 %v441_v8, %v440_v7  ;;  %394 = vst [vmem:[#allocation5 + $0x8] sm:$0x1] %v393_v9  ;;  %v395_v12 = vld [vmem:[#allocation5 + $0x10] sm:$0x1]  ;;  %v443_v14 = vld [vmem:[%s10106_s21 + $0x18] sm:$0xff]  ;;  %v445_v22 = vld [vmem:[%s10106_s21 + $0x28] sm:$0xff] }
  0x72   : > { %v396_v17 = vsel %vm10116_vm2, 0, %v395_v12  ;;  %v10132_v18 = vpack.c.bf16 %v443_v14, %v442_v13  ;;  %v398_v19 = vld [vmem:[#allocation5 + $0x18] sm:$0x1]  ;;  %v444_v20 = vld [vmem:[%s10106_s21 + $0x20] sm:$0xff]  ;;  %vm10142_vm5 = vmand %vm633_vm3, %vm732_vm4  ;;  %vm634_vm8 = vsmask.f32 7424 }
  0x73   : > { %v506_v15 = vshrl.u32 %v10124_v10, 16  ;;  %v508_v16 = vshll.u32 %v10124_v10, 16  ;;  %397 = vst [vmem:[#allocation5 + $0x10] sm:$0x1] %v396_v17  ;;  %v399_v21 = vsel %vm10116_vm2, 0, %v398_v19  ;;  %v446_v27 = vld [vmem:[%s10106_s21 + $0x30] sm:$0xff]  ;;  %v10149_v28 = vpack.c.bf16 %v445_v22, %v444_v20  ;;  %vm10391_vm9 = vmand %vm337_vm6, %vm338_vm7 }
  0x74   : > { %8100 = vmatpush3.bf16.msra.mxu0 %v9548_v2  ;;  %v513_v25 = vshrl.u32 %v10132_v18, 16  ;;  %v515_v26 = vshll.u32 %v10132_v18, 16  ;;  %400 = vst [vmem:[#allocation5 + $0x18] sm:$0x1] %v399_v21  ;;  %v401_v29 = vld [vmem:[#allocation5 + $0x20] sm:$0x1]  ;;  %vm10421_vm10 = vmand %vm633_vm3, %vm634_vm8 }
  0x75   : > { %8101 = vmatprep.subr.bf16.mxu0 %v9549_v3  ;;  %v684_v23 = vrot.slane %v506_v15, 7  ;;  %v447_v30 = vld [vmem:[%s10106_s21 + $0x38] sm:$0xff]  ;;  %v402_v34 = vsel %vm10116_vm2, 0, %v401_v29  ;;  %v448_v36 = vld [vmem:[%s10106_s21 + $0x40] sm:$0xff]  ;;  %v449_v37 = vld [vmem:[%s10106_s21 + $0x48] sm:$0xff]  ;;  %v520_v39 = vshrl.u32 %v10149_v28, 16 }
  0x76   : > { %v404_v31 = vld [vmem:[#allocation5 + $0x28] sm:$0x1]  ;;  %v686_v33 = vrot.slane %v513_v25, 7  ;;  %v10158_v35 = vpack.c.bf16 %v447_v30, %v446_v27  ;;  %v9552_v38 = vld [vmem:[#allocation9 + $0x28] sm:$0xff]   ;;  %v522_v40 = vshll.u32 %v10149_v28, 16  ;;  %v10166_v42 = vpack.c.bf16 %v449_v37, %v448_v36  ;;  %v450_v48 = vld [vmem:[%s10106_s21 + $0x50] sm:$0xff] }
  0x77   : > { %v685_v32 = vor.u32 %v684_v23, %v508_v16  ;;  %403 = vst [vmem:[#allocation5 + $0x20] sm:$0x1] %v402_v34  ;;  %v405_v41 = vsel %vm10116_vm2, 0, %v404_v31  ;;  %v407_v47 = vld [vmem:[#allocation5 + $0x30] sm:$0x1]  ;;  %v10173_v49 = vld [vmem:[#allocation9 + $0x30] sm:$0xff]  }
  0x78   : > { %8102 = vmatpush3.bf16.msra.mxu0 %v9549_v3  ;;  %v734_v43 = vld [vmem:[#allocation5 + $0x8] sm:$0xff]  ;;  %v687_v44 = vor.u32 %v686_v33, %v515_v26  ;;  %v527_v45 = vshrl.u32 %v10158_v35, 16  ;;  %v529_v46 = vshll.u32 %v10158_v35, 16  ;;  %406 = vst [vmem:[#allocation5 + $0x28] sm:$0x1] %v405_v41  ;;  %v688_v51 = vrot.slane %v520_v39, 7 }
  0x79   : > { %8103 = vmatprep.subr.bf16.mxu0 %v9550_v5  ;;  %v10177_v50 = vsel %vm10142_vm5, %v685_v32, %v734_v43  ;;  %v534_v52 = vshrl.u32 %v10166_v42, 16  ;;  %v536_v53 = vshll.u32 %v10166_v42, 16  ;;  %v451_v54 = vld [vmem:[%s10106_s21 + $0x58] sm:$0xff]  ;;  %v410_v55 = vld [vmem:[#allocation5 + $0x38] sm:$0x1]  ;;  %v408_v58 = vsel %vm10116_vm2, 0, %v407_v47 }
  0x7a   : > { %736 = vst [vmem:[#allocation5 + $0x8] sm:$0xff] %v10177_v50  ;;  %v737_v56 = vld [vmem:[#allocation5 + $0x10] sm:$0xff]  ;;  %v690_v57 = vrot.slane %v527_v45, 7  ;;  %v10189_v59 = vpack.c.bf16 %v451_v54, %v450_v48  ;;  %v411_v60 = vsel %vm10116_vm2, 0, %v410_v55  ;;  %v453_v62 = vld [vmem:[%s10106_s21 + $0x68] sm:$0xff]  ;;  %v689_v0 = vor.u32 %v688_v51, %v522_v40  ;;  %v454_v9 = vld [vmem:[%s10106_s21 + $0x70] sm:$0xff] }
  0x7b   : > { %v452_v61 = vld [vmem:[%s10106_s21 + $0x60] sm:$0xff]  ;;  %v10197_v63 = vsel %vm10142_vm5, %v687_v44, %v737_v56  ;;  %v740_v1 = vld [vmem:[#allocation5 + $0x18] sm:$0xff]  ;;  %v692_v2 = vrot.slane %v534_v52, 7  ;;  %409 = vst [vmem:[#allocation5 + $0x30] sm:$0x1] %v408_v58  ;;  %v455_v17 = vld [vmem:[%s10106_s21 + $0x78] sm:$0xff] }
  0x7c   : > { %8104 = vmatpush3.bf16.msra.mxu0 %v9550_v5  ;;  %412 = vst [vmem:[#allocation5 + $0x38] sm:$0x1] %v411_v60  ;;  %v10203_v3 = vpack.c.bf16 %v453_v62, %v452_v61  ;;  %739 = vst [vmem:[#allocation5 + $0x10] sm:$0xff] %v10197_v63  ;;  %v691_v5 = vor.u32 %v690_v57, %v529_v46  ;;  %v541_v6 = vshrl.u32 %v10189_v59, 16  ;;  %v543_v7 = vshll.u32 %v10189_v59, 16  ;;  %v456_v20 = vld [vmem:[%s10106_s21 + $0x80] sm:$0xff] }
  0x7d   : > { %8105 = vmatprep.subr.bf16.mxu0 %v9551_v11  ;;  %v413_v8 = vld [vmem:[#allocation5 + $0x40] sm:$0x1]  ;;  %v693_v12 = vor.u32 %v692_v2, %v536_v53  ;;  %v416_v19 = vld [vmem:[#allocation5 + $0x48] sm:$0x1]  ;;  %v10226_v29 = vpack.c.bf16 %v455_v17, %v454_v9  ;;  %v457_v31 = vld [vmem:[%s10106_s21 + $0x88] sm:$0xff]  ;;  %s11216_s12 = scalar_lea.vmem [#allocation12], %s7506_s29 }
  0x7e   : > { %v548_v13 = vshrl.u32 %v10203_v3, 16  ;;  %v550_v14 = vshll.u32 %v10203_v3, 16  ;;  %v9554_v21 = vld [vmem:[#allocation9 + $0x38] sm:$0xff]   ;;  %v743_v22 = vld [vmem:[#allocation5 + $0x20] sm:$0xff]  ;;  %v694_v23 = vrot.slane %v541_v6, 7  ;;  %v414_v27 = vsel %vm10116_vm2, 0, %v413_v8 }
  0x7f   : > { %v417_v30 = vsel %vm10116_vm2, 0, %v416_v19  ;;  %v10234_v32 = vsel %vm10142_vm5, %v691_v5, %v743_v22  ;;  %v746_v33 = vld [vmem:[#allocation5 + $0x28] sm:$0xff]  ;;  %415 = vst [vmem:[#allocation5 + $0x40] sm:$0x1] %v414_v27  ;;  %v10238_v36 = vpack.c.bf16 %v457_v31, %v456_v20  ;;  %v555_v41 = vshrl.u32 %v10226_v29, 16  ;;  %v458_v47 = vld [vmem:[%s10106_s21 + $0x90] sm:$0xff] }
  0x80   : > { %8106 = vmatpush3.bf16.msra.mxu0 %v9551_v11  ;;  %v10213_v11 = vsel %vm10142_vm5, %v689_v0, %v740_v1  ;;  %v696_v34 = vrot.slane %v548_v13, 7  ;;  %418 = vst [vmem:[#allocation5 + $0x48] sm:$0x1] %v417_v30  ;;  %745 = vst [vmem:[#allocation5 + $0x20] sm:$0xff] %v10234_v32  ;;  %v10243_v37 = vsel %vm10142_vm5, %v693_v12, %v746_v33  ;;  %v557_v43 = vshll.u32 %v10226_v29, 16  ;;  %v459_v48 = vld [vmem:[%s10106_s21 + $0x98] sm:$0xff] }
  0x81   : > { %8107 = vmatprep.subr.bf16.mxu0 %v9552_v38  ;;  %742 = vst [vmem:[#allocation5 + $0x18] sm:$0xff] %v10213_v11  ;;  %v419_v44 = vld [vmem:[#allocation5 + $0x50] sm:$0x1]  ;;  %748 = vst [vmem:[#allocation5 + $0x28] sm:$0xff] %v10243_v37  ;;  %v562_v54 = vshrl.u32 %v10238_v36, 16  ;;  %v564_v55 = vshll.u32 %v10238_v36, 16  ;;  %v10262_v0 = vpack.c.bf16 %v459_v48, %v458_v47 }
  0x82   : > { %v697_v51 = vor.u32 %v696_v34, %v550_v14  ;;  %v420_v56 = vsel %vm10116_vm2, 0, %v419_v44  ;;  %v422_v57 = vld [vmem:[#allocation5 + $0x58] sm:$0x1]  ;;  %v460_v58 = vld [vmem:[%s10106_s21 + $0xa0] sm:$0xff]  ;;  %v698_v62 = vrot.slane %v555_v41, 7  ;;  %v463_v27 = vld [vmem:[%s10106_s21 + $0xb8] sm:$0xff] }
  0x83   : > { %v749_v60 = vld [vmem:[#allocation5 + $0x30] sm:$0xff]  ;;  %v752_v61 = vld [vmem:[#allocation5 + $0x38] sm:$0xff]  ;;  %421 = vst [vmem:[#allocation5 + $0x50] sm:$0x1] %v420_v56  ;;  %v423_v1 = vsel %vm10116_vm2, 0, %v422_v57  ;;  %v700_v9 = vrot.slane %v562_v54, 7 }
  0x84   : > { %8108 = vmatpush3.bf16.msra.mxu0 %v9552_v38  ;;  %v695_v38 = vor.u32 %v694_v23, %v543_v7  ;;  %v461_v2 = vld [vmem:[%s10106_s21 + $0xa8] sm:$0xff]  ;;  %v9555_v5 = vld [vmem:[#allocation9 + $0x40] sm:$0xff]   ;;  %424 = vst [vmem:[#allocation5 + $0x58] sm:$0x1] %v423_v1  ;;  %v699_v17 = vor.u32 %v698_v62, %v557_v43  ;;  %v569_v19 = vshrl.u32 %v10262_v0, 16  ;;  %v571_v20 = vshll.u32 %v10262_v0, 16 }
  0x85   : > { %8109 = vmatprep.subr.bf16.mxu0 %v10173_v49  ;;  %v10277_v12 = vpack.c.bf16 %v461_v2, %v460_v58  ;;  %v425_v22 = vld [vmem:[#allocation5 + $0x60] sm:$0x1]  ;;  %v701_v30 = vor.u32 %v700_v9, %v564_v55  ;;  %v464_v44 = vld [vmem:[%s10106_s21 + $0xc0] sm:$0xff]  ;;  %v465_v58 = vld [vmem:[%s10106_s21 + $0xc8] sm:$0xff]  ;;  %s7664_s14 = sshll.u32 %s9949_s28, 12  ;;  %s7405_s29 = sshll.u32 %s11216_s12, 4  ;;  %s11338_s29 = int_to_ptr.vmem [resolvable:$true] %s7405_s29 }
  0x86   : > { %v10269_v8 = vsel %vm10142_vm5, %v695_v38, %v749_v60  ;;  %v462_v23 = vld [vmem:[%s10106_s21 + $0xb0] sm:$0xff]  ;;  %v426_v34 = vsel %vm10116_vm2, 0, %v425_v22  ;;  %v428_v38 = vld [vmem:[#allocation5 + $0x68] sm:$0x1]  ;;  %v9556_v60 = vld [vmem:[#allocation9 + $0x48] sm:$0xff]   ;;  %v10311_v1 = vpack.c.bf16 %v465_v58, %v464_v44  ;;  %s11336_s9 = scalar_lea.hbm %s11392_s7, %s7664_s14  ;;  %s7392_s28 = scalar_lea.sflag [#allocation8], %s10100_s23 }
  0x87   : > { %751 = vst [vmem:[#allocation5 + $0x30] sm:$0xff] %v10269_v8  ;;  %v11396_v31 = vshrl.u32 %v10277_v12, 16  ;;  %v578_v33 = vshll.u32 %v10277_v12, 16  ;;  %v755_v47 = vld [vmem:[#allocation5 + $0x40] sm:$0xff]  ;;  %v758_v48 = vld [vmem:[#allocation5 + $0x48] sm:$0xff]  ;;  %v10296_v56 = vpack.c.bf16 %v463_v27, %v462_v23  ;;  %v429_v57 = vsel %vm10116_vm2, 0, %v428_v38 }
  0x88   : > { %8110 = vmatpush3.bf16.msra.mxu0 %v10173_v49  ;;  %v10273_v49 = vsel %vm10142_vm5, %v697_v51, %v752_v61  ;;  %v702_v51 = vrot.slane %v569_v19, 7  ;;  %427 = vst [vmem:[#allocation5 + $0x60] sm:$0x1] %v426_v34  ;;  %v10303_v61 = vsel %vm10142_vm5, %v699_v17, %v755_v47  ;;  %430 = vst [vmem:[#allocation5 + $0x68] sm:$0x1] %v429_v57  ;;  %v466_v23 = vld [vmem:[%s10106_s21 + $0xd0] sm:$0xff] }
  0x89   : > { %8111 = vmatprep.subr.bf16.mxu0 %v9554_v21  ;;  %754 = vst [vmem:[#allocation5 + $0x38] sm:$0xff] %v10273_v49  ;;  %v704_v62 = vrot.slane %v11396_v31, 7  ;;  %757 = vst [vmem:[#allocation5 + $0x40] sm:$0xff] %v10303_v61  ;;  %v11398_v9 = vshrl.u32 %v10296_v56, 16  ;;  %v585_v17 = vshll.u32 %v10296_v56, 16  ;;  %v467_v27 = vld [vmem:[%s10106_s21 + $0xd8] sm:$0xff] }
  0x8a   : > { %v703_v2 = vor.u32 %v702_v51, %v571_v20  ;;  %v431_v22 = vld [vmem:[#allocation5 + $0x70] sm:$0x1]  ;;  %v11397_v38 = vshrl.u32 %v10311_v1, 16  ;;  %v592_v44 = vshll.u32 %v10311_v1, 16  ;;  %v10335_v58 = vpack.c.bf16 %v467_v27, %v466_v23  ;;  %v9637_v24 = vld [vmem:[#allocation11 + $0x90] sm:$0xff]   ;;  %p11441_p0 = scmp.ne.s32.totalorder %s11413_s16, 0 }
  0x8b   : > { %v705_v34 = vor.u32 %v704_v62, %v578_v33  ;;  %v432_v47 = vsel %vm10116_vm2, 0, %v431_v22  ;;  %v706_v57 = vrot.slane %v11398_v9, 7  ;;  %v468_v31 = vld [vmem:[%s10106_s21 + $0xe0] sm:$0xff]  ;;  %v469_v22 = vld [vmem:[%s10106_s21 + $0xe8] sm:$0xff]  ;;  %s9885_s20 = smov [#allocation12]  }
  0x8c   : > { %8112 = vmatpush3.bf16.msra.mxu0 %v9554_v21  ;;  %v10307_v21 = vsel %vm10142_vm5, %v701_v30, %v758_v48  ;;  %v761_v30 = vld [vmem:[#allocation5 + $0x50] sm:$0xff]  ;;  %v434_v48 = vld [vmem:[#allocation5 + $0x78] sm:$0x1]  ;;  %433 = vst [vmem:[#allocation5 + $0x70] sm:$0x1] %v432_v47  ;;  %v11400_v27 = vshrl.u32 %v10335_v58, 16 }
  0x8d   : > { %8145 = vmatprep.subr.bf16.mxu0 %v9555_v5  ;;  %760 = vst [vmem:[#allocation5 + $0x48] sm:$0xff] %v10307_v21  ;;  %v10331_v51 = vsel %vm10142_vm5, %v703_v2, %v761_v30  ;;  %v435_v62 = vsel %vm10116_vm2, 0, %v434_v48  ;;  %v708_v2 = vrot.slane %v11397_v38, 7  ;;  %v10348_v30 = vpack.c.bf16 %v469_v22, %v468_v31  ;;  %v9558_v22 = vld [vmem:[#allocation9 + $0x58] sm:$0xff]   ;;  %s9809_s11 = sshll.u32 %s9885_s20, 4  ;;  %s9810_s11 = int_to_ptr.vmem [resolvable:$false] %s9809_s11 }
  0x8e   : > { %763 = vst [vmem:[#allocation5 + $0x50] sm:$0xff] %v10331_v51  ;;  %436 = vst [vmem:[#allocation5 + $0x78] sm:$0x1] %v435_v62  ;;  %v707_v23 = vor.u32 %v706_v57, %v585_v17  ;;  %v11402_v47 = vshll.u32 %v10335_v58, 16  ;;  %v710_v57 = vrot.slane %v11400_v27, 7  ;;  %v524_v27 = vrot.slane %v522_v40, 1  ;;  %p9812_p7 = scmp.lt.s32.totalorder %s11338_s29, %s9810_s11 }
  0x8f   : > { %8114 = vmatmul.mubr.bf16.vlgmr.msra.gmra.mrb[0].mxu0 %v10177_v50  ;;  %v764_v50 = vld [vmem:[#allocation5 + $0x58] sm:$0xff]  ;;  %v767_v48 = vld [vmem:[#allocation5 + $0x60] sm:$0xff]  ;;  %v11401_v38 = vshll.u32 %v10348_v30, 16  ;;  %v770_v62 = vld [vmem:[#allocation5 + $0x68] sm:$0xff]  ;;  %v538_v40 = vrot.slane %v536_v53, 1  ;;  %v552_v53 = vrot.slane %v550_v14, 1 }
  0x90   : > { %8146 = vmatpush3.bf16.msra.mxu0 %v9555_v5  ;;  %8117 = vmatprep.mubr.bf16.mxu0 %v10197_v63  ;;  %v9557_v5 = vld [vmem:[#allocation9 + $0x50] sm:$0xff]   ;;  %v10344_v63 = vsel %vm10142_vm5, %v705_v34, %v764_v50  ;;  %v709_v34 = vor.u32 %v708_v2, %v592_v44  ;;  %v11399_v50 = vshrl.u32 %v10348_v30, 16  ;;  %v10361_v31 = vsel %vm10142_vm5, %v707_v23, %v767_v48  ;;  %s9811_s22 = scalar_lea.vmem %s9810_s11, 8192 }
  0x91   : > { %8147 = vmatprep.subr.bf16.mxu0 %v9556_v60  ;;  %766 = vst [vmem:[#allocation5 + $0x58] sm:$0xff] %v10344_v63  ;;  %769 = vst [vmem:[#allocation5 + $0x60] sm:$0xff] %v10361_v31  ;;  %v525_v14 = vor.u32 %v524_v27, %v520_v39 }
  0x92   : > { %v10368_v2 = vsel %vm10142_vm5, %v709_v34, %v770_v62  ;;  %v712_v9 = vrot.slane %v11399_v50, 7  ;;  %v9559_v50 = vld [vmem:[#allocation9 + $0x60] sm:$0xff]  }
  0x93   : > { %772 = vst [vmem:[#allocation5 + $0x68] sm:$0xff] %v10368_v2  ;;  %v773_v23 = vld [vmem:[#allocation5 + $0x70] sm:$0xff] }
  0x94   : > { %8148 = vmatpush3.bf16.msra.mxu0 %v9556_v60  ;;  %v711_v60 = vor.u32 %v710_v57, %v11402_v47  ;;  %v713_v48 = vor.u32 %v712_v9, %v11401_v38  ;;  %v9560_v9 = vld [vmem:[#allocation9 + $0x68] sm:$0xff]   ;;  %v517_v57 = vrot.slane %v515_v26, 1  ;;  %v9561_v26 = vld [vmem:[#allocation9 + $0x70] sm:$0xff]  }
  0x95   : > { %8149 = vmatprep.subr.bf16.mxu0 %v9557_v5  ;;  %v776_v62 = vld [vmem:[#allocation5 + $0x78] sm:$0xff] }
  0x96   : > { %v10381_v34 = vsel %vm10142_vm5, %v711_v60, %v773_v23  ;;  %v340_v60 = vld [vmem:[#allocation4 + $0x8] sm:$0x80] }
  0x97   : > { %8118 = vmatmul.mubr.bf16.gmra.mrb[4].mxu0 %v10213_v11  ;;  %775 = vst [vmem:[#allocation5 + $0x70] sm:$0xff] %v10381_v34  ;;  %v10386_v11 = vsel %vm10142_vm5, %v713_v48, %v776_v62  ;;  %v341_v23 = vsel %vm10391_vm9, 0, %v340_v60  ;;  %v343_v48 = vld [vmem:[#allocation4 + $0x10] sm:$0x80]  ;;  %v346_v62 = vld [vmem:[#allocation4 + $0x18] sm:$0x80] }
  0x98   : > { %8121 = vmatprep.mubr.bf16.mxu0 %v10234_v32  ;;  %8150 = vmatpush3.bf16.msra.mxu0 %v9557_v5  ;;  %778 = vst [vmem:[#allocation5 + $0x78] sm:$0xff] %v10386_v11  ;;  %v510_v32 = vrot.slane %v508_v16, 1  ;;  %342 = vst [vmem:[#allocation4 + $0x8] sm:$0x80] %v341_v23  ;;  %v344_v16 = vsel %vm10391_vm9, 0, %v343_v48  ;;  %v347_v38 = vsel %vm10391_vm9, 0, %v346_v62 }
  0x99   : > { %8151 = vmatprep.subr.bf16.mxu0 %v9558_v22  ;;  %345 = vst [vmem:[#allocation4 + $0x10] sm:$0x80] %v344_v16  ;;  %348 = vst [vmem:[#allocation4 + $0x18] sm:$0x80] %v347_v38  ;;  %v531_v60 = vrot.slane %v529_v46, 1  ;;  %v545_v46 = vrot.slane %v543_v7, 1  ;;  %v518_v7 = vor.u32 %v517_v57, %v513_v25  ;;  %v539_v25 = vor.u32 %v538_v40, %v534_v52 }
  0x9a   : > { %v352_v47 = vld [vmem:[#allocation4 + $0x28] sm:$0x80]  ;;  %v355_v38 = vld [vmem:[#allocation4 + $0x30] sm:$0x80]  ;;  %v358_v48 = vld [vmem:[#allocation4 + $0x38] sm:$0x80]  ;;  %v553_v40 = vor.u32 %v552_v53, %v548_v13 }
  0x9b   : > { %v359_v62 = vsel %vm10391_vm9, 0, %v358_v48  ;;  %v361_v16 = vld [vmem:[#allocation4 + $0x40] sm:$0x80]  ;;  %v566_v48 = vrot.slane %v564_v55, 1  ;;  %v9588_v5 = vld [vmem:[#allocation9 + $0x148] sm:$0xff]  }
  0x9c   : > { %8152 = vmatpush3.bf16.msra.mxu0 %v9558_v22  ;;  %v349_v22 = vld [vmem:[#allocation4 + $0x20] sm:$0x80]  ;;  %360 = vst [vmem:[#allocation4 + $0x38] sm:$0x80] %v359_v62  ;;  %v367_v62 = vld [vmem:[#allocation4 + $0x50] sm:$0x80] }
  0x9d   : > { %8153 = vmatprep.subr.bf16.mxu0 %v9559_v50  ;;  %v350_v23 = vsel %vm10391_vm9, 0, %v349_v22  ;;  %v9562_v22 = vld [vmem:[#allocation9 + $0x78] sm:$0xff]   ;;  %v567_v55 = vor.u32 %v566_v48, %v562_v54  ;;  %v11428_v48 = vshrl.u32 %v10311_v1, 16 }
  0x9e   : > { %351 = vst [vmem:[#allocation4 + $0x20] sm:$0x80] %v350_v23 }
  0x9f   : > { %8122 = vmatmul.mubr.bf16.gmra.mrb[8].mxu0 %v10243_v37  ;;  %v353_v37 = vsel %vm10391_vm9, 0, %v352_v47  ;;  %v511_v47 = vor.u32 %v510_v32, %v506_v15  ;;  %v362_v15 = vsel %vm10391_vm9, 0, %v361_v16  ;;  %v364_v32 = vld [vmem:[#allocation4 + $0x48] sm:$0x80] }
  0xa0   : > { %8125 = vmatprep.mubr.bf16.mxu0 %v10269_v8  ;;  %8154 = vmatpush3.bf16.msra.mxu0 %v9559_v50  ;;  %354 = vst [vmem:[#allocation4 + $0x28] sm:$0x80] %v353_v37  ;;  %v356_v50 = vsel %vm10391_vm9, 0, %v355_v38  ;;  %v636_v23 = vld [vmem:[#allocation4 + $0x8] sm:$0xff]  ;;  %v532_v37 = vor.u32 %v531_v60, %v527_v45  ;;  %363 = vst [vmem:[#allocation4 + $0x40] sm:$0x80] %v362_v15  ;;  %v546_v38 = vor.u32 %v545_v46, %v541_v6 }
  0xa1   : > { %8155 = vmatprep.subr.bf16.mxu0 %v9560_v9  ;;  %357 = vst [vmem:[#allocation4 + $0x30] sm:$0x80] %v356_v50  ;;  %v365_v39 = vsel %vm10391_vm9, 0, %v364_v32  ;;  %v10445_v27 = vsel %vm10421_vm10, %v511_v47, %v636_v23  ;;  %v642_v57 = vld [vmem:[#allocation4 + $0x18] sm:$0xff]  ;;  %v10450_v45 = vld [vmem:[#allocation9 + $0x80] sm:$0xff]   ;;  %v559_v6 = vrot.slane %v557_v43, 1 }
  0xa2   : > { %366 = vst [vmem:[#allocation4 + $0x48] sm:$0x80] %v365_v39  ;;  %638 = vst [vmem:[#allocation4 + $0x8] sm:$0xff] %v10445_v27  ;;  %v10459_v60 = vsel %vm10421_vm10, %v525_v14, %v642_v57  ;;  %v370_v14 = vld [vmem:[#allocation4 + $0x58] sm:$0x80]  ;;  %v573_v32 = vrot.slane %v571_v20, 1 }
  0xa3   : > { %644 = vst [vmem:[#allocation4 + $0x18] sm:$0xff] %v10459_v60  ;;  %v560_v43 = vor.u32 %v559_v6, %v555_v41  ;;  %v580_v23 = vrot.slane %v578_v33, 1  ;;  %v594_v6 = vrot.slane %v592_v44, 1  ;;  %v9638_v8 = vld [vmem:[#allocation11 + $0x98] sm:$0xff]  }
  0xa4   : > { %8156 = vmatpush3.bf16.msra.mxu0 %v9560_v9  ;;  %v639_v9 = vld [vmem:[#allocation4 + $0x10] sm:$0xff] }
  0xa5   : > { %8157 = vmatprep.subr.bf16.mxu0 %v9561_v26  ;;  %v10455_v52 = vsel %vm10421_vm10, %v518_v7, %v639_v9  ;;  %v368_v7 = vsel %vm10391_vm9, 0, %v367_v62  ;;  %v373_v9 = vld [vmem:[#allocation4 + $0x60] sm:$0x80] }
  0xa6   : > { %641 = vst [vmem:[#allocation4 + $0x10] sm:$0xff] %v10455_v52  ;;  %369 = vst [vmem:[#allocation4 + $0x50] sm:$0x80] %v368_v7 }
  0xa7   : > { %8126 = vmatmul.mubr.bf16.gmra.mrb[12].mxu0 %v10273_v49  ;;  %v645_v49 = vld [vmem:[#allocation4 + $0x20] sm:$0xff]  ;;  %v648_v46 = vld [vmem:[#allocation4 + $0x28] sm:$0xff] }
  0xa8   : > { %8129 = vmatprep.mubr.bf16.mxu0 %v10303_v61  ;;  %8158 = vmatpush3.bf16.msra.mxu0 %v9561_v26  ;;  %v10472_v47 = vsel %vm10421_vm10, %v532_v37, %v645_v49  ;;  %v10476_v13 = vsel %vm10421_vm10, %v539_v25, %v648_v46  ;;  %v651_v61 = vld [vmem:[#allocation4 + $0x30] sm:$0xff]  ;;  %v654_v26 = vld [vmem:[#allocation4 + $0x38] sm:$0xff]  ;;  %v657_v41 = vld [vmem:[#allocation4 + $0x40] sm:$0xff]  ;;  %v574_v37 = vor.u32 %v573_v32, %v569_v19  ;;  %v11426_v25 = vshrl.u32 %v10277_v12, 16 }
  0xa9   : > { %8159 = vmatprep.subr.bf16.mxu0 %v9562_v22  ;;  %647 = vst [vmem:[#allocation4 + $0x20] sm:$0xff] %v10472_v47  ;;  %650 = vst [vmem:[#allocation4 + $0x28] sm:$0xff] %v10476_v13  ;;  %v10486_v53 = vsel %vm10421_vm10, %v546_v38, %v651_v61  ;;  %v10490_v50 = vsel %vm10421_vm10, %v553_v40, %v654_v26  ;;  %v10499_v54 = vsel %vm10421_vm10, %v560_v43, %v657_v41  ;;  %v660_v16 = vld [vmem:[#allocation4 + $0x48] sm:$0xff]  ;;  %v379_v61 = vld [vmem:[#allocation4 + $0x70] sm:$0x80] }
  0xaa   : > { %653 = vst [vmem:[#allocation4 + $0x30] sm:$0xff] %v10486_v53  ;;  %656 = vst [vmem:[#allocation4 + $0x38] sm:$0xff] %v10490_v50  ;;  %v10506_v15 = vsel %vm10421_vm10, %v567_v55, %v660_v16  ;;  %v581_v39 = vor.u32 %v580_v23, %v11426_v25  ;;  %v376_v38 = vld [vmem:[#allocation4 + $0x68] sm:$0x80]  ;;  %v587_v40 = vrot.slane %v585_v17, 1  ;;  %v11427_v49 = vshrl.u32 %v10296_v56, 16 }
  0xab   : > { %659 = vst [vmem:[#allocation4 + $0x40] sm:$0xff] %v10499_v54  ;;  %662 = vst [vmem:[#allocation4 + $0x48] sm:$0xff] %v10506_v15  ;;  %v377_v33 = vsel %vm10391_vm9, 0, %v376_v38  ;;  %v595_v43 = vor.u32 %v594_v6, %v11428_v48  ;;  %v382_v55 = vld [vmem:[#allocation4 + $0x78] sm:$0x80]  ;;  %v11429_v41 = vshll.u32 %v10335_v58, 16 }
  0xac   : > { %8160 = vmatpush3.bf16.msra.mxu0 %v9562_v22  ;;  %v371_v22 = vsel %vm10391_vm9, 0, %v370_v14  ;;  %378 = vst [vmem:[#allocation4 + $0x68] sm:$0x80] %v377_v33  ;;  %v588_v46 = vor.u32 %v587_v40, %v11427_v49  ;;  %v383_v44 = vsel %vm10391_vm9, 0, %v382_v55  ;;  %v11430_v14 = vshll.u32 %v10348_v30, 16  ;;  %v9566_v38 = vld [vmem:[#allocation9 + $0x98] sm:$0xff]  }
  0xad   : > { %8193 = vmatprep.subr.bf16.mxu0 %v10450_v45  ;;  %372 = vst [vmem:[#allocation4 + $0x58] sm:$0x80] %v371_v22  ;;  %v663_v57 = vld [vmem:[#allocation4 + $0x50] sm:$0xff]  ;;  %384 = vst [vmem:[#allocation4 + $0x78] sm:$0x80] %v383_v44  ;;  %v601_v7 = vrot.slane %v11429_v41, 1 }
  0xae   : > { %v10523_v20 = vsel %vm10421_vm10, %v574_v37, %v663_v57  ;;  %v608_v16 = vrot.slane %v11430_v14, 1  ;;  %v11431_v22 = vshrl.u32 %v10335_v58, 16  ;;  %v11432_v23 = vshrl.u32 %v10348_v30, 16  ;;  %v9564_v57 = vld [vmem:[#allocation9 + $0x88] sm:$0xff]   ;;  %v9569_v33 = vld [vmem:[#allocation9 + $0xb0] sm:$0xff]   ;;  %v9571_v40 = vld [vmem:[#allocation9 + $0xc0] sm:$0xff]  }
  0xaf   : > { %8130 = vmatmul.mubr.bf16.gmra.mrb[16].mxu0 %v10307_v21  ;;  %v374_v21 = vsel %vm10391_vm9, 0, %v373_v9  ;;  %665 = vst [vmem:[#allocation4 + $0x50] sm:$0xff] %v10523_v20  ;;  %v10578_v9 = vld [vmem:[#allocation5] sm:$0xff]  ;;  %v471_v48 = vld [vmem:[%s10106_s21 + $0xf8] sm:$0xff]  ;;  %v9572_v44 = vld [vmem:[#allocation9 + $0xc8] sm:$0xff]  }
  0xb0   : > { %8133 = vmatprep.mubr.bf16.mxu0 %v10331_v51  ;;  %375 = vst [vmem:[#allocation4 + $0x60] sm:$0x80] %v374_v21  ;;  %v602_v32 = vor.u32 %v601_v7, %v11431_v22  ;;  %v609_v37 = vor.u32 %v608_v16, %v11432_v23  ;;  %v9565_v21 = vld [vmem:[#allocation9 + $0x90] sm:$0xff]   ;;  %v9574_v7 = vld [vmem:[#allocation9 + $0xd8] sm:$0xff]   ;;  %v9575_v14 = vld [vmem:[#allocation9 + $0xe0] sm:$0xff]  }
  0xb1   : > { %v437_v6 = vld [vmem:[#allocation5 + $0x80] sm:$0x1]  ;;  %v9576_v16 = vld [vmem:[#allocation9 + $0xe8] sm:$0xff]   ;;  %v9579_v23 = vld [vmem:[#allocation9 + $0x100] sm:$0xff]  }
  0xb2   : > { %v438_v49 = vsel %vm10116_vm2, 0, %v437_v6  ;;  %v9573_v41 = vld [vmem:[#allocation9 + $0xd0] sm:$0xff]   ;;  %v9698_v6 = vld [vmem:[#allocation5 + $0x38] sm:$0xff] }
  0xb3   : > { %439 = vst [vmem:[#allocation5 + $0x80] sm:$0x1] %v438_v49  ;;  %v9577_v22 = vld [vmem:[#allocation9 + $0xf0] sm:$0xff]  }
  0xb4   : > { %v666_v51 = vld [vmem:[#allocation4 + $0x58] sm:$0xff]  ;;  %v9585_v49 = vld [vmem:[#allocation9 + $0x130] sm:$0xff]  }
  0xb5   : > { %v10530_v19 = vsel %vm10421_vm10, %v581_v39, %v666_v51  ;;  %v678_v39 = vld [vmem:[#allocation4 + $0x78] sm:$0xff]  ;;  %v9568_v51 = vld [vmem:[#allocation9 + $0xa8] sm:$0xff]  }
  0xb6   : > { %668 = vst [vmem:[#allocation4 + $0x58] sm:$0xff] %v10530_v19 }
  0xb7   : > { %8134 = vmatmul.mubr.bf16.gmra.mrb[20].mxu0 %v10344_v63  ;;  %v669_v26 = vld [vmem:[#allocation4 + $0x60] sm:$0xff]  ;;  %v380_v63 = vsel %vm10391_vm9, 0, %v379_v61 }
  0xb8   : > { %8137 = vmatprep.mubr.bf16.mxu0 %v10361_v31  ;;  %v10547_v17 = vsel %vm10421_vm10, %v588_v46, %v669_v26  ;;  %v672_v31 = vld [vmem:[#allocation4 + $0x68] sm:$0xff]  ;;  %381 = vst [vmem:[#allocation4 + $0x70] sm:$0x80] %v380_v63  ;;  %v470_v46 = vld [vmem:[%s10106_s21 + $0xf0] sm:$0xff] }
  0xb9   : > { %671 = vst [vmem:[#allocation4 + $0x60] sm:$0xff] %v10547_v17  ;;  %v10554_v62 = vsel %vm10421_vm10, %v595_v43, %v672_v31  ;;  %v10598_v43 = vpack.c.bf16 %v471_v48, %v470_v46  ;;  %v9586_v46 = vld [vmem:[#allocation9 + $0x138] sm:$0xff]   ;;  %v9699_v48 = vld [vmem:[#allocation5 + $0x40] sm:$0xff] }
  0xba   : > { %674 = vst [vmem:[#allocation4 + $0x68] sm:$0xff] %v10554_v62  ;;  %v779_v55 = vld [vmem:[#allocation5 + $0x80] sm:$0xff] }
  0xbb   : > { %v611_v61 = vshrl.u32 %v10598_v43, 16  ;;  %v613_v26 = vshll.u32 %v10598_v43, 16 }
  0xbd   : > { %v714_v63 = vrot.slane %v611_v61, 7 }
  0xbf   : > { %8138 = vmatmul.mubr.bf16.gmra.mrb[24].mxu0 %v10368_v2  ;;  %v675_v25 = vld [vmem:[#allocation4 + $0x70] sm:$0xff]  ;;  %v715_v4 = vor.u32 %v714_v63, %v613_v26  ;;  %v9700_v63 = vld [vmem:[#allocation5 + $0x48] sm:$0xff] }
  0xc0   : > { %8141 = vmatprep.mubr.bf16.mxu0 %v10381_v34  ;;  %v10569_v2 = vsel %vm10421_vm10, %v602_v32, %v675_v25  ;;  %v10574_v34 = vsel %vm10421_vm10, %v609_v37, %v678_v39  ;;  %v9578_v32 = vld [vmem:[#allocation9 + $0xf8] sm:$0xff]   ;;  %v9580_v25 = vld [vmem:[#allocation9 + $0x108] sm:$0xff]   ;;  %v9693_v39 = vld [vmem:[#allocation5 + $0x10] sm:$0xff] }
  0xc1   : > { %677 = vst [vmem:[#allocation4 + $0x70] sm:$0xff] %v10569_v2  ;;  %680 = vst [vmem:[#allocation4 + $0x78] sm:$0xff] %v10574_v34  ;;  %v10610_v31 = vsel %vm10142_vm5, %v715_v4, %v779_v55  ;;  %v9692_v37 = vld [vmem:[#allocation5 + $0x8] sm:$0xff]  ;;  %v9587_v4 = vld [vmem:[#allocation9 + $0x140] sm:$0xff]  }
  0xc2   : > { %781 = vst [vmem:[#allocation5 + $0x80] sm:$0xff] %v10610_v31  ;;  %v9701_v55 = vld [vmem:[#allocation5 + $0x50] sm:$0xff] }
  0xc7   : > { %8142 = vmatmul.mubr.bf16.gmra.mrb[28].mxu0 %v10386_v11  ;;  %v9567_v11 = vld [vmem:[#allocation9 + $0xa0] sm:$0xff]  }
  0xc8   : > { %8161 = vmatprep.mubr.bf16.mxu0 %v10578_v9 }
  0xcf   : > { %8162 = vmatmul.mubr.bf16.vlgmr.msra.gmra.mrb[0].mxu0 %v10124_v10 }
  0xd0   : > { %8194 = vmatpush3.bf16.msra.mxu0 %v10450_v45  ;;  %8165 = vmatprep.mubr.bf16.mxu0 %v10132_v18  ;;  %v9570_v45 = vld [vmem:[#allocation9 + $0xb8] sm:$0xff]  }
  0xd1   : > { %8195 = vmatprep.subr.bf16.mxu0 %v9564_v57 }
  0xd4   : > { %8196 = vmatpush3.bf16.msra.mxu0 %v9564_v57  ;;  %v9694_v57 = vld [vmem:[#allocation5 + $0x18] sm:$0xff] }
  0xd5   : > { %8197 = vmatprep.subr.bf16.mxu0 %v9565_v21 }
  0xd7   : > { %8166 = vmatmul.mubr.bf16.gmra.mrb[4].mxu0 %v10149_v28 }
  0xd8   : > { %8169 = vmatprep.mubr.bf16.mxu0 %v10158_v35  ;;  %8198 = vmatpush3.bf16.msra.mxu0 %v9565_v21  ;;  %v9581_v21 = vld [vmem:[#allocation9 + $0x110] sm:$0xff]  }
  0xd9   : > { %8199 = vmatprep.subr.bf16.mxu0 %v9566_v38 }
  0xdc   : > { %8200 = vmatpush3.bf16.msra.mxu0 %v9566_v38  ;;  %v9582_v38 = vld [vmem:[#allocation9 + $0x118] sm:$0xff]  }
  0xdd   : > { %8201 = vmatprep.subr.bf16.mxu0 %v9567_v11 }
  0xdf   : > { %8170 = vmatmul.mubr.bf16.gmra.mrb[8].mxu0 %v10166_v42 }
  0xe0   : > { %8173 = vmatprep.mubr.bf16.mxu0 %v10189_v59  ;;  %8202 = vmatpush3.bf16.msra.mxu0 %v9567_v11  ;;  %v9695_v11 = vld [vmem:[#allocation5 + $0x20] sm:$0xff] }
  0xe1   : > { %8203 = vmatprep.subr.bf16.mxu0 %v9568_v51 }
  0xe4   : > { %8204 = vmatpush3.bf16.msra.mxu0 %v9568_v51  ;;  %v9696_v51 = vld [vmem:[#allocation5 + $0x28] sm:$0xff] }
  0xe5   : > { %8205 = vmatprep.subr.bf16.mxu0 %v9569_v33 }
  0xe7   : > { %8174 = vmatmul.mubr.bf16.gmra.mrb[12].mxu0 %v10203_v3 }
  0xe8   : > { %8177 = vmatprep.mubr.bf16.mxu0 %v10226_v29  ;;  %8206 = vmatpush3.bf16.msra.mxu0 %v9569_v33  ;;  %v9583_v33 = vld [vmem:[#allocation9 + $0x120] sm:$0xff]  }
  0xe9   : > { %8207 = vmatprep.subr.bf16.mxu0 %v9570_v45 }
  0xec   : > { %8208 = vmatpush3.bf16.msra.mxu0 %v9570_v45  ;;  %v9584_v45 = vld [vmem:[#allocation9 + $0x128] sm:$0xff]  }
  0xed   : > { %8241 = vmatprep.subr.bf16.mxu0 %v9571_v40 }
  0xef   : > { %8178 = vmatmul.mubr.bf16.gmra.mrb[16].mxu0 %v10238_v36 }
  0xf0   : > { %8181 = vmatprep.mubr.bf16.mxu0 %v10262_v0 }
  0xf7   : > { %8182 = vmatmul.mubr.bf16.gmra.mrb[20].mxu0 %v10277_v12 }
  0xf8   : > { %8185 = vmatprep.mubr.bf16.mxu0 %v10296_v56 }
  0xff   : > { %8186 = vmatmul.mubr.bf16.gmra.mrb[24].mxu0 %v10311_v1 }
 0x100   : > { %8189 = vmatprep.mubr.bf16.mxu0 %v10335_v58 }
 0x107   : > { %8190 = vmatmul.mubr.bf16.gmra.mrb[28].mxu0 %v10348_v30 }
 0x108   : > { %8209 = vmatprep.mubr.bf16.mxu0 %v10578_v9 }
 0x10f   : > { %8210 = vmatmul.mubr.bf16.vlgmr.msra.gmra.mrb[0].mxu0 %v10445_v27 }
 0x110   : > { %8242 = vmatpush3.bf16.msra.mxu0 %v9571_v40  ;;  %8213 = vmatprep.mubr.bf16.mxu0 %v10455_v52  ;;  %v9697_v40 = vld [vmem:[#allocation5 + $0x30] sm:$0xff] }
 0x111   : > { %8243 = vmatprep.subr.bf16.mxu0 %v9572_v44 }
 0x114   : > { %8244 = vmatpush3.bf16.msra.mxu0 %v9572_v44  ;;  %v9702_v44 = vld [vmem:[#allocation5 + $0x58] sm:$0xff] }
 0x115   : > { %8245 = vmatprep.subr.bf16.mxu0 %v9573_v41 }
 0x117   : > { %8214 = vmatmul.mubr.bf16.gmra.mrb[4].mxu0 %v10459_v60 }
 0x118   : > { %8217 = vmatprep.mubr.bf16.mxu0 %v10472_v47  ;;  %8246 = vmatpush3.bf16.msra.mxu0 %v9573_v41  ;;  %v9703_v41 = vld [vmem:[#allocation5 + $0x60] sm:$0xff] }
 0x119   : > { %8247 = vmatprep.subr.bf16.mxu0 %v9574_v7 }
 0x11c   : > { %8248 = vmatpush3.bf16.msra.mxu0 %v9574_v7  ;;  %v9704_v7 = vld [vmem:[#allocation5 + $0x68] sm:$0xff] }
 0x11d   : > { %8249 = vmatprep.subr.bf16.mxu0 %v9575_v14 }
 0x11f   : > { %8218 = vmatmul.mubr.bf16.gmra.mrb[8].mxu0 %v10476_v13 }
 0x120   : > { %8221 = vmatprep.mubr.bf16.mxu0 %v10486_v53  ;;  %8250 = vmatpush3.bf16.msra.mxu0 %v9575_v14  ;;  %v385_v14 = vld [vmem:[#allocation4 + $0x80] sm:$0x80] }
 0x121   : > { %8251 = vmatprep.subr.bf16.mxu0 %v9576_v16 }
 0x124   : > { %8252 = vmatpush3.bf16.msra.mxu0 %v9576_v16  ;;  %v386_v16 = vsel %vm10391_vm9, 0, %v385_v14  ;;  %v10707_v14 = vld [vmem:[#allocation5 + $0x68] sm:$0xff] }
 0x125   : > { %8253 = vmatprep.subr.bf16.mxu0 %v9577_v22  ;;  %387 = vst [vmem:[#allocation4 + $0x80] sm:$0x80] %v386_v16  ;;  %v10709_v16 = vld [vmem:[#allocation5 + $0x70] sm:$0xff] }
 0x127   : > { %8222 = vmatmul.mubr.bf16.gmra.mrb[12].mxu0 %v10490_v50 }
 0x128   : > { %8225 = vmatprep.mubr.bf16.mxu0 %v10499_v54  ;;  %8254 = vmatpush3.bf16.msra.mxu0 %v9577_v22  ;;  %v9705_v22 = vld [vmem:[#allocation5 + $0x70] sm:$0xff] }
 0x129   : > { %8255 = vmatprep.subr.bf16.mxu0 %v9578_v32 }
 0x12c   : > { %8256 = vmatpush3.bf16.msra.mxu0 %v9578_v32  ;;  %v9706_v32 = vld [vmem:[#allocation5 + $0x78] sm:$0xff] }
 0x12d   : > { %8289 = vmatprep.subr.bf16.mxu0 %v9579_v23 }
 0x12f   : > { %8226 = vmatmul.mubr.bf16.gmra.mrb[16].mxu0 %v10506_v15 }
 0x130   : > { %8229 = vmatprep.mubr.bf16.mxu0 %v10523_v20 }
 0x137   : > { %8230 = vmatmul.mubr.bf16.gmra.mrb[20].mxu0 %v10530_v19 }
 0x138   : > { %8233 = vmatprep.mubr.bf16.mxu0 %v10547_v17 }
 0x13f   : > { %8234 = vmatmul.mubr.bf16.gmra.mrb[24].mxu0 %v10554_v62 }
 0x140   : > { %8237 = vmatprep.mubr.bf16.mxu0 %v10569_v2 }
 0x147   : > { %8238 = vmatmul.mubr.bf16.gmra.mrb[28].mxu0 %v10574_v34 }
 0x148   : > { %8257 = vmatprep.mubr.bf16.mxu0 %v9692_v37 }
 0x14f   : > { %8258 = vmatmul.mubr.bf16.vlgmr.msra.gmra.mrb[0].mxu0 %v9693_v39 }
 0x150   : > { %8290 = vmatpush3.bf16.msra.mxu0 %v9579_v23  ;;  %8261 = vmatprep.mubr.bf16.mxu0 %v9694_v57  ;;  %v615_v23 = vrot.slane %v613_v26, 1  ;;  %v9589_v26 = vld [vmem:[#allocation9 + $0x150] sm:$0xff]   ;;  %v9591_v57 = vld [vmem:[#allocation9 + $0x160] sm:$0xff]  }
 0x151   : > { %8291 = vmatprep.subr.bf16.mxu0 %v9580_v25 }
 0x152   : > { %v616_v37 = vor.u32 %v615_v23, %v611_v61  ;;  %v9590_v61 = vld [vmem:[#allocation9 + $0x158] sm:$0xff]   ;;  %v9620_v23 = vld [vmem:[#allocation11 + $0x8] sm:$0xff]  }
 0x154   : > { %8292 = vmatpush3.bf16.msra.mxu0 %v9580_v25  ;;  %v681_v25 = vld [vmem:[#allocation4 + $0x80] sm:$0xff] }
 0x155   : > { %8293 = vmatprep.subr.bf16.mxu0 %v9581_v21  ;;  %v10638_v39 = vsel %vm10421_vm10, %v616_v37, %v681_v25  ;;  %v9612_v37 = vld [vmem:[#allocation9 + $0x208] sm:$0xff]   ;;  %v9613_v25 = vld [vmem:[#allocation9 + $0x210] sm:$0xff]  }
 0x156   : > { %683 = vst [vmem:[#allocation4 + $0x80] sm:$0xff] %v10638_v39 }
 0x157   : > { %8262 = vmatmul.mubr.bf16.gmra.mrb[4].mxu0 %v9695_v11  ;;  %v9595_v11 = vld [vmem:[#allocation9 + $0x180] sm:$0xff]  }
 0x158   : > { %8265 = vmatprep.mubr.bf16.mxu0 %v9696_v51  ;;  %8294 = vmatpush3.bf16.msra.mxu0 %v9581_v21  ;;  %v9593_v21 = vld [vmem:[#allocation9 + $0x170] sm:$0xff]   ;;  %v9596_v51 = vld [vmem:[#allocation9 + $0x188] sm:$0xff]  }
 0x159   : > { %8295 = vmatprep.subr.bf16.mxu0 %v9582_v38 }
 0x15c   : > { %8296 = vmatpush3.bf16.msra.mxu0 %v9582_v38  ;;  %v9594_v38 = vld [vmem:[#allocation9 + $0x178] sm:$0xff]  }
 0x15d   : > { %8297 = vmatprep.subr.bf16.mxu0 %v9583_v33 }
 0x15f   : > { %8266 = vmatmul.mubr.bf16.gmra.mrb[8].mxu0 %v9697_v40  ;;  %v9599_v40 = vld [vmem:[#allocation9 + $0x1a0] sm:$0xff]  }
 0x160   : > { %8269 = vmatprep.mubr.bf16.mxu0 %v9698_v6  ;;  %8298 = vmatpush3.bf16.msra.mxu0 %v9583_v33  ;;  %v9597_v33 = vld [vmem:[#allocation9 + $0x190] sm:$0xff]   ;;  %v10689_v6 = vld [vmem:[#allocation5 + $0x38] sm:$0xff] }
 0x161   : > { %8299 = vmatprep.subr.bf16.mxu0 %v9584_v45 }
 0x164   : > { %8300 = vmatpush3.bf16.msra.mxu0 %v9584_v45  ;;  %v9598_v45 = vld [vmem:[#allocation9 + $0x198] sm:$0xff]  }
 0x165   : > { %8301 = vmatprep.subr.bf16.mxu0 %v9585_v49 }
 0x167   : > { %8270 = vmatmul.mubr.bf16.gmra.mrb[12].mxu0 %v9699_v48  ;;  %v9609_v48 = vld [vmem:[#allocation9 + $0x1f0] sm:$0xff]  }
 0x168   : > { %8273 = vmatprep.mubr.bf16.mxu0 %v9700_v63  ;;  %8302 = vmatpush3.bf16.msra.mxu0 %v9585_v49  ;;  %v10691_v49 = vld [vmem:[#allocation5 + $0x40] sm:$0xff]  ;;  %v10695_v63 = vld [vmem:[#allocation5 + $0x48] sm:$0xff] }
 0x169   : > { %8303 = vmatprep.subr.bf16.mxu0 %v9586_v46 }
 0x16c   : > { %8304 = vmatpush3.bf16.msra.mxu0 %v9586_v46  ;;  %v9608_v46 = vld [vmem:[#allocation9 + $0x1e8] sm:$0xff]  }
 0x16d   : > { %8337 = vmatprep.subr.bf16.mxu0 %v9587_v4 }
 0x16f   : > { %8274 = vmatmul.mubr.bf16.gmra.mrb[16].mxu0 %v9701_v55  ;;  %v9610_v55 = vld [vmem:[#allocation9 + $0x1f8] sm:$0xff]  }
 0x170   : > { %8277 = vmatprep.mubr.bf16.mxu0 %v9702_v44  ;;  %v9611_v44 = vld [vmem:[#allocation9 + $0x200] sm:$0xff]  }
 0x177   : > { %8278 = vmatmul.mubr.bf16.gmra.mrb[20].mxu0 %v9703_v41  ;;  %v10701_v41 = vld [vmem:[#allocation5 + $0x58] sm:$0xff] }
 0x178   : > { %8281 = vmatprep.mubr.bf16.mxu0 %v9704_v7  ;;  %v10703_v7 = vld [vmem:[#allocation5 + $0x60] sm:$0xff] }
 0x17f   : > { %8282 = vmatmul.mubr.bf16.gmra.mrb[24].mxu0 %v9705_v22  ;;  %v2759_v22 = vld [vmem:[#allocation5 + $0x78] sm:$0xff] }
 0x180   : > { %8285 = vmatprep.mubr.bf16.mxu0 %v9706_v32  ;;  %v9619_v32 = vld [vmem:[#allocation11] sm:$0xff]  }
 0x181   : > { %8529 = vmatprep.subr.bf16.mxu1 %v9619_v32 }
 0x182   : > { %8530 = vmatpush3.bf16.msra.mxu1 %v9619_v32 }
 0x183   : > { %8531 = vmatprep.subr.bf16.mxu1 %v9620_v23 }
 0x186   : > { %8532 = vmatpush3.bf16.msra.mxu1 %v9620_v23 }
 0x187   : > { %8286 = vmatmul.mubr.bf16.gmra.mrb[28].mxu0 %v10610_v31 }
 0x188   : > { %8305 = vmatprep.mubr.bf16.mxu0 %v10124_v10  ;;  %v9592_v10 = vld [vmem:[#allocation9 + $0x168] sm:$0xff]  }
 0x18f   : > { %8306 = vmatmul.mubr.bf16.vlgmr.msra.gmra.mrb[0].mxu0 %v10132_v18 }
 0x190   : > { %8338 = vmatpush3.bf16.msra.mxu0 %v9587_v4  ;;  %8309 = vmatprep.mubr.bf16.mxu0 %v10149_v28  ;;  %v10697_v4 = vld [vmem:[#allocation5 + $0x50] sm:$0xff] }
 0x191   : > { %8339 = vmatprep.subr.bf16.mxu0 %v9588_v5 }
 0x194   : > { %8340 = vmatpush3.bf16.msra.mxu0 %v9588_v5  ;;  %v9616_v5 = vld [vmem:[#allocation9 + $0x228] sm:$0xff]  }
 0x195   : > { %8341 = vmatprep.subr.bf16.mxu0 %v9589_v26 }
 0x197   : > { %8310 = vmatmul.mubr.bf16.gmra.mrb[4].mxu0 %v10158_v35 }
 0x198   : > { %8313 = vmatprep.mubr.bf16.mxu0 %v10166_v42  ;;  %8342 = vmatpush3.bf16.msra.mxu0 %v9589_v26  ;;  %v9621_v26 = vld [vmem:[#allocation11 + $0x10] sm:$0xff]  }
 0x199   : > { %8343 = vmatprep.subr.bf16.mxu0 %v9590_v61  ;;  %8533 = vmatprep.subr.bf16.mxu1 %v9621_v26 }
 0x19a   : > { %8534 = vmatpush3.bf16.msra.mxu1 %v9621_v26 }
 0x19c   : > { %8344 = vmatpush3.bf16.msra.mxu0 %v9590_v61  ;;  %v9622_v61 = vld [vmem:[#allocation11 + $0x18] sm:$0xff]  }
 0x19d   : > { %8345 = vmatprep.subr.bf16.mxu0 %v9591_v57  ;;  %8535 = vmatprep.subr.bf16.mxu1 %v9622_v61 }
 0x19e   : > { %8536 = vmatpush3.bf16.msra.mxu1 %v9622_v61  ;;  %v4064_v61 = vld [vmem:[#allocation4 + $0x8] sm:$0xff] }
 0x19f   : > { %8314 = vmatmul.mubr.bf16.gmra.mrb[8].mxu0 %v10189_v59 }
 0x1a0   : > { %8317 = vmatprep.mubr.bf16.mxu0 %v10203_v3  ;;  %8346 = vmatpush3.bf16.msra.mxu0 %v9591_v57  ;;  %v9623_v57 = vld [vmem:[#allocation11 + $0x20] sm:$0xff]  }
 0x1a1   : > { %8347 = vmatprep.subr.bf16.mxu0 %v9592_v10  ;;  %8537 = vmatprep.subr.bf16.mxu1 %v9623_v57 }
 0x1a2   : > { %8538 = vmatpush3.bf16.msra.mxu1 %v9623_v57  ;;  %v4160_v57 = vld [vmem:[#allocation5 + $0x8] sm:$0xff] }
 0x1a4   : > { %8348 = vmatpush3.bf16.msra.mxu0 %v9592_v10  ;;  %v9624_v10 = vld [vmem:[#allocation11 + $0x28] sm:$0xff]  }
 0x1a5   : > { %8349 = vmatprep.subr.bf16.mxu0 %v9593_v21  ;;  %8539 = vmatprep.subr.bf16.mxu1 %v9624_v10 }
 0x1a6   : > { %8540 = vmatpush3.bf16.msra.mxu1 %v9624_v10 }
 0x1a7   : > { %8318 = vmatmul.mubr.bf16.gmra.mrb[12].mxu0 %v10226_v29 }
 0x1a8   : > { %8321 = vmatprep.mubr.bf16.mxu0 %v10238_v36  ;;  %8350 = vmatpush3.bf16.msra.mxu0 %v9593_v21  ;;  %v9625_v21 = vld [vmem:[#allocation11 + $0x30] sm:$0xff]  }
 0x1a9   : > { %8351 = vmatprep.subr.bf16.mxu0 %v9594_v38  ;;  %8541 = vmatprep.subr.bf16.mxu1 %v9625_v21 }
 0x1aa   : > { %8542 = vmatpush3.bf16.msra.mxu1 %v9625_v21 }
 0x1ac   : > { %8352 = vmatpush3.bf16.msra.mxu0 %v9594_v38  ;;  %v10749_v38 = vld [vmem:[%s11388_s3] ss:$0 sm:$0xff] }
 0x1ad   : > { %8385 = vmatprep.subr.bf16.mxu0 %v9595_v11 }
 0x1af   : > { %8322 = vmatmul.mubr.bf16.gmra.mrb[16].mxu0 %v10262_v0 }
 0x1b0   : > { %8325 = vmatprep.mubr.bf16.mxu0 %v10277_v12 }
 0x1b7   : > { %8326 = vmatmul.mubr.bf16.gmra.mrb[20].mxu0 %v10296_v56 }
 0x1b8   : > { %8329 = vmatprep.mubr.bf16.mxu0 %v10311_v1 }
 0x1bf   : > { %8330 = vmatmul.mubr.bf16.gmra.mrb[24].mxu0 %v10335_v58 }
 0x1c0   : > { %8333 = vmatprep.mubr.bf16.mxu0 %v10348_v30 }
 0x1c7   : > { %8334 = vmatmul.mubr.bf16.gmra.mrb[28].mxu0 %v10598_v43 }
 0x1c8   : > { %8353 = vmatprep.mubr.bf16.mxu0 %v10445_v27  ;;  %v9600_v27 = vld [vmem:[#allocation9 + $0x1a8] sm:$0xff]  }
 0x1cf   : > { %8354 = vmatmul.mubr.bf16.vlgmr.msra.gmra.mrb[0].mxu0 %v10455_v52  ;;  %v9601_v52 = vld [vmem:[#allocation9 + $0x1b0] sm:$0xff]  }
 0x1d0   : > { %8386 = vmatpush3.bf16.msra.mxu0 %v9595_v11  ;;  %8357 = vmatprep.mubr.bf16.mxu0 %v10459_v60  ;;  %v9602_v60 = vld [vmem:[#allocation9 + $0x1b8] sm:$0xff]  }
 0x1d1   : > { %8387 = vmatprep.subr.bf16.mxu0 %v9596_v51 }
 0x1d4   : > { %8388 = vmatpush3.bf16.msra.mxu0 %v9596_v51 }
 0x1d5   : > { %8389 = vmatprep.subr.bf16.mxu0 %v9597_v33 }
 0x1d7   : > { %8358 = vmatmul.mubr.bf16.gmra.mrb[4].mxu0 %v10472_v47  ;;  %v9603_v47 = vld [vmem:[#allocation9 + $0x1c0] sm:$0xff]  }
 0x1d8   : > { %8361 = vmatprep.mubr.bf16.mxu0 %v10476_v13  ;;  %8390 = vmatpush3.bf16.msra.mxu0 %v9597_v33  ;;  %v10673_v13 = vld [vmem:[#allocation5 + $0x10] sm:$0xff] }
 0x1d9   : > { %8391 = vmatprep.subr.bf16.mxu0 %v9598_v45 }
 0x1dc   : > { %8392 = vmatpush3.bf16.msra.mxu0 %v9598_v45 }
 0x1dd   : > { %8393 = vmatprep.subr.bf16.mxu0 %v9599_v40 }
 0x1df   : > { %8362 = vmatmul.mubr.bf16.gmra.mrb[8].mxu0 %v10486_v53  ;;  %v10677_v53 = vld [vmem:[#allocation5 + $0x18] sm:$0xff] }
 0x1e0   : > { %8365 = vmatprep.mubr.bf16.mxu0 %v10490_v50  ;;  %8394 = vmatpush3.bf16.msra.mxu0 %v9599_v40  ;;  %v10679_v50 = vld [vmem:[#allocation5 + $0x20] sm:$0xff] }
 0x1e1   : > { %8395 = vmatprep.subr.bf16.mxu0 %v9600_v27 }
 0x1e4   : > { %8396 = vmatpush3.bf16.msra.mxu0 %v9600_v27 }
 0x1e5   : > { %8397 = vmatprep.subr.bf16.mxu0 %v9601_v52 }
 0x1e7   : > { %8366 = vmatmul.mubr.bf16.gmra.mrb[12].mxu0 %v10499_v54  ;;  %v9604_v54 = vld [vmem:[#allocation9 + $0x1c8] sm:$0xff]  }
 0x1e8   : > { %8369 = vmatprep.mubr.bf16.mxu0 %v10506_v15  ;;  %8398 = vmatpush3.bf16.msra.mxu0 %v9601_v52  ;;  %v9605_v15 = vld [vmem:[#allocation9 + $0x1d0] sm:$0xff]  }
 0x1e9   : > { %8399 = vmatprep.subr.bf16.mxu0 %v9602_v60 }
 0x1ec   : > { %8400 = vmatpush3.bf16.msra.mxu0 %v9602_v60 }
 0x1ed   : > { %8433 = vmatprep.subr.bf16.mxu0 %v9603_v47 }
 0x1ef   : > { %8370 = vmatmul.mubr.bf16.gmra.mrb[16].mxu0 %v10523_v20  ;;  %v10683_v20 = vld [vmem:[#allocation5 + $0x28] sm:$0xff] }
 0x1f0   : > { %8373 = vmatprep.mubr.bf16.mxu0 %v10530_v19  ;;  %v10685_v19 = vld [vmem:[#allocation5 + $0x30] sm:$0xff] }
 0x1f7   : > { %8374 = vmatmul.mubr.bf16.gmra.mrb[20].mxu0 %v10547_v17  ;;  %v9606_v17 = vld [vmem:[#allocation9 + $0x1d8] sm:$0xff]  }
 0x1f8   : > { %8377 = vmatprep.mubr.bf16.mxu0 %v10554_v62  ;;  %v9607_v62 = vld [vmem:[#allocation9 + $0x1e0] sm:$0xff]  }
 0x1ff   : > { %8378 = vmatmul.mubr.bf16.gmra.mrb[24].mxu0 %v10569_v2 }
 0x200   : > { %8381 = vmatprep.mubr.bf16.mxu0 %v10574_v34 }
 0x207   : > { %8382 = vmatmul.mubr.bf16.gmra.mrb[28].mxu0 %v10638_v39 }
 0x208   : > { %8401 = vmatprep.mubr.bf16.mxu0 %v10673_v13 }
 0x20f   : > { %8402 = vmatmul.mubr.bf16.vlgmr.msra.gmra.mrb[0].mxu0 %v10677_v53 }
 0x210   : > { %8434 = vmatpush3.bf16.msra.mxu0 %v9603_v47  ;;  %8405 = vmatprep.mubr.bf16.mxu0 %v10679_v50 }
 0x211   : > { %8435 = vmatprep.subr.bf16.mxu0 %v9604_v54 }
 0x214   : > { %8436 = vmatpush3.bf16.msra.mxu0 %v9604_v54 }
 0x215   : > { %8437 = vmatprep.subr.bf16.mxu0 %v9605_v15 }
 0x217   : > { %8406 = vmatmul.mubr.bf16.gmra.mrb[4].mxu0 %v10683_v20 }
 0x218   : > { %8409 = vmatprep.mubr.bf16.mxu0 %v10685_v19  ;;  %8438 = vmatpush3.bf16.msra.mxu0 %v9605_v15 }
 0x219   : > { %8439 = vmatprep.subr.bf16.mxu0 %v9606_v17 }
 0x21c   : > { %8440 = vmatpush3.bf16.msra.mxu0 %v9606_v17 }
 0x21d   : > { %8441 = vmatprep.subr.bf16.mxu0 %v9607_v62 }
 0x21f   : > { %8410 = vmatmul.mubr.bf16.gmra.mrb[8].mxu0 %v10689_v6 }
 0x220   : > { %8413 = vmatprep.mubr.bf16.mxu0 %v10691_v49  ;;  %8442 = vmatpush3.bf16.msra.mxu0 %v9607_v62 }
 0x221   : > { %8443 = vmatprep.subr.bf16.mxu0 %v9608_v46 }
 0x224   : > { %8444 = vmatpush3.bf16.msra.mxu0 %v9608_v46 }
 0x225   : > { %8445 = vmatprep.subr.bf16.mxu0 %v9609_v48 }
 0x227   : > { %8414 = vmatmul.mubr.bf16.gmra.mrb[12].mxu0 %v10695_v63 }
 0x228   : > { %8417 = vmatprep.mubr.bf16.mxu0 %v10697_v4  ;;  %8446 = vmatpush3.bf16.msra.mxu0 %v9609_v48 }
 0x229   : > { %8447 = vmatprep.subr.bf16.mxu0 %v9610_v55 }
 0x22c   : > { %8448 = vmatpush3.bf16.msra.mxu0 %v9610_v55 }
 0x22d   : > { %8481 = vmatprep.subr.bf16.mxu0 %v9611_v44 }
 0x22f   : > { %8418 = vmatmul.mubr.bf16.gmra.mrb[16].mxu0 %v10701_v41 }
 0x230   : > { %8421 = vmatprep.mubr.bf16.mxu0 %v10703_v7 }
 0x237   : > { %8422 = vmatmul.mubr.bf16.gmra.mrb[20].mxu0 %v10707_v14 }
 0x238   : > { %8425 = vmatprep.mubr.bf16.mxu0 %v10709_v16 }
 0x23f   : > { %8426 = vmatmul.mubr.bf16.gmra.mrb[24].mxu0 %v2759_v22 }
 0x240   : > { %8429 = vmatprep.mubr.bf16.mxu0 %v10610_v31  ;;  %v9614_v31 = vld [vmem:[#allocation9 + $0x218] sm:$0xff]  }
 0x247   : > { %8430 = vmatmul.mubr.bf16.gmra.mrb[28].mxu0 %v10578_v9 }
 0x248   : > { %8449 = vmatprep.mubr.bf16.mxu0 %v10132_v18  ;;  %v9615_v18 = vld [vmem:[#allocation9 + $0x220] sm:$0xff]  }
 0x24f   : > { %8450 = vmatmul.mubr.bf16.vlgmr.msra.gmra.mrb[0].mxu0 %v10149_v28  ;;  %v9617_v28 = vld [vmem:[#allocation9 + $0x230] sm:$0xff]  }
 0x250   : > { %8482 = vmatpush3.bf16.msra.mxu0 %v9611_v44  ;;  %8453 = vmatprep.mubr.bf16.mxu0 %v10158_v35  ;;  %v9618_v35 = vld [vmem:[#allocation9 + $0x238] sm:$0xff]  }
 0x251   : > { %8483 = vmatprep.subr.bf16.mxu0 %v9612_v37 }
 0x254   : > { %8484 = vmatpush3.bf16.msra.mxu0 %v9612_v37 }
 0x255   : > { %8485 = vmatprep.subr.bf16.mxu0 %v9613_v25 }
 0x257   : > { %8454 = vmatmul.mubr.bf16.gmra.mrb[4].mxu0 %v10166_v42  ;;  %v10730_v42 = vld [vmem:[#allocation4 + $0x10] sm:$0xff] }
 0x258   : > { %8457 = vmatprep.mubr.bf16.mxu0 %v10189_v59  ;;  %8486 = vmatpush3.bf16.msra.mxu0 %v9613_v25  ;;  %v9707_v59 = vld [vmem:[#allocation4 + $0x18] sm:$0xff] }
 0x259   : > { %8487 = vmatprep.subr.bf16.mxu0 %v9614_v31 }
 0x25c   : > { %8488 = vmatpush3.bf16.msra.mxu0 %v9614_v31 }
 0x25d   : > { %8489 = vmatprep.subr.bf16.mxu0 %v9615_v18 }
 0x25f   : > { %8458 = vmatmul.mubr.bf16.gmra.mrb[8].mxu0 %v10203_v3  ;;  %v9708_v3 = vld [vmem:[#allocation4 + $0x20] sm:$0xff] }
 0x260   : > { %8461 = vmatprep.mubr.bf16.mxu0 %v10226_v29  ;;  %8490 = vmatpush3.bf16.msra.mxu0 %v9615_v18  ;;  %v9709_v29 = vld [vmem:[#allocation4 + $0x28] sm:$0xff] }
 0x261   : > { %8491 = vmatprep.subr.bf16.mxu0 %v9616_v5 }
 0x264   : > { %8492 = vmatpush3.bf16.msra.mxu0 %v9616_v5 }
 0x265   : > { %8493 = vmatprep.subr.bf16.mxu0 %v9617_v28 }
 0x267   : > { %8462 = vmatmul.mubr.bf16.gmra.mrb[12].mxu0 %v10238_v36  ;;  %v9710_v36 = vld [vmem:[#allocation4 + $0x30] sm:$0xff] }
 0x268   : > { %8465 = vmatprep.mubr.bf16.mxu0 %v10262_v0  ;;  %8494 = vmatpush3.bf16.msra.mxu0 %v9617_v28  ;;  %v9711_v0 = vld [vmem:[#allocation4 + $0x38] sm:$0xff] }
 0x269   : > { %8495 = vmatprep.subr.bf16.mxu0 %v9618_v35 }
 0x26c   : > { %8496 = vmatpush3.bf16.msra.mxu0 %v9618_v35 }
 0x26f   : > { %8466 = vmatmul.mubr.bf16.gmra.mrb[16].mxu0 %v10277_v12  ;;  %v9712_v12 = vld [vmem:[#allocation4 + $0x40] sm:$0xff] }
 0x270   : > { %8469 = vmatprep.mubr.bf16.mxu0 %v10296_v56  ;;  %v9713_v56 = vld [vmem:[#allocation4 + $0x48] sm:$0xff] }
 0x277   : > { %8470 = vmatmul.mubr.bf16.gmra.mrb[20].mxu0 %v10311_v1  ;;  %v9714_v1 = vld [vmem:[#allocation4 + $0x50] sm:$0xff] }
 0x278   : > { %8473 = vmatprep.mubr.bf16.mxu0 %v10335_v58  ;;  %v9715_v58 = vld [vmem:[#allocation4 + $0x58] sm:$0xff] }
 0x27f   : > { %8474 = vmatmul.mubr.bf16.gmra.mrb[24].mxu0 %v10348_v30  ;;  %v9716_v30 = vld [vmem:[#allocation4 + $0x60] sm:$0xff] }
 0x280   : > { %8477 = vmatprep.mubr.bf16.mxu0 %v10598_v43  ;;  %v9717_v43 = vld [vmem:[#allocation4 + $0x68] sm:$0xff] }
 0x287   : > { %8478 = vmatmul.mubr.bf16.gmra.mrb[28].mxu0 %v10578_v9 }
 0x288   : > { %8497 = vmatprep.mubr.bf16.mxu0 %v10730_v42 }
 0x28f   : > { %8498 = vmatmul.mubr.bf16.vlgmr.msra.gmra.mrb[0].mxu0 %v9707_v59 }
 0x290   : > { %8501 = vmatprep.mubr.bf16.mxu0 %v9708_v3 }
 0x297   : > { %8502 = vmatmul.mubr.bf16.gmra.mrb[4].mxu0 %v9709_v29 }
 0x298   : > { %8505 = vmatprep.mubr.bf16.mxu0 %v9710_v36 }
 0x29f   : > { %8506 = vmatmul.mubr.bf16.gmra.mrb[8].mxu0 %v9711_v0 }
 0x2a0   : > { %8509 = vmatprep.mubr.bf16.mxu0 %v9712_v12 }
 0x2a7   : > { %8510 = vmatmul.mubr.bf16.gmra.mrb[12].mxu0 %v9713_v56 }
 0x2a8   : > { %8513 = vmatprep.mubr.bf16.mxu0 %v9714_v1 }
 0x2af   : > { %8514 = vmatmul.mubr.bf16.gmra.mrb[16].mxu0 %v9715_v58 }
 0x2b0   : > { %8517 = vmatprep.mubr.bf16.mxu0 %v9716_v30 }
 0x2b7   : > { %8518 = vmatmul.mubr.bf16.gmra.mrb[20].mxu0 %v9717_v43 }
 0x2b8   : > { %8521 = vmatprep.mubr.bf16.mxu0 %v10569_v2  ;;  %v9626_v2 = vld [vmem:[#allocation11 + $0x38] sm:$0xff]  }
 0x2b9   : > { %8543 = vmatprep.subr.bf16.mxu1 %v9626_v2 }
 0x2ba   : > { %8544 = vmatpush3.bf16.msra.mxu1 %v9626_v2 }
 0x2bf   : > { %8522 = vmatmul.mubr.bf16.gmra.mrb[24].mxu0 %v10574_v34  ;;  %v10738_v34 = vld [vmem:[#allocation11 + $0x40] sm:$0xff]  }
 0x2c0   : > { %8525 = vmatprep.mubr.bf16.mxu0 %v10638_v39  ;;  %8577 = vmatprep.subr.bf16.mxu1 %v10738_v34 }
 0x2c7   : > { %8526 = vmatmul.mubr.bf16.gmra.mrb[28].mxu0 %v10578_v9  ;;  %v10744_v9 = vld [vmem:[%s11387_s2] ss:$0 sm:$0xff] }
 0x362   : > { %v8499_v39 = vpop.f32.mrb[0].mxu0 }
 0x363   : > { %v3803_v11 = vmul.f32 %v8499_v39, %v10744_v9  ;;  %v3539_v51 = vpop.f32.mrb[1].mxu0 }
 0x364   : > { %v3801_v33 = vmul.f32 %v10744_v9, %v3539_v51  ;;  %v8500_v45 = vpop.f32.mrb[2].mxu0 }
 0x365   : > { %v3842_v40 = vadd.f32 %v10749_v38, %v3803_v11  ;;  %v3804_v27 = vmul.f32 %v8500_v45, %v10744_v9  ;;  %v3542_v52 = vpop.f32.mrb[3].mxu0 }
 0x366   : > { %v3840_v60 = vadd.f32 %v10749_v38, %v3801_v33  ;;  %v3802_v47 = vmul.f32 %v10744_v9, %v3542_v52 }
 0x367   : > { %v3843_v54 = vadd.f32 %v10749_v38, %v3804_v27  ;;  %v3874_v17 = vmax.f32 %v3842_v40, 0.0 }
 0x368   : > { %v3841_v15 = vadd.f32 %v10749_v38, %v3802_v47  ;;  %v3872_v46 = vmax.f32 %v3840_v60, 0.0  ;;  %v9628_v47 = vld [vmem:[#allocation11 + $0x48] sm:$0xff]  }
 0x369   : > { %v3875_v62 = vmax.f32 %v3843_v54, 0.0 }
 0x36a   : > { %v3873_v48 = vmax.f32 %v3841_v15, 0.0  ;;  %v8503_v55 = vpop.f32.mrb[4].mxu0 }
 0x36b   : > { %v10759_v44 = vpack.c.bf16 %v3875_v62, %v3874_v17  ;;  %v3807_v22 = vmul.f32 %v8503_v55, %v10744_v9  ;;  %v3555_v32 = vpop.f32.mrb[5].mxu0 }
 0x36c   : > { %v10762_v23 = vpack.c.bf16 %v3873_v48, %v3872_v46  ;;  %v3805_v37 = vmul.f32 %v10744_v9, %v3555_v32  ;;  %v8504_v25 = vpop.f32.mrb[6].mxu0 }
 0x36d   : > { %v3944_v31 = vshrl.u32 %v10759_v44, 16  ;;  %v3946_v18 = vshll.u32 %v10759_v44, 16  ;;  %v3846_v5 = vadd.f32 %v10749_v38, %v3807_v22  ;;  %v3808_v28 = vmul.f32 %v8504_v25, %v10744_v9  ;;  %v3558_v35 = vpop.f32.mrb[7].mxu0 }
 0x36e   : > { %v3937_v59 = vshrl.u32 %v10762_v23, 16  ;;  %v3939_v3 = vshll.u32 %v10762_v23, 16  ;;  %v3844_v29 = vadd.f32 %v10749_v38, %v3805_v37  ;;  %v3806_v36 = vmul.f32 %v10744_v9, %v3558_v35  ;;  %v9629_v35 = vld [vmem:[#allocation11 + $0x50] sm:$0xff]  }
 0x36f   : > { %v3948_v0 = vrot.slane %v3946_v18, 1  ;;  %v4114_v12 = vrot.slane %v3944_v31, 7  ;;  %v3847_v56 = vadd.f32 %v10749_v38, %v3808_v28  ;;  %v3878_v10 = vmax.f32 %v3846_v5, 0.0 }
 0x370   : > { %v3941_v1 = vrot.slane %v3939_v3, 1  ;;  %v4112_v58 = vrot.slane %v3937_v59, 7  ;;  %v3845_v30 = vadd.f32 %v10749_v38, %v3806_v36  ;;  %v3876_v11 = vmax.f32 %v3844_v29, 0.0 }
 0x371   : > { %v3949_v43 = vor.u32 %v3948_v0, %v3944_v31  ;;  %v4115_v26 = vor.u32 %v4114_v12, %v3946_v18  ;;  %v3879_v21 = vmax.f32 %v3847_v56, 0.0  ;;  %v4070_v56 = vld [vmem:[#allocation4 + $0x18] sm:$0xff] }
 0x372   : > { %v3942_v2 = vor.u32 %v3941_v1, %v3937_v59  ;;  %v4113_v39 = vor.u32 %v4112_v58, %v3939_v3  ;;  %v3877_v51 = vmax.f32 %v3845_v30, 0.0  ;;  %v8507_v33 = vpop.f32.mrb[8].mxu0  ;;  %v4073_v59 = vld [vmem:[#allocation4 + $0x20] sm:$0xff] }
 0x373   : > { %v10778_v45 = vsel %vm10421_vm10, %v3949_v43, %v10730_v42  ;;  %v4164_v40 = vsel %vm10142_vm5, %v4115_v26, %v10673_v13  ;;  %v10783_v27 = vpack.c.bf16 %v3879_v21, %v3878_v10  ;;  %v3811_v52 = vmul.f32 %v8507_v33, %v10744_v9  ;;  %v3571_v60 = vpop.f32.mrb[9].mxu0 }
 0x374   : > { %4069 = vst [vmem:[#allocation4 + $0x10] sm:$0xff] %v10778_v45  ;;  %4165 = vst [vmem:[#allocation5 + $0x10] sm:$0xff] %v4164_v40  ;;  %v10789_v54 = vsel %vm10421_vm10, %v3942_v2, %v4064_v61  ;;  %v4161_v42 = vsel %vm10142_vm5, %v4113_v39, %v4160_v57  ;;  %v10793_v15 = vpack.c.bf16 %v3877_v51, %v3876_v11  ;;  %v8508_v17 = vpop.f32.mrb[10].mxu0  ;;  %v9630_v11 = vld [vmem:[#allocation11 + $0x58] sm:$0xff]  }
 0x375   : > { %v3809_v13 = vmul.f32 %v10744_v9, %v3571_v60  ;;  %4066 = vst [vmem:[#allocation4 + $0x8] sm:$0xff] %v10789_v54  ;;  %4162 = vst [vmem:[#allocation5 + $0x8] sm:$0xff] %v4161_v42  ;;  %v3958_v62 = vshrl.u32 %v10783_v27, 16  ;;  %v3960_v46 = vshll.u32 %v10783_v27, 16  ;;  %v3850_v48 = vadd.f32 %v10749_v38, %v3811_v52  ;;  %v3574_v22 = vpop.f32.mrb[11].mxu0  ;;  %8546 = vmatmul.mubr.bf16.vlgmr.msra.gmra.mrb[0].mxu1 %v4161_v42 }
 0x376   : > { %v3812_v55 = vmul.f32 %v8508_v17, %v10744_v9  ;;  %v3951_v32 = vshrl.u32 %v10793_v15, 16  ;;  %v3953_v37 = vshll.u32 %v10793_v15, 16  ;;  %v3810_v31 = vmul.f32 %v10744_v9, %v3574_v22  ;;  %8549 = vmatprep.mubr.bf16.mxu1 %v4164_v40  ;;  %8578 = vmatpush3.bf16.msra.mxu1 %v10738_v34 }
 0x377   : > { %v3848_v25 = vadd.f32 %v10749_v38, %v3809_v13  ;;  %v3962_v18 = vrot.slane %v3960_v46, 1  ;;  %v4118_v5 = vrot.slane %v3958_v62, 7  ;;  %8579 = vmatprep.subr.bf16.mxu1 %v9628_v47  ;;  %v3882_v1 = vmax.f32 %v3850_v48, 0.0 }
 0x378   : > { %v3851_v28 = vadd.f32 %v10749_v38, %v3812_v55  ;;  %v3955_v3 = vrot.slane %v3953_v37, 1  ;;  %v4116_v29 = vrot.slane %v3951_v32, 7  ;;  %v3849_v36 = vadd.f32 %v10749_v38, %v3810_v31 }
 0x379   : > { %v3963_v0 = vor.u32 %v3962_v18, %v3958_v62  ;;  %v4119_v12 = vor.u32 %v4118_v5, %v3960_v46  ;;  %v3880_v26 = vmax.f32 %v3848_v25, 0.0  ;;  %v4079_v25 = vld [vmem:[#allocation4 + $0x30] sm:$0xff] }
 0x37a   : > { %v3883_v58 = vmax.f32 %v3851_v28, 0.0  ;;  %v3956_v30 = vor.u32 %v3955_v3, %v3951_v32  ;;  %v4117_v43 = vor.u32 %v4116_v29, %v3953_v37  ;;  %v3881_v34 = vmax.f32 %v3849_v36, 0.0  ;;  %v8511_v61 = vpop.f32.mrb[12].mxu0  ;;  %8580 = vmatpush3.bf16.msra.mxu1 %v9628_v47  ;;  %v9631_v37 = vld [vmem:[#allocation11 + $0x60] sm:$0xff]   ;;  %v4076_v3 = vld [vmem:[#allocation4 + $0x28] sm:$0xff] }
 0x37b   : > { %v10810_v57 = vsel %vm10421_vm10, %v3963_v0, %v4073_v59  ;;  %v10815_v10 = vsel %vm10142_vm5, %v4119_v12, %v10679_v50  ;;  %v3815_v2 = vmul.f32 %v8511_v61, %v10744_v9  ;;  %v3587_v39 = vpop.f32.mrb[13].mxu0  ;;  %8581 = vmatprep.subr.bf16.mxu1 %v9629_v35  ;;  %v9632_v61 = vld [vmem:[#allocation11 + $0x68] sm:$0xff]  }
 0x37c   : > { %v10817_v21 = vpack.c.bf16 %v3883_v58, %v3882_v1  ;;  %4075 = vst [vmem:[#allocation4 + $0x20] sm:$0xff] %v10810_v57  ;;  %4171 = vst [vmem:[#allocation5 + $0x20] sm:$0xff] %v10815_v10  ;;  %v10824_v51 = vsel %vm10421_vm10, %v3956_v30, %v4070_v56  ;;  %v10829_v50 = vsel %vm10142_vm5, %v4117_v43, %v10677_v53  ;;  %v8512_v52 = vpop.f32.mrb[14].mxu0 }
 0x37d   : > { %v10831_v33 = vpack.c.bf16 %v3881_v34, %v3880_v26  ;;  %v3813_v40 = vmul.f32 %v10744_v9, %v3587_v39  ;;  %4072 = vst [vmem:[#allocation4 + $0x18] sm:$0xff] %v10824_v51  ;;  %4168 = vst [vmem:[#allocation5 + $0x18] sm:$0xff] %v10829_v50  ;;  %v3854_v42 = vadd.f32 %v10749_v38, %v3815_v2  ;;  %v3590_v17 = vpop.f32.mrb[15].mxu0  ;;  %8550 = vmatmul.mubr.bf16.gmra.mrb[4].mxu1 %v10829_v50 }
 0x37e   : > { %v3972_v60 = vshrl.u32 %v10817_v21, 16  ;;  %v3974_v47 = vshll.u32 %v10817_v21, 16  ;;  %v3816_v13 = vmul.f32 %v8512_v52, %v10744_v9  ;;  %v3814_v48 = vmul.f32 %v10744_v9, %v3590_v17  ;;  %8553 = vmatprep.mubr.bf16.mxu1 %v10815_v10  ;;  %8582 = vmatpush3.bf16.msra.mxu1 %v9629_v35 }
 0x37f   : > { %v3965_v53 = vshrl.u32 %v10831_v33, 16  ;;  %v3967_v62 = vshll.u32 %v10831_v33, 16  ;;  %v3852_v46 = vadd.f32 %v10749_v38, %v3813_v40  ;;  %8583 = vmatprep.subr.bf16.mxu1 %v9630_v11  ;;  %v3886_v29 = vmax.f32 %v3854_v42, 0.0 }
 0x380   : > { %v3976_v55 = vrot.slane %v3974_v47, 1  ;;  %v4122_v22 = vrot.slane %v3972_v60, 7  ;;  %v3855_v32 = vadd.f32 %v10749_v38, %v3816_v13  ;;  %v3853_v5 = vadd.f32 %v10749_v38, %v3814_v48 }
 0x381   : > { %v3969_v31 = vrot.slane %v3967_v62, 1  ;;  %v4120_v18 = vrot.slane %v3965_v53, 7  ;;  %v3884_v56 = vmax.f32 %v3852_v46, 0.0 }
 0x382   : > { %v3977_v28 = vor.u32 %v3976_v55, %v3972_v60  ;;  %v4123_v59 = vor.u32 %v4122_v22, %v3974_v47  ;;  %v3887_v36 = vmax.f32 %v3855_v32, 0.0  ;;  %v3885_v35 = vmax.f32 %v3853_v5, 0.0  ;;  %v8515_v1 = vpop.f32.mrb[16].mxu0  ;;  %8584 = vmatpush3.bf16.msra.mxu1 %v9630_v11  ;;  %v9633_v22 = vld [vmem:[#allocation11 + $0x70] sm:$0xff]   ;;  %v4085_v32 = vld [vmem:[#allocation4 + $0x40] sm:$0xff] }
 0x383   : > { %v3970_v0 = vor.u32 %v3969_v31, %v3965_v53  ;;  %v4121_v12 = vor.u32 %v4120_v18, %v3967_v62  ;;  %v3819_v26 = vmul.f32 %v8515_v1, %v10744_v9  ;;  %v3603_v34 = vpop.f32.mrb[17].mxu0  ;;  %8585 = vmatprep.subr.bf16.mxu1 %v9631_v37 }
 0x384   : > { %v10850_v58 = vsel %vm10421_vm10, %v3977_v28, %v4079_v25  ;;  %v10855_v30 = vsel %vm10142_vm5, %v4123_v59, %v10685_v19  ;;  %v10857_v43 = vpack.c.bf16 %v3887_v36, %v3886_v29  ;;  %v10871_v39 = vpack.c.bf16 %v3885_v35, %v3884_v56  ;;  %v8516_v40 = vpop.f32.mrb[18].mxu0  ;;  %v4082_v59 = vld [vmem:[#allocation4 + $0x38] sm:$0xff] }
 0x385   : > { %4081 = vst [vmem:[#allocation4 + $0x30] sm:$0xff] %v10850_v58  ;;  %4177 = vst [vmem:[#allocation5 + $0x30] sm:$0xff] %v10855_v30  ;;  %v10864_v2 = vsel %vm10421_vm10, %v3970_v0, %v4076_v3  ;;  %v10869_v19 = vsel %vm10142_vm5, %v4121_v12, %v10683_v20  ;;  %v3817_v11 = vmul.f32 %v10744_v9, %v3603_v34  ;;  %v3606_v13 = vpop.f32.mrb[19].mxu0 }
 0x386   : > { %4078 = vst [vmem:[#allocation4 + $0x28] sm:$0xff] %v10864_v2  ;;  %4174 = vst [vmem:[#allocation5 + $0x28] sm:$0xff] %v10869_v19  ;;  %v3986_v52 = vshrl.u32 %v10857_v43, 16  ;;  %v3988_v60 = vshll.u32 %v10857_v43, 16  ;;  %v3858_v47 = vadd.f32 %v10749_v38, %v3819_v26  ;;  %v3820_v42 = vmul.f32 %v8516_v40, %v10744_v9  ;;  %8554 = vmatmul.mubr.bf16.gmra.mrb[8].mxu1 %v10869_v19  ;;  %v9634_v40 = vld [vmem:[#allocation11 + $0x78] sm:$0xff]  }
 0x387   : > { %v3979_v20 = vshrl.u32 %v10871_v39, 16  ;;  %v3981_v17 = vshll.u32 %v10871_v39, 16  ;;  %v3856_v53 = vadd.f32 %v10749_v38, %v3817_v11  ;;  %v3818_v62 = vmul.f32 %v10744_v9, %v3606_v13  ;;  %8557 = vmatprep.mubr.bf16.mxu1 %v10855_v30  ;;  %8586 = vmatpush3.bf16.msra.mxu1 %v9631_v37 }
 0x388   : > { %v3990_v46 = vrot.slane %v3988_v60, 1  ;;  %v4126_v48 = vrot.slane %v3986_v52, 7  ;;  %v3859_v55 = vadd.f32 %v10749_v38, %v3820_v42  ;;  %8587 = vmatprep.subr.bf16.mxu1 %v9632_v61  ;;  %v3890_v3 = vmax.f32 %v3858_v47, 0.0 }
 0x389   : > { %v3983_v25 = vrot.slane %v3981_v17, 1  ;;  %v4124_v31 = vrot.slane %v3979_v20, 7  ;;  %v3857_v18 = vadd.f32 %v10749_v38, %v3818_v62  ;;  %v3888_v12 = vmax.f32 %v3856_v53, 0.0 }
 0x38a   : > { %v3991_v5 = vor.u32 %v3990_v46, %v3986_v52  ;;  %v4127_v28 = vor.u32 %v4126_v48, %v3988_v60  ;;  %v3891_v29 = vmax.f32 %v3859_v55, 0.0  ;;  %v8519_v56 = vpop.f32.mrb[20].mxu0 }
 0x38b   : > { %v3984_v36 = vor.u32 %v3983_v25, %v3979_v20  ;;  %v4125_v0 = vor.u32 %v4124_v31, %v3981_v17  ;;  %v3889_v37 = vmax.f32 %v3857_v18, 0.0  ;;  %8588 = vmatpush3.bf16.msra.mxu1 %v9632_v61  ;;  %v3823_v34 = vmul.f32 %v8519_v56, %v10744_v9  ;;  %v3619_v11 = vpop.f32.mrb[21].mxu0  ;;  %v10927_v31 = vld [vmem:[#allocation11 + $0x80] sm:$0xff]   ;;  %v4091_v18 = vld [vmem:[#allocation4 + $0x50] sm:$0xff] }
 0x38c   : > { %v10890_v35 = vsel %vm10421_vm10, %v3991_v5, %v4085_v32  ;;  %v10895_v1 = vsel %vm10142_vm5, %v4127_v28, %v10691_v49  ;;  %v10897_v26 = vpack.c.bf16 %v3891_v29, %v3890_v3  ;;  %8589 = vmatprep.subr.bf16.mxu1 %v9633_v22  ;;  %v3821_v60 = vmul.f32 %v10744_v9, %v3619_v11  ;;  %v8520_v47 = vpop.f32.mrb[22].mxu0 }
 0x38d   : > { %4087 = vst [vmem:[#allocation4 + $0x40] sm:$0xff] %v10890_v35  ;;  %4183 = vst [vmem:[#allocation5 + $0x40] sm:$0xff] %v10895_v1  ;;  %v10904_v61 = vsel %vm10421_vm10, %v3984_v36, %v4082_v59  ;;  %v10909_v49 = vsel %vm10142_vm5, %v4125_v0, %v10689_v6  ;;  %v10911_v52 = vpack.c.bf16 %v3889_v37, %v3888_v12  ;;  %v3622_v53 = vpop.f32.mrb[23].mxu0  ;;  %v4088_v36 = vld [vmem:[#allocation4 + $0x48] sm:$0xff] }
 0x38e   : > { %4084 = vst [vmem:[#allocation4 + $0x38] sm:$0xff] %v10904_v61  ;;  %4180 = vst [vmem:[#allocation5 + $0x38] sm:$0xff] %v10909_v49  ;;  %v4000_v42 = vshrl.u32 %v10897_v26, 16  ;;  %v4002_v13 = vshll.u32 %v10897_v26, 16  ;;  %v3862_v20 = vadd.f32 %v10749_v38, %v3823_v34  ;;  %v3824_v17 = vmul.f32 %v8520_v47, %v10744_v9  ;;  %8558 = vmatmul.mubr.bf16.gmra.mrb[12].mxu1 %v10909_v49 }
 0x38f   : > { %v3993_v6 = vshrl.u32 %v10911_v52, 16  ;;  %v3995_v62 = vshll.u32 %v10911_v52, 16  ;;  %v3860_v46 = vadd.f32 %v10749_v38, %v3821_v60  ;;  %v3822_v48 = vmul.f32 %v10744_v9, %v3622_v53  ;;  %8561 = vmatprep.mubr.bf16.mxu1 %v10895_v1  ;;  %8590 = vmatpush3.bf16.msra.mxu1 %v9633_v22 }
 0x390   : > { %v4004_v55 = vrot.slane %v4002_v13, 1  ;;  %v4130_v32 = vrot.slane %v4000_v42, 7  ;;  %v3863_v25 = vadd.f32 %v10749_v38, %v3824_v17  ;;  %8591 = vmatprep.subr.bf16.mxu1 %v9634_v40  ;;  %v3894_v0 = vmax.f32 %v3862_v20, 0.0 }
 0x391   : > { %v3997_v5 = vrot.slane %v3995_v62, 1  ;;  %v4128_v28 = vrot.slane %v3993_v6, 7  ;;  %v3861_v59 = vadd.f32 %v10749_v38, %v3822_v48  ;;  %v3892_v22 = vmax.f32 %v3860_v46, 0.0 }
 0x392   : > { %v4005_v3 = vor.u32 %v4004_v55, %v4000_v42  ;;  %v4131_v29 = vor.u32 %v4130_v32, %v4002_v13  ;;  %v3895_v12 = vmax.f32 %v3863_v25, 0.0  ;;  %v8523_v11 = vpop.f32.mrb[24].mxu0 }
 0x393   : > { %v3998_v37 = vor.u32 %v3997_v5, %v3993_v6  ;;  %v4129_v56 = vor.u32 %v4128_v28, %v3995_v62  ;;  %v3893_v34 = vmax.f32 %v3861_v59, 0.0  ;;  %8592 = vmatpush3.bf16.msra.mxu1 %v9634_v40  ;;  %v3827_v13 = vmul.f32 %v8523_v11, %v10744_v9  ;;  %v3635_v20 = vpop.f32.mrb[25].mxu0 }
 0x394   : > { %v10932_v60 = vsel %vm10421_vm10, %v4005_v3, %v4091_v18  ;;  %v10937_v47 = vsel %vm10142_vm5, %v4131_v29, %v10697_v4  ;;  %v10939_v42 = vpack.c.bf16 %v3895_v12, %v3894_v0  ;;  %8625 = vmatprep.subr.bf16.mxu1 %v10927_v31  ;;  %v3825_v53 = vmul.f32 %v10744_v9, %v3635_v20  ;;  %v8524_v6 = vpop.f32.mrb[26].mxu0  ;;  %v4097_v29 = vld [vmem:[#allocation4 + $0x60] sm:$0xff] }
 0x395   : > { %11433 = vst [vmem:[#allocation16_spill] sm:$0xff] %v10937_v47  ;;  %4093 = vst [vmem:[#allocation4 + $0x50] sm:$0xff] %v10932_v60  ;;  %v10947_v40 = vsel %vm10421_vm10, %v3998_v37, %v4088_v36  ;;  %v10952_v4 = vsel %vm10142_vm5, %v4129_v56, %v10695_v63  ;;  %v10954_v17 = vpack.c.bf16 %v3893_v34, %v3892_v22  ;;  %v3638_v32 = vpop.f32.mrb[27].mxu0  ;;  %v4094_v22 = vld [vmem:[#allocation4 + $0x58] sm:$0xff] }
 0x396   : > { %4189 = vst [vmem:[#allocation5 + $0x50] sm:$0xff] %v10937_v47  ;;  %11434 = vst [vmem:[#allocation17_spill] sm:$0xff] %v10952_v4  ;;  %v4014_v62 = vshrl.u32 %v10939_v42, 16  ;;  %v4016_v46 = vshll.u32 %v10939_v42, 16  ;;  %v3866_v48 = vadd.f32 %v10749_v38, %v3827_v13  ;;  %v3828_v55 = vmul.f32 %v8524_v6, %v10744_v9  ;;  %8562 = vmatmul.mubr.bf16.gmra.mrb[16].mxu1 %v10952_v4 }
 0x397   : > { %4090 = vst [vmem:[#allocation4 + $0x48] sm:$0xff] %v10947_v40  ;;  %4186 = vst [vmem:[#allocation5 + $0x48] sm:$0xff] %v10952_v4  ;;  %v4007_v63 = vshrl.u32 %v10954_v17, 16  ;;  %v4009_v25 = vshll.u32 %v10954_v17, 16  ;;  %v3864_v18 = vadd.f32 %v10749_v38, %v3825_v53  ;;  %v3826_v5 = vmul.f32 %v10744_v9, %v3638_v32  ;;  %8565 = vmatprep.mubr.bf16.mxu1 %v10937_v47 }
 0x398   : > { %v4018_v28 = vrot.slane %v4016_v46, 1  ;;  %v4134_v59 = vrot.slane %v4014_v62, 7  ;;  %v3867_v3 = vadd.f32 %v10749_v38, %v3828_v55  ;;  %v3898_v34 = vmax.f32 %v3866_v48, 0.0 }
 0x399   : > { %v4011_v36 = vrot.slane %v4009_v25, 1  ;;  %v4132_v0 = vrot.slane %v4007_v63, 7  ;;  %v3865_v12 = vadd.f32 %v10749_v38, %v3826_v5  ;;  %v3896_v53 = vmax.f32 %v3864_v18, 0.0 }
 0x39a   : > { %v4019_v37 = vor.u32 %v4018_v28, %v4014_v62  ;;  %v4135_v56 = vor.u32 %v4134_v59, %v4016_v46  ;;  %v3899_v11 = vmax.f32 %v3867_v3, 0.0  ;;  %v8527_v32 = vpop.f32.mrb[28].mxu0 }
 0x39b   : > { %v4012_v13 = vor.u32 %v4011_v36, %v4007_v63  ;;  %v4133_v20 = vor.u32 %v4132_v0, %v4009_v25  ;;  %v3897_v6 = vmax.f32 %v3865_v12, 0.0  ;;  %v3831_v62 = vmul.f32 %v8527_v32, %v10744_v9  ;;  %v3651_v46 = vpop.f32.mrb[29].mxu0 }
 0x39c   : > { %v10973_v47 = vsel %vm10421_vm10, %v4019_v37, %v4097_v29  ;;  %v10978_v55 = vsel %vm10142_vm5, %v4135_v56, %v10703_v7  ;;  %v10980_v5 = vpack.c.bf16 %v3899_v11, %v3898_v34  ;;  %v3829_v25 = vmul.f32 %v10744_v9, %v3651_v46  ;;  %v8528_v18 = vpop.f32.mrb[30].mxu0  ;;  %v4103_v11 = vld [vmem:[#allocation4 + $0x70] sm:$0xff] }
 0x39d   : > { %11435 = vst [vmem:[#allocation18_spill] sm:$0xff] %v10978_v55  ;;  %4099 = vst [vmem:[#allocation4 + $0x60] sm:$0xff] %v10973_v47  ;;  %v10987_v48 = vsel %vm10421_vm10, %v4012_v13, %v4094_v22  ;;  %v10992_v63 = vsel %vm10142_vm5, %v4133_v20, %v10701_v41  ;;  %v10994_v7 = vpack.c.bf16 %v3897_v6, %v3896_v53  ;;  %v3654_v36 = vpop.f32.mrb[31].mxu0 }
 0x39e   : > { %4195 = vst [vmem:[#allocation5 + $0x60] sm:$0xff] %v10978_v55  ;;  %11436 = vst [vmem:[#allocation19_spill] sm:$0xff] %v10992_v63  ;;  %v4028_v28 = vshrl.u32 %v10980_v5, 16  ;;  %v4030_v59 = vshll.u32 %v10980_v5, 16  ;;  %v3870_v3 = vadd.f32 %v10749_v38, %v3831_v62  ;;  %v3832_v29 = vmul.f32 %v8528_v18, %v10744_v9  ;;  %8566 = vmatmul.mubr.bf16.gmra.mrb[20].mxu1 %v10992_v63  ;;  %v4100_v62 = vld [vmem:[#allocation4 + $0x68] sm:$0xff] }
 0x39f   : > { %4096 = vst [vmem:[#allocation4 + $0x58] sm:$0xff] %v10987_v48  ;;  %4192 = vst [vmem:[#allocation5 + $0x58] sm:$0xff] %v10992_v63  ;;  %v4021_v41 = vshrl.u32 %v10994_v7, 16  ;;  %v4023_v0 = vshll.u32 %v10994_v7, 16  ;;  %v3868_v12 = vadd.f32 %v10749_v38, %v3829_v25  ;;  %v3830_v37 = vmul.f32 %v10744_v9, %v3654_v36  ;;  %8569 = vmatprep.mubr.bf16.mxu1 %v10978_v55 }
 0x3a0   : > { %v4032_v56 = vrot.slane %v4030_v59, 1  ;;  %v4138_v22 = vrot.slane %v4028_v28, 7  ;;  %v3871_v34 = vadd.f32 %v10749_v38, %v3832_v29  ;;  %v3902_v46 = vmax.f32 %v3870_v3, 0.0 }
 0x3a1   : > { %v4025_v13 = vrot.slane %v4023_v0, 1  ;;  %v4136_v20 = vrot.slane %v4021_v41, 7  ;;  %v3869_v53 = vadd.f32 %v10749_v38, %v3830_v37  ;;  %v3900_v4 = vmax.f32 %v3868_v12, 0.0  ;;  %v4205_v12 = vld [vmem:[#allocation5 + $0x80] sm:$0xff] }
 0x3a2   : > { %v4033_v6 = vor.u32 %v4032_v56, %v4028_v28  ;;  %v4139_v32 = vor.u32 %v4138_v22, %v4030_v59  ;;  %v3903_v18 = vmax.f32 %v3871_v34, 0.0 }
 0x3a3   : > { %v4026_v63 = vor.u32 %v4025_v13, %v4021_v41  ;;  %v4137_v25 = vor.u32 %v4136_v20, %v4023_v0  ;;  %v3901_v9 = vmax.f32 %v3869_v53, 0.0  ;;  %v4202_v13 = vld [vmem:[#allocation5 + $0x78] sm:$0xff] }
 0x3a4   : > { %v11013_v36 = vsel %vm10421_vm10, %v4033_v6, %v4103_v11  ;;  %v11018_v29 = vsel %vm10142_vm5, %v4139_v32, %v10709_v16  ;;  %v11020_v55 = vpack.c.bf16 %v3903_v18, %v3902_v46  ;;  %v4106_v11 = vld [vmem:[#allocation4 + $0x78] sm:$0xff]  ;;  %v11064_v18 = vld [vmem:[#allocation5] sm:$0xff] }
 0x3a5   : > { %4105 = vst [vmem:[#allocation4 + $0x70] sm:$0xff] %v11013_v36  ;;  %4201 = vst [vmem:[#allocation5 + $0x70] sm:$0xff] %v11018_v29  ;;  %v11026_v38 = vsel %vm10421_vm10, %v4026_v63, %v4100_v62  ;;  %v11031_v28 = vsel %vm10142_vm5, %v4137_v25, %v10707_v14  ;;  %v11033_v59 = vpack.c.bf16 %v3901_v9, %v3900_v4  ;;  %v4109_v4 = vld [vmem:[#allocation4 + $0x80] sm:$0xff]  ;;  %v9636_v25 = vld [vmem:[#allocation11 + $0x88] sm:$0xff]  }
 0x3a6   : > { %4102 = vst [vmem:[#allocation4 + $0x68] sm:$0xff] %v11026_v38  ;;  %4198 = vst [vmem:[#allocation5 + $0x68] sm:$0xff] %v11031_v28  ;;  %v4042_v16 = vshrl.u32 %v11020_v55, 16  ;;  %v4044_v3 = vshll.u32 %v11020_v55, 16  ;;  %8570 = vmatmul.mubr.bf16.gmra.mrb[24].mxu1 %v11031_v28  ;;  %v9639_v9 = vld [vmem:[#allocation11 + $0xa0] sm:$0xff]  }
 0x3a7   : > { %v4035_v63 = vshrl.u32 %v11033_v59, 16  ;;  %v4037_v41 = vshll.u32 %v11033_v59, 16  ;;  %8573 = vmatprep.mubr.bf16.mxu1 %v11018_v29 }
 0x3a8   : > { %v4046_v14 = vrot.slane %v4044_v3, 1  ;;  %v4142_v0 = vrot.slane %v4042_v16, 7 }
 0x3a9   : > { %v4039_v37 = vrot.slane %v4037_v41, 1  ;;  %v4140_v56 = vrot.slane %v4035_v63, 7 }
 0x3aa   : > { %v4047_v22 = vor.u32 %v4046_v14, %v4042_v16  ;;  %v4143_v34 = vor.u32 %v4142_v0, %v4044_v3  ;;  %v9640_v16 = vld [vmem:[#allocation11 + $0xa8] sm:$0xff]   ;;  %v9642_v3 = vld [vmem:[#allocation11 + $0xb8] sm:$0xff]   ;;  %v9645_v14 = vld [vmem:[#allocation11 + $0xd0] sm:$0xff]  }
 0x3ab   : > { %v4040_v20 = vor.u32 %v4039_v37, %v4035_v63  ;;  %v4141_v53 = vor.u32 %v4140_v56, %v4037_v41  ;;  %v9643_v63 = vld [vmem:[#allocation11 + $0xc0] sm:$0xff]   ;;  %v9644_v41 = vld [vmem:[#allocation11 + $0xc8] sm:$0xff]   ;;  %v9646_v0 = vld [vmem:[#allocation11 + $0xd8] sm:$0xff]  }
 0x3ac   : > { %v11045_v6 = vsel %vm10421_vm10, %v4047_v22, %v4109_v4  ;;  %v11049_v32 = vsel %vm10142_vm5, %v4143_v34, %v4205_v12  ;;  %v9647_v4 = vld [vmem:[#allocation11 + $0xe0] sm:$0xff]   ;;  %v9648_v12 = vld [vmem:[#allocation11 + $0xe8] sm:$0xff]   ;;  %v9658_v22 = vld [vmem:[#allocation11 + $0x138] sm:$0xff]  }
 0x3ad   : > { %4111 = vst [vmem:[#allocation4 + $0x80] sm:$0xff] %v11045_v6  ;;  %4207 = vst [vmem:[#allocation5 + $0x80] sm:$0xff] %v11049_v32  ;;  %v11055_v62 = vsel %vm10421_vm10, %v4040_v20, %v4106_v11  ;;  %v11059_v46 = vsel %vm10142_vm5, %v4141_v53, %v4202_v13  ;;  %v9655_v37 = vld [vmem:[#allocation11 + $0x120] sm:$0xff]   ;;  %v9656_v56 = vld [vmem:[#allocation11 + $0x128] sm:$0xff]  }
 0x3ae   : > { %4108 = vst [vmem:[#allocation4 + $0x78] sm:$0xff] %v11055_v62  ;;  %4204 = vst [vmem:[#allocation5 + $0x78] sm:$0xff] %v11059_v46  ;;  %8574 = vmatmul.mubr.bf16.gmra.mrb[28].mxu1 %v11059_v46  ;;  %v11438_v34 = vld [vmem:[#allocation16_spill] sm:$0xff]  ;;  %v9661_v11 = vld [vmem:[#allocation11 + $0x150] sm:$0xff]  }
 0x3af   : > { %8593 = vmatprep.mubr.bf16.mxu1 %v11064_v18  ;;  %v9662_v13 = vld [vmem:[#allocation11 + $0x158] sm:$0xff]   ;;  %v9663_v20 = vld [vmem:[#allocation11 + $0x160] sm:$0xff]   ;;  %v9665_v53 = vld [vmem:[#allocation11 + $0x170] sm:$0xff]  }
 0x3b6   : > { %8594 = vmatmul.mubr.bf16.vlgmr.msra.gmra.mrb[0].mxu1 %v10762_v23 }
 0x3b7   : > { %8597 = vmatprep.mubr.bf16.mxu1 %v10759_v44  ;;  %8626 = vmatpush3.bf16.msra.mxu1 %v10927_v31  ;;  %v9641_v31 = vld [vmem:[#allocation11 + $0xb0] sm:$0xff]  }
 0x3b8   : > { %8627 = vmatprep.subr.bf16.mxu1 %v9636_v25 }
 0x3bb   : > { %8628 = vmatpush3.bf16.msra.mxu1 %v9636_v25  ;;  %v9666_v25 = vld [vmem:[#allocation11 + $0x178] sm:$0xff]  }
 0x3bc   : > { %8629 = vmatprep.subr.bf16.mxu1 %v9637_v24 }
 0x3be   : > { %8598 = vmatmul.mubr.bf16.gmra.mrb[4].mxu1 %v10793_v15 }
 0x3bf   : > { %8601 = vmatprep.mubr.bf16.mxu1 %v10783_v27  ;;  %8630 = vmatpush3.bf16.msra.mxu1 %v9637_v24  ;;  %v9667_v24 = vld [vmem:[#allocation11 + $0x180] sm:$0xff]  }
 0x3c0   : > { %8631 = vmatprep.subr.bf16.mxu1 %v9638_v8 }
 0x3c3   : > { %8632 = vmatpush3.bf16.msra.mxu1 %v9638_v8  ;;  %v5865_v8 = vld [vmem:[#allocation4 + $0x8] sm:$0xff] }
 0x3c4   : > { %8633 = vmatprep.subr.bf16.mxu1 %v9639_v9 }
 0x3c6   : > { %8602 = vmatmul.mubr.bf16.gmra.mrb[8].mxu1 %v10831_v33 }
 0x3c7   : > { %8605 = vmatprep.mubr.bf16.mxu1 %v10817_v21  ;;  %8634 = vmatpush3.bf16.msra.mxu1 %v9639_v9  ;;  %v9668_v9 = vld [vmem:[#allocation11 + $0x188] sm:$0xff]  }
 0x3c8   : > { %8635 = vmatprep.subr.bf16.mxu1 %v9640_v16 }
 0x3cb   : > { %8636 = vmatpush3.bf16.msra.mxu1 %v9640_v16  ;;  %v11132_v16 = vld [vmem:[#allocation4 + $0x10] sm:$0xff] }
 0x3cc   : > { %8637 = vmatprep.subr.bf16.mxu1 %v9641_v31 }
 0x3ce   : > { %8606 = vmatmul.mubr.bf16.gmra.mrb[12].mxu1 %v10871_v39 }
 0x3cf   : > { %8609 = vmatprep.mubr.bf16.mxu1 %v10857_v43  ;;  %8638 = vmatpush3.bf16.msra.mxu1 %v9641_v31  ;;  %v11135_v31 = vld [vmem:[#allocation4 + $0x18] sm:$0xff] }
 0x3d0   : > { %8639 = vmatprep.subr.bf16.mxu1 %v9642_v3 }
 0x3d3   : > { %8640 = vmatpush3.bf16.msra.mxu1 %v9642_v3  ;;  %v9669_v3 = vld [vmem:[#allocation11 + $0x190] sm:$0xff]  }
 0x3d4   : > { %8673 = vmatprep.subr.bf16.mxu1 %v9643_v63 }
 0x3d6   : > { %8610 = vmatmul.mubr.bf16.gmra.mrb[16].mxu1 %v10911_v52 }
 0x3d7   : > { %8613 = vmatprep.mubr.bf16.mxu1 %v10897_v26 }
 0x3de   : > { %8614 = vmatmul.mubr.bf16.gmra.mrb[20].mxu1 %v10954_v17 }
 0x3df   : > { %8617 = vmatprep.mubr.bf16.mxu1 %v10939_v42 }
 0x3e6   : > { %8618 = vmatmul.mubr.bf16.gmra.mrb[24].mxu1 %v10994_v7 }
 0x3e7   : > { %8621 = vmatprep.mubr.bf16.mxu1 %v10980_v5 }
 0x3ee   : > { %8622 = vmatmul.mubr.bf16.gmra.mrb[28].mxu1 %v11033_v59 }
 0x3ef   : > { %8641 = vmatprep.mubr.bf16.mxu1 %v11064_v18 }
 0x3f6   : > { %8642 = vmatmul.mubr.bf16.vlgmr.msra.gmra.mrb[0].mxu1 %v10789_v54  ;;  %v9650_v54 = vld [vmem:[#allocation11 + $0xf8] sm:$0xff]  }
 0x3f7   : > { %8645 = vmatprep.mubr.bf16.mxu1 %v10778_v45  ;;  %8674 = vmatpush3.bf16.msra.mxu1 %v9643_v63  ;;  %v9649_v45 = vld [vmem:[#allocation11 + $0xf0] sm:$0xff]   ;;  %v9670_v63 = vld [vmem:[#allocation11 + $0x198] sm:$0xff]  }
 0x3f8   : > { %8675 = vmatprep.subr.bf16.mxu1 %v9644_v41 }
 0x3fb   : > { %8676 = vmatpush3.bf16.msra.mxu1 %v9644_v41  ;;  %v11138_v41 = vld [vmem:[#allocation4 + $0x20] sm:$0xff] }
 0x3fc   : > { %8677 = vmatprep.subr.bf16.mxu1 %v9645_v14 }
 0x3fe   : > { %8646 = vmatmul.mubr.bf16.gmra.mrb[4].mxu1 %v10824_v51  ;;  %v5189_v51 = vld [vmem:[#allocation5 + $0x8] sm:$0xff] }
 0x3ff   : > { %8649 = vmatprep.mubr.bf16.mxu1 %v10810_v57  ;;  %8678 = vmatpush3.bf16.msra.mxu1 %v9645_v14  ;;  %v9651_v57 = vld [vmem:[#allocation11 + $0x100] sm:$0xff]   ;;  %v11141_v14 = vld [vmem:[#allocation4 + $0x28] sm:$0xff] }
 0x400   : > { %8679 = vmatprep.subr.bf16.mxu1 %v9646_v0 }
 0x403   : > { %8680 = vmatpush3.bf16.msra.mxu1 %v9646_v0  ;;  %v9671_v0 = vld [vmem:[#allocation11 + $0x1a0] sm:$0xff]  }
 0x404   : > { %8681 = vmatprep.subr.bf16.mxu1 %v9647_v4 }
 0x406   : > { %8650 = vmatmul.mubr.bf16.gmra.mrb[8].mxu1 %v10864_v2  ;;  %v11099_v2 = vld [vmem:[#allocation5 + $0x10] sm:$0xff] }
 0x407   : > { %8653 = vmatprep.mubr.bf16.mxu1 %v10850_v58  ;;  %8682 = vmatpush3.bf16.msra.mxu1 %v9647_v4  ;;  %v9652_v58 = vld [vmem:[#allocation11 + $0x108] sm:$0xff]  }
 0x408   : > { %8683 = vmatprep.subr.bf16.mxu1 %v9648_v12  ;;  %v9672_v4 = vld [vmem:[#allocation11 + $0x1a8] sm:$0xff]  }
 0x40b   : > { %8684 = vmatpush3.bf16.msra.mxu1 %v9648_v12  ;;  %v11144_v12 = vld [vmem:[#allocation4 + $0x30] sm:$0xff] }
 0x40c   : > { %8685 = vmatprep.subr.bf16.mxu1 %v9649_v45 }
 0x40e   : > { %8654 = vmatmul.mubr.bf16.gmra.mrb[12].mxu1 %v10904_v61  ;;  %v9654_v61 = vld [vmem:[#allocation11 + $0x118] sm:$0xff]  }
 0x40f   : > { %8657 = vmatprep.mubr.bf16.mxu1 %v10890_v35  ;;  %8686 = vmatpush3.bf16.msra.mxu1 %v9649_v45  ;;  %v9653_v35 = vld [vmem:[#allocation11 + $0x110] sm:$0xff]   ;;  %v11147_v45 = vld [vmem:[#allocation4 + $0x38] sm:$0xff] }
 0x410   : > { %8687 = vmatprep.subr.bf16.mxu1 %v9650_v54 }
 0x413   : > { %8688 = vmatpush3.bf16.msra.mxu1 %v9650_v54  ;;  %v9673_v54 = vld [vmem:[#allocation11 + $0x1b0] sm:$0xff]  }
 0x414   : > { %8721 = vmatprep.subr.bf16.mxu1 %v9651_v57 }
 0x416   : > { %8658 = vmatmul.mubr.bf16.gmra.mrb[16].mxu1 %v10947_v40 }
 0x417   : > { %8661 = vmatprep.mubr.bf16.mxu1 %v10932_v60 }
 0x41e   : > { %8662 = vmatmul.mubr.bf16.gmra.mrb[20].mxu1 %v10987_v48 }
 0x41f   : > { %8665 = vmatprep.mubr.bf16.mxu1 %v10973_v47 }
 0x426   : > { %8666 = vmatmul.mubr.bf16.gmra.mrb[24].mxu1 %v11026_v38 }
 0x427   : > { %8669 = vmatprep.mubr.bf16.mxu1 %v11013_v36 }
 0x42e   : > { %8670 = vmatmul.mubr.bf16.gmra.mrb[28].mxu1 %v11055_v62 }
 0x42f   : > { %8689 = vmatprep.mubr.bf16.mxu1 %v5189_v51  ;;  %v11150_v51 = vld [vmem:[#allocation4 + $0x40] sm:$0xff] }
 0x436   : > { %8690 = vmatmul.mubr.bf16.vlgmr.msra.gmra.mrb[0].mxu1 %v11099_v2 }
 0x437   : > { %8693 = vmatprep.mubr.bf16.mxu1 %v10829_v50  ;;  %8722 = vmatpush3.bf16.msra.mxu1 %v9651_v57  ;;  %v9657_v50 = vld [vmem:[#allocation11 + $0x130] sm:$0xff]   ;;  %v9674_v57 = vld [vmem:[#allocation11 + $0x1b8] sm:$0xff]  }
 0x438   : > { %8723 = vmatprep.subr.bf16.mxu1 %v9652_v58 }
 0x43b   : > { %8724 = vmatpush3.bf16.msra.mxu1 %v9652_v58  ;;  %v9675_v58 = vld [vmem:[#allocation11 + $0x1c0] sm:$0xff]  }
 0x43c   : > { %8725 = vmatprep.subr.bf16.mxu1 %v9653_v35 }
 0x43e   : > { %8694 = vmatmul.mubr.bf16.gmra.mrb[4].mxu1 %v10815_v10  ;;  %v11437_v10 = vld [vmem:[#allocation17_spill] sm:$0xff] }
 0x43f   : > { %8697 = vmatprep.mubr.bf16.mxu1 %v10869_v19  ;;  %8726 = vmatpush3.bf16.msra.mxu1 %v9653_v35  ;;  %v9659_v19 = vld [vmem:[#allocation11 + $0x140] sm:$0xff]   ;;  %v6204_v35 = vld [vmem:[#allocation5 + $0x18] sm:$0xff] }
 0x440   : > { %8727 = vmatprep.subr.bf16.mxu1 %v9654_v61 }
 0x443   : > { %8728 = vmatpush3.bf16.msra.mxu1 %v9654_v61  ;;  %v6205_v61 = vld [vmem:[#allocation5 + $0x20] sm:$0xff] }
 0x444   : > { %8729 = vmatprep.subr.bf16.mxu1 %v9655_v37 }
 0x446   : > { %8698 = vmatmul.mubr.bf16.gmra.mrb[8].mxu1 %v10855_v30  ;;  %v11439_v30 = vld [vmem:[#allocation19_spill] sm:$0xff] }
 0x447   : > { %8701 = vmatprep.mubr.bf16.mxu1 %v10909_v49  ;;  %8730 = vmatpush3.bf16.msra.mxu1 %v9655_v37  ;;  %v11440_v49 = vld [vmem:[#allocation18_spill] sm:$0xff] }
 0x448   : > { %8731 = vmatprep.subr.bf16.mxu1 %v9656_v56  ;;  %v9681_v37 = vld [vmem:[#allocation11 + $0x1f0] sm:$0xff]  }
 0x44b   : > { %8732 = vmatpush3.bf16.msra.mxu1 %v9656_v56  ;;  %v9682_v56 = vld [vmem:[#allocation11 + $0x1f8] sm:$0xff]  }
 0x44c   : > { %8733 = vmatprep.subr.bf16.mxu1 %v9657_v50 }
 0x44e   : > { %8702 = vmatmul.mubr.bf16.gmra.mrb[12].mxu1 %v10895_v1  ;;  %v9660_v1 = vld [vmem:[#allocation11 + $0x148] sm:$0xff]  }
 0x44f   : > { %8705 = vmatprep.mubr.bf16.mxu1 %v11437_v10  ;;  %8734 = vmatpush3.bf16.msra.mxu1 %v9657_v50  ;;  %v6210_v50 = vld [vmem:[#allocation5 + $0x48] sm:$0xff]  ;;  %v9683_v10 = vld [vmem:[#allocation11 + $0x200] sm:$0xff]  }
 0x450   : > { %8735 = vmatprep.subr.bf16.mxu1 %v9658_v22 }
 0x453   : > { %8736 = vmatpush3.bf16.msra.mxu1 %v9658_v22  ;;  %v6211_v22 = vld [vmem:[#allocation5 + $0x50] sm:$0xff] }
 0x454   : > { %8769 = vmatprep.subr.bf16.mxu1 %v9659_v19 }
 0x456   : > { %8706 = vmatmul.mubr.bf16.gmra.mrb[16].mxu1 %v11438_v34  ;;  %v9684_v34 = vld [vmem:[#allocation11 + $0x208] sm:$0xff]  }
 0x457   : > { %8709 = vmatprep.mubr.bf16.mxu1 %v11439_v30 }
 0x45e   : > { %8710 = vmatmul.mubr.bf16.gmra.mrb[20].mxu1 %v11440_v49 }
 0x45f   : > { %8713 = vmatprep.mubr.bf16.mxu1 %v11031_v28 }
 0x466   : > { %8714 = vmatmul.mubr.bf16.gmra.mrb[24].mxu1 %v11018_v29 }
 0x467   : > { %8717 = vmatprep.mubr.bf16.mxu1 %v11059_v46 }
 0x46e   : > { %8718 = vmatmul.mubr.bf16.gmra.mrb[28].mxu1 %v11049_v32 }
 0x46f   : > { %8737 = vmatprep.mubr.bf16.mxu1 %v10762_v23  ;;  %v9664_v23 = vld [vmem:[#allocation11 + $0x168] sm:$0xff]  }
 0x476   : > { %8738 = vmatmul.mubr.bf16.vlgmr.msra.gmra.mrb[0].mxu1 %v10759_v44 }
 0x477   : > { %8741 = vmatprep.mubr.bf16.mxu1 %v10793_v15  ;;  %8770 = vmatpush3.bf16.msra.mxu1 %v9659_v19  ;;  %v6213_v19 = vld [vmem:[#allocation5 + $0x60] sm:$0xff] }
 0x478   : > { %8771 = vmatprep.subr.bf16.mxu1 %v9660_v1 }
 0x47b   : > { %8772 = vmatpush3.bf16.msra.mxu1 %v9660_v1 }
 0x47c   : > { %8773 = vmatprep.subr.bf16.mxu1 %v9661_v11 }
 0x47e   : > { %8742 = vmatmul.mubr.bf16.gmra.mrb[4].mxu1 %v10783_v27 }
 0x47f   : > { %8745 = vmatprep.mubr.bf16.mxu1 %v10831_v33  ;;  %8774 = vmatpush3.bf16.msra.mxu1 %v9661_v11  ;;  %v4208_v11 = vld [vmem:[%s10106_s21] sm:$0xff] }
 0x480   : > { %8775 = vmatprep.subr.bf16.mxu1 %v9662_v13 }
 0x483   : > { %8776 = vmatpush3.bf16.msra.mxu1 %v9662_v13 }
 0x484   : > { %8777 = vmatprep.subr.bf16.mxu1 %v9663_v20 }
 0x486   : > { %8746 = vmatmul.mubr.bf16.gmra.mrb[8].mxu1 %v10817_v21 }
 0x487   : > { %8749 = vmatprep.mubr.bf16.mxu1 %v10871_v39  ;;  %8778 = vmatpush3.bf16.msra.mxu1 %v9663_v20 }
 0x488   : > { %8779 = vmatprep.subr.bf16.mxu1 %v9664_v23 }
 0x48b   : > { %8780 = vmatpush3.bf16.msra.mxu1 %v9664_v23 }
 0x48c   : > { %8781 = vmatprep.subr.bf16.mxu1 %v9665_v53 }
 0x48e   : > { %8750 = vmatmul.mubr.bf16.gmra.mrb[12].mxu1 %v10857_v43 }
 0x48f   : > { %8753 = vmatprep.mubr.bf16.mxu1 %v10911_v52  ;;  %8782 = vmatpush3.bf16.msra.mxu1 %v9665_v53  ;;  %v4211_v53 = vld [vmem:[%s10106_s21 + $0x18] sm:$0xff] }
 0x490   : > { %8783 = vmatprep.subr.bf16.mxu1 %v9666_v25 }
 0x493   : > { %8784 = vmatpush3.bf16.msra.mxu1 %v9666_v25 }
 0x494   : > { %8817 = vmatprep.subr.bf16.mxu1 %v9667_v24 }
 0x496   : > { %8754 = vmatmul.mubr.bf16.gmra.mrb[16].mxu1 %v10897_v26 }
 0x497   : > { %8757 = vmatprep.mubr.bf16.mxu1 %v10954_v17 }
 0x49e   : > { %8758 = vmatmul.mubr.bf16.gmra.mrb[20].mxu1 %v10939_v42 }
 0x49f   : > { %8761 = vmatprep.mubr.bf16.mxu1 %v10994_v7 }
 0x4a6   : > { %8762 = vmatmul.mubr.bf16.gmra.mrb[24].mxu1 %v10980_v5 }
 0x4a7   : > { %8765 = vmatprep.mubr.bf16.mxu1 %v11033_v59 }
 0x4ae   : > { %8766 = vmatmul.mubr.bf16.gmra.mrb[28].mxu1 %v11020_v55 }
 0x4af   : > { %8785 = vmatprep.mubr.bf16.mxu1 %v5865_v8 }
 0x4b6   : > { %8786 = vmatmul.mubr.bf16.vlgmr.msra.gmra.mrb[0].mxu1 %v11132_v16 }
 0x4b7   : > { %8789 = vmatprep.mubr.bf16.mxu1 %v11135_v31  ;;  %8818 = vmatpush3.bf16.msra.mxu1 %v9667_v24 }
 0x4b8   : > { %8819 = vmatprep.subr.bf16.mxu1 %v9668_v9 }
 0x4bb   : > { %8820 = vmatpush3.bf16.msra.mxu1 %v9668_v9  ;;  %v4209_v9 = vld [vmem:[%s10106_s21 + $0x8] sm:$0xff] }
 0x4bc   : > { %8821 = vmatprep.subr.bf16.mxu1 %v9669_v3 }
 0x4be   : > { %8790 = vmatmul.mubr.bf16.gmra.mrb[4].mxu1 %v11138_v41 }
 0x4bf   : > { %8793 = vmatprep.mubr.bf16.mxu1 %v11141_v14  ;;  %8822 = vmatpush3.bf16.msra.mxu1 %v9669_v3 }
 0x4c0   : > { %8823 = vmatprep.subr.bf16.mxu1 %v9670_v63 }
 0x4c3   : > { %8824 = vmatpush3.bf16.msra.mxu1 %v9670_v63 }
 0x4c4   : > { %8825 = vmatprep.subr.bf16.mxu1 %v9671_v0 }
 0x4c6   : > { %8794 = vmatmul.mubr.bf16.gmra.mrb[8].mxu1 %v11144_v12 }
 0x4c7   : > { %8797 = vmatprep.mubr.bf16.mxu1 %v11147_v45  ;;  %8826 = vmatpush3.bf16.msra.mxu1 %v9671_v0 }
 0x4c8   : > { %8827 = vmatprep.subr.bf16.mxu1 %v9672_v4 }
 0x4cb   : > { %8828 = vmatpush3.bf16.msra.mxu1 %v9672_v4  ;;  %v4214_v4 = vld [vmem:[%s10106_s21 + $0x30] sm:$0xff] }
 0x4cc   : > { %8829 = vmatprep.subr.bf16.mxu1 %v9673_v54 }
 0x4ce   : > { %8798 = vmatmul.mubr.bf16.gmra.mrb[12].mxu1 %v11150_v51 }
 0x4cf   : > { %8801 = vmatprep.mubr.bf16.mxu1 %v10947_v40  ;;  %8830 = vmatpush3.bf16.msra.mxu1 %v9673_v54  ;;  %v9676_v40 = vld [vmem:[#allocation11 + $0x1c8] sm:$0xff]  }
 0x4d0   : > { %8831 = vmatprep.subr.bf16.mxu1 %v9674_v57 }
 0x4d3   : > { %8832 = vmatpush3.bf16.msra.mxu1 %v9674_v57  ;;  %v4212_v57 = vld [vmem:[%s10106_s21 + $0x20] sm:$0xff] }
 0x4d4   : > { %8865 = vmatprep.subr.bf16.mxu1 %v9675_v58 }
 0x4d6   : > { %8802 = vmatmul.mubr.bf16.gmra.mrb[16].mxu1 %v10932_v60  ;;  %v9677_v60 = vld [vmem:[#allocation11 + $0x1d0] sm:$0xff]  }
 0x4d7   : > { %8805 = vmatprep.mubr.bf16.mxu1 %v10987_v48  ;;  %v6206_v48 = vld [vmem:[#allocation5 + $0x28] sm:$0xff] }
 0x4de   : > { %8806 = vmatmul.mubr.bf16.gmra.mrb[20].mxu1 %v10973_v47  ;;  %v9678_v47 = vld [vmem:[#allocation11 + $0x1d8] sm:$0xff]  }
 0x4df   : > { %8809 = vmatprep.mubr.bf16.mxu1 %v11026_v38  ;;  %v9679_v38 = vld [vmem:[#allocation11 + $0x1e0] sm:$0xff]  }
 0x4e6   : > { %8810 = vmatmul.mubr.bf16.gmra.mrb[24].mxu1 %v11013_v36  ;;  %v6207_v36 = vld [vmem:[#allocation5 + $0x30] sm:$0xff] }
 0x4e7   : > { %8813 = vmatprep.mubr.bf16.mxu1 %v11055_v62  ;;  %v6208_v62 = vld [vmem:[#allocation5 + $0x38] sm:$0xff] }
 0x4ee   : > { %8814 = vmatmul.mubr.bf16.gmra.mrb[28].mxu1 %v11045_v6  ;;  %v9680_v6 = vld [vmem:[#allocation11 + $0x1e8] sm:$0xff]  }
 0x4ef   : > { %8833 = vmatprep.mubr.bf16.mxu1 %v11099_v2  ;;  %v6209_v2 = vld [vmem:[#allocation5 + $0x40] sm:$0xff] }
 0x4f6   : > { %8834 = vmatmul.mubr.bf16.vlgmr.msra.gmra.mrb[0].mxu1 %v6204_v35  ;;  %v4215_v35 = vld [vmem:[%s10106_s21 + $0x38] sm:$0xff] }
 0x4f7   : > { %8837 = vmatprep.mubr.bf16.mxu1 %v6205_v61  ;;  %8866 = vmatpush3.bf16.msra.mxu1 %v9675_v58 }
 0x4f8   : > { %8867 = vmatprep.subr.bf16.mxu1 %v9676_v40 }
 0x4fb   : > { %8868 = vmatpush3.bf16.msra.mxu1 %v9676_v40 }
 0x4fc   : > { %8869 = vmatprep.subr.bf16.mxu1 %v9677_v60 }
 0x4fe   : > { %8838 = vmatmul.mubr.bf16.gmra.mrb[4].mxu1 %v6206_v48  ;;  %v4213_v48 = vld [vmem:[%s10106_s21 + $0x28] sm:$0xff] }
 0x4ff   : > { %8841 = vmatprep.mubr.bf16.mxu1 %v6207_v36  ;;  %8870 = vmatpush3.bf16.msra.mxu1 %v9677_v60 }
 0x500   : > { %8871 = vmatprep.subr.bf16.mxu1 %v9678_v47 }
 0x503   : > { %8872 = vmatpush3.bf16.msra.mxu1 %v9678_v47 }
 0x504   : > { %8873 = vmatprep.subr.bf16.mxu1 %v9679_v38 }
 0x506   : > { %8842 = vmatmul.mubr.bf16.gmra.mrb[8].mxu1 %v6208_v62 }
 0x507   : > { %8845 = vmatprep.mubr.bf16.mxu1 %v6209_v2  ;;  %8874 = vmatpush3.bf16.msra.mxu1 %v9679_v38 }
 0x508   : > { %8875 = vmatprep.subr.bf16.mxu1 %v9680_v6 }
 0x50b   : > { %8876 = vmatpush3.bf16.msra.mxu1 %v9680_v6 }
 0x50c   : > { %8877 = vmatprep.subr.bf16.mxu1 %v9681_v37 }
 0x50e   : > { %8846 = vmatmul.mubr.bf16.gmra.mrb[12].mxu1 %v6210_v50  ;;  %v4218_v50 = vld [vmem:[%s10106_s21 + $0x50] sm:$0xff] }
 0x50f   : > { %8849 = vmatprep.mubr.bf16.mxu1 %v6211_v22  ;;  %8878 = vmatpush3.bf16.msra.mxu1 %v9681_v37 }
 0x510   : > { %8879 = vmatprep.subr.bf16.mxu1 %v9682_v56 }
 0x513   : > { %8880 = vmatpush3.bf16.msra.mxu1 %v9682_v56 }
 0x514   : > { %8913 = vmatprep.subr.bf16.mxu1 %v9683_v10 }
 0x516   : > { %8850 = vmatmul.mubr.bf16.gmra.mrb[16].mxu1 %v11439_v30  ;;  %v9685_v30 = vld [vmem:[#allocation11 + $0x210] sm:$0xff]  }
 0x517   : > { %8853 = vmatprep.mubr.bf16.mxu1 %v6213_v19 }
 0x51e   : > { %8854 = vmatmul.mubr.bf16.gmra.mrb[20].mxu1 %v11031_v28  ;;  %v9686_v28 = vld [vmem:[#allocation11 + $0x218] sm:$0xff]  }
 0x51f   : > { %8857 = vmatprep.mubr.bf16.mxu1 %v11018_v29  ;;  %v9687_v29 = vld [vmem:[#allocation11 + $0x220] sm:$0xff]  }
 0x526   : > { %8858 = vmatmul.mubr.bf16.gmra.mrb[24].mxu1 %v11059_v46  ;;  %v4210_v46 = vld [vmem:[%s10106_s21 + $0x10] sm:$0xff] }
 0x527   : > { %8861 = vmatprep.mubr.bf16.mxu1 %v11049_v32 }
 0x52e   : > { %8862 = vmatmul.mubr.bf16.gmra.mrb[28].mxu1 %v11064_v18 }
 0x52f   : > { %8881 = vmatprep.mubr.bf16.mxu1 %v10759_v44  ;;  %v9688_v44 = vld [vmem:[#allocation11 + $0x228] sm:$0xff]  }
 0x536   : > { %8882 = vmatmul.mubr.bf16.vlgmr.msra.gmra.mrb[0].mxu1 %v10793_v15  ;;  %v9690_v15 = vld [vmem:[#allocation11 + $0x238] sm:$0xff]  }
 0x537   : > { %8885 = vmatprep.mubr.bf16.mxu1 %v10783_v27  ;;  %8914 = vmatpush3.bf16.msra.mxu1 %v9683_v10  ;;  %v9689_v27 = vld [vmem:[#allocation11 + $0x230] sm:$0xff]  }
 0x538   : > { %8915 = vmatprep.subr.bf16.mxu1 %v9684_v34 }
 0x53b   : > { %8916 = vmatpush3.bf16.msra.mxu1 %v9684_v34  ;;  %v4216_v34 = vld [vmem:[%s10106_s21 + $0x40] sm:$0xff] }
 0x53c   : > { %8917 = vmatprep.subr.bf16.mxu1 %v9685_v30 }
 0x53e   : > { %8886 = vmatmul.mubr.bf16.gmra.mrb[4].mxu1 %v10831_v33  ;;  %v6887_v33 = vld [vmem:[#allocation4 + $0x50] sm:$0xff] }
 0x53f   : > { %8889 = vmatprep.mubr.bf16.mxu1 %v10817_v21  ;;  %8918 = vmatpush3.bf16.msra.mxu1 %v9685_v30  ;;  %v6886_v21 = vld [vmem:[#allocation4 + $0x48] sm:$0xff] }
 0x540   : > { %8919 = vmatprep.subr.bf16.mxu1 %v9686_v28 }
 0x543   : > { %8920 = vmatpush3.bf16.msra.mxu1 %v9686_v28 }
 0x544   : > { %8921 = vmatprep.subr.bf16.mxu1 %v9687_v29 }
 0x546   : > { %8890 = vmatmul.mubr.bf16.gmra.mrb[8].mxu1 %v10871_v39  ;;  %v6889_v39 = vld [vmem:[#allocation4 + $0x60] sm:$0xff] }
 0x547   : > { %8893 = vmatprep.mubr.bf16.mxu1 %v10857_v43  ;;  %8922 = vmatpush3.bf16.msra.mxu1 %v9687_v29  ;;  %v6888_v43 = vld [vmem:[#allocation4 + $0x58] sm:$0xff] }
 0x548   : > { %8923 = vmatprep.subr.bf16.mxu1 %v9688_v44 }
 0x54b   : > { %8924 = vmatpush3.bf16.msra.mxu1 %v9688_v44  ;;  %v4219_v44 = vld [vmem:[%s10106_s21 + $0x58] sm:$0xff] }
 0x54c   : > { %8925 = vmatprep.subr.bf16.mxu1 %v9689_v27 }
 0x54e   : > { %8894 = vmatmul.mubr.bf16.gmra.mrb[12].mxu1 %v10911_v52  ;;  %v6891_v52 = vld [vmem:[#allocation4 + $0x70] sm:$0xff] }
 0x54f   : > { %8897 = vmatprep.mubr.bf16.mxu1 %v10897_v26  ;;  %8926 = vmatpush3.bf16.msra.mxu1 %v9689_v27  ;;  %v6890_v26 = vld [vmem:[#allocation4 + $0x68] sm:$0xff] }
 0x550   : > { %8927 = vmatprep.subr.bf16.mxu1 %v9690_v15 }
 0x553   : > { %8928 = vmatpush3.bf16.msra.mxu1 %v9690_v15 }
 0x556   : > { %8898 = vmatmul.mubr.bf16.gmra.mrb[16].mxu1 %v10954_v17  ;;  %v6893_v17 = vld [vmem:[#allocation4 + $0x80] sm:$0xff] }
 0x557   : > { %8901 = vmatprep.mubr.bf16.mxu1 %v10939_v42  ;;  %v6892_v42 = vld [vmem:[#allocation4 + $0x78] sm:$0xff] }
 0x55e   : > { %8902 = vmatmul.mubr.bf16.gmra.mrb[20].mxu1 %v10994_v7  ;;  %v11200_v7 = vld [vmem:[%s11391_s6] ss:$0 sm:$0xff] }
 0x55f   : > { %8905 = vmatprep.mubr.bf16.mxu1 %v10980_v5 }
 0x566   : > { %8906 = vmatmul.mubr.bf16.gmra.mrb[24].mxu1 %v11033_v59 }
 0x567   : > { %8909 = vmatprep.mubr.bf16.mxu1 %v11020_v55  ;;  %v11195_v55 = vld [vmem:[%s11390_s5] ss:$0 sm:$0xff] }
 0x56e   : > { %8910 = vmatmul.mubr.bf16.gmra.mrb[28].mxu1 %v11064_v18 }
 0x56f   : > { %8929 = vmatprep.mubr.bf16.mxu1 %v11132_v16 }
 0x576   : > { %8930 = vmatmul.mubr.bf16.vlgmr.msra.gmra.mrb[0].mxu1 %v11135_v31 }
 0x577   : > { %8933 = vmatprep.mubr.bf16.mxu1 %v11138_v41 }
 0x57e   : > { %8934 = vmatmul.mubr.bf16.gmra.mrb[4].mxu1 %v11141_v14 }
 0x57f   : > { %8937 = vmatprep.mubr.bf16.mxu1 %v11144_v12 }
 0x586   : > { %8938 = vmatmul.mubr.bf16.gmra.mrb[8].mxu1 %v11147_v45 }
 0x587   : > { %8941 = vmatprep.mubr.bf16.mxu1 %v11150_v51 }
 0x58e   : > { %8942 = vmatmul.mubr.bf16.gmra.mrb[12].mxu1 %v6886_v21 }
 0x58f   : > { %8945 = vmatprep.mubr.bf16.mxu1 %v6887_v33  ;;  %v4217_v33 = vld [vmem:[%s10106_s21 + $0x48] sm:$0xff] }
 0x596   : > { %8946 = vmatmul.mubr.bf16.gmra.mrb[16].mxu1 %v6888_v43 }
 0x597   : > { %8949 = vmatprep.mubr.bf16.mxu1 %v6889_v39 }
 0x59e   : > { %8950 = vmatmul.mubr.bf16.gmra.mrb[20].mxu1 %v6890_v26 }
 0x59f   : > { %8953 = vmatprep.mubr.bf16.mxu1 %v6891_v52 }
 0x5a6   : > { %8954 = vmatmul.mubr.bf16.gmra.mrb[24].mxu1 %v6892_v42 }
 0x5a7   : > { %8957 = vmatprep.mubr.bf16.mxu1 %v6893_v17 }
 0x5ae   : > { %8958 = vmatmul.mubr.bf16.gmra.mrb[28].mxu1 %v11064_v18 }
 0x649   : > { %v8931_v5 = vpop.f32.mrb[0].mxu1 }
 0x64a   : > { %v7258_v59 = vmul.f32 %v8931_v5, %v11195_v55  ;;  %v6994_v32 = vpop.f32.mrb[1].mxu1 }
 0x64b   : > { %v7256_v49 = vmul.f32 %v11195_v55, %v6994_v32  ;;  %v8932_v18 = vpop.f32.mrb[2].mxu1 }
 0x64c   : > { %v7297_v1 = vadd.f32 %v11200_v7, %v7258_v59  ;;  %v7259_v13 = vmul.f32 %v8932_v18, %v11195_v55  ;;  %v6997_v20 = vpop.f32.mrb[3].mxu1  ;;  %v4222_v59 = vld [vmem:[%s10106_s21 + $0x70] sm:$0xff]  ;;  %v4220_v18 = vld [vmem:[%s10106_s21 + $0x60] sm:$0xff] }
 0x64d   : > { %v7295_v23 = vadd.f32 %v11200_v7, %v7256_v49  ;;  %v7257_v25 = vmul.f32 %v11195_v55, %v6997_v20  ;;  %v4223_v20 = vld [vmem:[%s10106_s21 + $0x78] sm:$0xff] }
 0x64e   : > { %v7329_v24 = vadd.f32 %v7297_v1, %v4210_v46  ;;  %v7298_v8 = vadd.f32 %v11200_v7, %v7259_v13 }
 0x64f   : > { %v7327_v16 = vadd.f32 %v7295_v23, %v4208_v11  ;;  %v7296_v31 = vadd.f32 %v11200_v7, %v7257_v25 }
 0x650   : > { %7361 = vst [vmem:[%s11216_s12 + $0x10] sm:$0xff] %v7329_v24  ;;  %v7330_v3 = vadd.f32 %v7298_v8, %v4211_v53  ;;  %v4221_v24 = vld [vmem:[%s10106_s21 + $0x68] sm:$0xff] }
 0x651   : > { %7359 = vst [vmem:[%s11216_s12] sm:$0xff] %v7327_v16  ;;  %v7328_v63 = vadd.f32 %v7296_v31, %v4209_v9  ;;  %v8935_v41 = vpop.f32.mrb[4].mxu1 }
 0x652   : > { %7362 = vst [vmem:[%s11216_s12 + $0x18] sm:$0xff] %v7330_v3  ;;  %v7262_v14 = vmul.f32 %v8935_v41, %v11195_v55  ;;  %v7010_v0 = vpop.f32.mrb[5].mxu1 }
 0x653   : > { %7360 = vst [vmem:[%s11216_s12 + $0x8] sm:$0xff] %v7328_v63  ;;  %v7260_v12 = vmul.f32 %v11195_v55, %v7010_v0  ;;  %v8936_v45 = vpop.f32.mrb[6].mxu1 }
 0x654   : > { %v7301_v54 = vadd.f32 %v11200_v7, %v7262_v14  ;;  %v7263_v51 = vmul.f32 %v8936_v45, %v11195_v55  ;;  %v7013_v58 = vpop.f32.mrb[7].mxu1  ;;  %v4226_v14 = vld [vmem:[%s10106_s21 + $0x90] sm:$0xff]  ;;  %v4224_v45 = vld [vmem:[%s10106_s21 + $0x80] sm:$0xff] }
 0x655   : > { %v7299_v40 = vadd.f32 %v11200_v7, %v7260_v12  ;;  %v7261_v61 = vmul.f32 %v11195_v55, %v7013_v58  ;;  %v4227_v58 = vld [vmem:[%s10106_s21 + $0x98] sm:$0xff] }
 0x656   : > { %v7333_v60 = vadd.f32 %v7301_v54, %v4214_v4  ;;  %v7302_v47 = vadd.f32 %v11200_v7, %v7263_v51 }
 0x657   : > { %v7331_v36 = vadd.f32 %v7299_v40, %v4212_v57  ;;  %v7300_v38 = vadd.f32 %v11200_v7, %v7261_v61 }
 0x658   : > { %7365 = vst [vmem:[%s11216_s12 + $0x30] sm:$0xff] %v7333_v60  ;;  %v7334_v6 = vadd.f32 %v7302_v47, %v4215_v35  ;;  %v4225_v60 = vld [vmem:[%s10106_s21 + $0x88] sm:$0xff] }
 0x659   : > { %7363 = vst [vmem:[%s11216_s12 + $0x20] sm:$0xff] %v7331_v36  ;;  %v7332_v62 = vadd.f32 %v7300_v38, %v4213_v48  ;;  %v8939_v2 = vpop.f32.mrb[8].mxu1 }
 0x65a   : > { %7366 = vst [vmem:[%s11216_s12 + $0x38] sm:$0xff] %v7334_v6  ;;  %v7266_v37 = vmul.f32 %v8939_v2, %v11195_v55  ;;  %v7026_v56 = vpop.f32.mrb[9].mxu1 }
 0x65b   : > { %7364 = vst [vmem:[%s11216_s12 + $0x28] sm:$0xff] %v7332_v62  ;;  %v7264_v22 = vmul.f32 %v11195_v55, %v7026_v56  ;;  %v8940_v10 = vpop.f32.mrb[10].mxu1 }
 0x65c   : > { %v7305_v19 = vadd.f32 %v11200_v7, %v7266_v37  ;;  %v7267_v30 = vmul.f32 %v8940_v10, %v11195_v55  ;;  %v7029_v28 = vpop.f32.mrb[11].mxu1  ;;  %v4230_v37 = vld [vmem:[%s10106_s21 + $0xb0] sm:$0xff]  ;;  %v4228_v10 = vld [vmem:[%s10106_s21 + $0xa0] sm:$0xff] }
 0x65d   : > { %v7303_v29 = vadd.f32 %v11200_v7, %v7264_v22  ;;  %v7265_v27 = vmul.f32 %v11195_v55, %v7029_v28  ;;  %v4231_v28 = vld [vmem:[%s10106_s21 + $0xb8] sm:$0xff] }
 0x65e   : > { %v7337_v15 = vadd.f32 %v7305_v19, %v4218_v50  ;;  %v7306_v21 = vadd.f32 %v11200_v7, %v7267_v30 }
 0x65f   : > { %v7335_v43 = vadd.f32 %v7303_v29, %v4216_v34  ;;  %v7304_v39 = vadd.f32 %v11200_v7, %v7265_v27 }
 0x660   : > { %7369 = vst [vmem:[%s11216_s12 + $0x50] sm:$0xff] %v7337_v15  ;;  %v7338_v26 = vadd.f32 %v7306_v21, %v4219_v44  ;;  %v4229_v15 = vld [vmem:[%s10106_s21 + $0xa8] sm:$0xff] }
 0x661   : > { %7367 = vst [vmem:[%s11216_s12 + $0x40] sm:$0xff] %v7335_v43  ;;  %v7336_v52 = vadd.f32 %v7304_v39, %v4217_v33  ;;  %v8943_v42 = vpop.f32.mrb[12].mxu1 }
 0x662   : > { %7370 = vst [vmem:[%s11216_s12 + $0x58] sm:$0xff] %v7338_v26  ;;  %v7270_v17 = vmul.f32 %v8943_v42, %v11195_v55  ;;  %v7042_v5 = vpop.f32.mrb[13].mxu1 }
 0x663   : > { %7368 = vst [vmem:[%s11216_s12 + $0x48] sm:$0xff] %v7336_v52  ;;  %v7268_v32 = vmul.f32 %v11195_v55, %v7042_v5  ;;  %v8944_v46 = vpop.f32.mrb[14].mxu1 }
 0x664   : > { %v7309_v49 = vadd.f32 %v11200_v7, %v7270_v17  ;;  %v7271_v1 = vmul.f32 %v8944_v46, %v11195_v55  ;;  %v7045_v11 = vpop.f32.mrb[15].mxu1  ;;  %v4234_v17 = vld [vmem:[%s10106_s21 + $0xd0] sm:$0xff]  ;;  %v4232_v46 = vld [vmem:[%s10106_s21 + $0xc0] sm:$0xff] }
 0x665   : > { %v7307_v13 = vadd.f32 %v11200_v7, %v7268_v32  ;;  %v7269_v23 = vmul.f32 %v11195_v55, %v7045_v11  ;;  %v4235_v11 = vld [vmem:[%s10106_s21 + $0xd8] sm:$0xff] }
 0x666   : > { %v7341_v53 = vadd.f32 %v7309_v49, %v4222_v59  ;;  %v7310_v25 = vadd.f32 %v11200_v7, %v7271_v1 }
 0x667   : > { %v7339_v8 = vadd.f32 %v7307_v13, %v4220_v18  ;;  %v7308_v9 = vadd.f32 %v11200_v7, %v7269_v23 }
 0x668   : > { %7373 = vst [vmem:[%s11216_s12 + $0x70] sm:$0xff] %v7341_v53  ;;  %v7342_v16 = vadd.f32 %v7310_v25, %v4223_v20  ;;  %v4233_v53 = vld [vmem:[%s10106_s21 + $0xc8] sm:$0xff] }
 0x669   : > { %7371 = vst [vmem:[%s11216_s12 + $0x60] sm:$0xff] %v7339_v8  ;;  %v7340_v31 = vadd.f32 %v7308_v9, %v4221_v24  ;;  %v8947_v3 = vpop.f32.mrb[16].mxu1 }
 0x66a   : > { %7374 = vst [vmem:[%s11216_s12 + $0x78] sm:$0xff] %v7342_v16  ;;  %v7274_v63 = vmul.f32 %v8947_v3, %v11195_v55  ;;  %v7058_v41 = vpop.f32.mrb[17].mxu1 }
 0x66b   : > { %7372 = vst [vmem:[%s11216_s12 + $0x68] sm:$0xff] %v7340_v31  ;;  %v7272_v0 = vmul.f32 %v11195_v55, %v7058_v41  ;;  %v8948_v4 = vpop.f32.mrb[18].mxu1 }
 0x66c   : > { %v7313_v12 = vadd.f32 %v11200_v7, %v7274_v63  ;;  %v7275_v54 = vmul.f32 %v8948_v4, %v11195_v55  ;;  %v7061_v57 = vpop.f32.mrb[19].mxu1  ;;  %v4238_v63 = vld [vmem:[%s10106_s21 + $0xf0] sm:$0xff]  ;;  %v4236_v4 = vld [vmem:[%s10106_s21 + $0xe0] sm:$0xff] }
 0x66d   : > { %v7311_v51 = vadd.f32 %v11200_v7, %v7272_v0  ;;  %v7273_v40 = vmul.f32 %v11195_v55, %v7061_v57  ;;  %v4239_v57 = vld [vmem:[%s10106_s21 + $0xf8] sm:$0xff] }
 0x66e   : > { %v7345_v35 = vadd.f32 %v7313_v12, %v4226_v14  ;;  %v7314_v61 = vadd.f32 %v11200_v7, %v7275_v54 }
 0x66f   : > { %v7343_v47 = vadd.f32 %v7311_v51, %v4224_v45  ;;  %v7312_v48 = vadd.f32 %v11200_v7, %v7273_v40 }
 0x670   : > { %7377 = vst [vmem:[%s11216_s12 + $0x90] sm:$0xff] %v7345_v35  ;;  %v7346_v36 = vadd.f32 %v7314_v61, %v4227_v58  ;;  %v4237_v35 = vld [vmem:[%s10106_s21 + $0xe8] sm:$0xff]  ;;  %s9805_s21 = scalar_lea.vmem %s11338_s29, 4096 }
 0x671   : > { %7375 = vst [vmem:[%s11216_s12 + $0x80] sm:$0xff] %v7343_v47  ;;  %v7344_v38 = vadd.f32 %v7312_v48, %v4225_v60  ;;  %v8951_v6 = vpop.f32.mrb[20].mxu1  ;;  %p9806_p11 = scmp.ne.s32.totalorder %s11338_s29, %s9805_s21  ;;  %p9813_p9 = scmp.lt.s32.totalorder %s9811_s22, %s9805_s21 }
 0x672   : > { %7378 = vst [vmem:[%s11216_s12 + $0x98] sm:$0xff] %v7346_v36  ;;  %v7278_v62 = vmul.f32 %v8951_v6, %v11195_v55  ;;  %v7074_v2 = vpop.f32.mrb[21].mxu1 }
 0x673   : > { %7376 = vst [vmem:[%s11216_s12 + $0x88] sm:$0xff] %v7344_v38  ;;  %v7276_v56 = vmul.f32 %v11195_v55, %v7074_v2  ;;  %v8952_v50 = vpop.f32.mrb[22].mxu1  ;;  %p9807_p1 = pnand %p9806_p11, %p11441_p0  ;;  %p9814_p12 = por %p9813_p9, %p9812_p7 }
 0x674   : > { %v7317_v22 = vadd.f32 %v11200_v7, %v7278_v62  ;;  %v7279_v19 = vmul.f32 %v8952_v50, %v11195_v55  ;;  %v7077_v34 = vpop.f32.mrb[23].mxu1 }
 0x675   : > { %v7315_v30 = vadd.f32 %v11200_v7, %v7276_v56  ;;  %v7277_v29 = vmul.f32 %v11195_v55, %v7077_v34  ;;  %p9808_p3 = pneg %p9807_p1 }
 0x676   : > { %v7349_v44 = vadd.f32 %v7317_v22, %v4230_v37  ;;  %v7318_v27 = vadd.f32 %v11200_v7, %v7279_v19 }
 0x677   : > { %v7347_v21 = vadd.f32 %v7315_v30, %v4228_v10  ;;  %v7316_v33 = vadd.f32 %v11200_v7, %v7277_v29  ;;  %p9815_p2 = pnand %p9814_p12, %p9808_p3 }
 0x678   : > { %7381 = vst [vmem:[%s11216_s12 + $0xb0] sm:$0xff] %v7349_v44  ;;  %v7350_v43 = vadd.f32 %v7318_v27, %v4231_v28 }
 0x679   : > { %7379 = vst [vmem:[%s11216_s12 + $0xa0] sm:$0xff] %v7347_v21  ;;  %v7348_v39 = vadd.f32 %v7316_v33, %v4229_v15  ;;  %v8955_v26 = vpop.f32.mrb[24].mxu1 }
 0x67a   : > { %7382 = vst [vmem:[%s11216_s12 + $0xb8] sm:$0xff] %v7350_v43  ;;  %v7282_v52 = vmul.f32 %v8955_v26, %v11195_v55  ;;  %v7090_v42 = vpop.f32.mrb[25].mxu1 }
 0x67b   : > { %7380 = vst [vmem:[%s11216_s12 + $0xa8] sm:$0xff] %v7348_v39  ;;  %v7280_v5 = vmul.f32 %v11195_v55, %v7090_v42  ;;  %v8956_v59 = vpop.f32.mrb[26].mxu1 }
 0x67c   : > { %v7321_v32 = vadd.f32 %v11200_v7, %v7282_v52  ;;  %v7283_v49 = vmul.f32 %v8956_v59, %v11195_v55  ;;  %v7093_v18 = vpop.f32.mrb[27].mxu1 }
 0x67d   : > { %v7319_v1 = vadd.f32 %v11200_v7, %v7280_v5  ;;  %v7281_v13 = vmul.f32 %v11195_v55, %v7093_v18 }
 0x67e   : > { %v7353_v20 = vadd.f32 %v7321_v32, %v4234_v17  ;;  %v7322_v23 = vadd.f32 %v11200_v7, %v7283_v49 }
 0x67f   : > { %v7351_v25 = vadd.f32 %v7319_v1, %v4232_v46  ;;  %v7320_v24 = vadd.f32 %v11200_v7, %v7281_v13 }
 0x680   : > { %7385 = vst [vmem:[%s11216_s12 + $0xd0] sm:$0xff] %v7353_v20  ;;  %v7354_v8 = vadd.f32 %v7322_v23, %v4235_v11 }
 0x681   : > { %7383 = vst [vmem:[%s11216_s12 + $0xc0] sm:$0xff] %v7351_v25  ;;  %v7352_v9 = vadd.f32 %v7320_v24, %v4233_v53  ;;  %v8959_v16 = vpop.f32.mrb[28].mxu1 }
 0x682   : > { %7386 = vst [vmem:[%s11216_s12 + $0xd8] sm:$0xff] %v7354_v8  ;;  %v7286_v31 = vmul.f32 %v8959_v16, %v11195_v55  ;;  %v7106_v3 = vpop.f32.mrb[29].mxu1 }
 0x683   : > { %7384 = vst [vmem:[%s11216_s12 + $0xc8] sm:$0xff] %v7352_v9  ;;  %v7284_v41 = vmul.f32 %v11195_v55, %v7106_v3  ;;  %v8960_v14 = vpop.f32.mrb[30].mxu1 }
 0x684   : > { %v7325_v0 = vadd.f32 %v11200_v7, %v7286_v31  ;;  %v7287_v12 = vmul.f32 %v8960_v14, %v11195_v55  ;;  %v7109_v45 = vpop.f32.mrb[31].mxu1 }
 0x685   : > { %v7323_v54 = vadd.f32 %v11200_v7, %v7284_v41  ;;  %v7285_v51 = vmul.f32 %v11195_v55, %v7109_v45 }
 0x686   : > { %v7357_v58 = vadd.f32 %v7325_v0, %v4238_v63  ;;  %v7326_v40 = vadd.f32 %v11200_v7, %v7287_v12 }
 0x687   : > { %v7355_v61 = vadd.f32 %v7323_v54, %v4236_v4  ;;  %v7324_v60 = vadd.f32 %v11200_v7, %v7285_v51 }
 0x688   : > { %7389 = vst [vmem:[%s11216_s12 + $0xf0] sm:$0xff] %v7357_v58  ;;  %v7358_v47 = vadd.f32 %v7326_v40, %v4239_v57 }
 0x689   : > { %7387 = vst [vmem:[%s11216_s12 + $0xe0] sm:$0xff] %v7355_v61  ;;  %v7356_v55 = vadd.f32 %v7324_v60, %v4237_v35 }
 0x68a   : > { %7390 = vst [vmem:[%s11216_s12 + $0xf8] sm:$0xff] %v7358_v47 }
 0x68b   : > { %7388 = vst [vmem:[%s11216_s12 + $0xe8] sm:$0xff] %v7356_v55 }
 0x68c   : > { %9818 = shalt.err (!%p9815_p2)
}
 0x68d   : > { %s9819_s10 = scalar_lea.hbm %s11336_s9, 4096  ;;  %s9823_s12 = scalar_lea.hbm %s11392_s7, 8192 }
 0x68e   : > { %p9820_p13 = scmp.ne.s32.totalorder %s11336_s9, %s9819_s10  ;;  %p9824_p4 = scmp.lt.u32.totalorder %s11336_s9, %s11392_s7 }
 0x68f   : > { %p9825_p5 = scmp.lt.u32.totalorder %s9823_s12, %s9819_s10  ;;  %p9827_p11 = scmp.lt.u32.totalorder %s9819_s10, %s11336_s9 }
 0x690   : > { %p9821_p6 = pnand %p9820_p13, %p11441_p0 }
 0x691   : > { %p9826_p8 = por %p9825_p5, %p9824_p4 }
 0x692   : > { %p9822_p10 = pneg %p9821_p6 }
 0x693   : > { %p9828_p1 = por %p9827_p11, %p9826_p8 }
 0x695   : > { %p9829_p3 = pnand %p9828_p1, %p9822_p10 }
 0x697   : > { %9832 = shalt.err (!%p9829_p3)
}
 0x698   : > { %s9886_s30 = smov 128   ;;  %s9887_s21 = smov 8  }
 0x699   : > { %9483 = dma.vmem_to_hbm [thread:$0]  (%p11441_p0), %s11338_s29, 4096, %s11336_s9, %s7392_s28, %s9886_s30, %s9886_s30, %s9887_s21  }
 0x69a PF: > { %s7420_s20 = sand.u32 1, %s9863_s24   ;;  %p11442_p7 = scmp.ne.s32.totalorder %s11409_s8, 0 }
 0x69b   : > { %p11443_p9 = scmp.ge.s32.totalorder %s9875_s27, 2  ;;  %s7421_s11 = scalar_lea.sflag [#allocation8], %s7420_s20 }
 0x69d   : > { %p9497_p12 = pnand %p11443_p9, %p11442_p7 }
 0x69f   : > { %9858 = dma.done.wait (!%p9497_p12), %s7421_s11, 4096  }
 0x6a0   : > { %9860 = vsyncadd (!%p9497_p12), %s7421_s11, 4294963200  ;;  %p21_p2 = scmp.ge.s32.totalorder %s10038_s13, 4   ;;  %s11444_s24 = smov %s9867_s25 }
 0x6a1   : > { %s11445_s25 = smov %s9871_s26  ;;  %s11446_s26 = smov %s10054_s17 }
 0x6a2   : > { %s11447_s27 = smov %s10038_s13  ;;  %23 = sbr.rel (!%p21_p2) target bundleno = 6 (0x6), region = 126 }
 0x6a9   :  { %7426 = vsyncpa [#allocation7], 1 }
 0x6aa   :  { %7428 = vsyncpa [#allocation7 + $0x1], 1 }
 0x6ab   :  { %7429 = vsyncpa [#allocation10], 1 }
 0x6ac   :  { %7430 = vsyncpa [#allocation8], 1 }
 0x6ad   :  { %7432 = vsyncpa [#allocation8 + $0x1], 1 }

</bundles_post_ra>
